<compile_context>
chip_gen: v7x
topology: tpu7x:2x2x1
jax: 0.10.0
libtpu: 0.0.40
codegen_flags: <defaults>
</compile_context>

<pallas_src>
import math

import numpy as np
import jax
import jax.numpy as jnp
from jax.experimental import pallas as pl
from jax.experimental.pallas import tpu as pltpu

B = 2            # batch
S = 8            # seq_len of hidden_states
H = 64           # hidden_size (must be divisible by NHEAD)
NHEAD = 8
HEAD_DIM = H // NHEAD
MAX_DEPTH = 3    # max_recursion_depth
LN_EPS = 1e-5    # PyTorch LayerNorm / TransformerEncoderLayer default
BATCH_BLOCK = 8  # batch rows per grid step

H2, H4, HALF = 2 * H, 4 * H, H // 2
LANES = 3 * 128  # packed slab width: three 128-lane tiles

# Column offsets inside the two fused projection matrices. All starts are 128-lane
# tile aligned so the in-kernel slices never straddle a vreg tile (no lane rotates).
COL_DEC = 0      # decomposer first linear -> lanes [0, 128)
COL_Q = 0        # Wq (pre-scaled)         -> lanes [0, 64)
COL_K = 128      # Wk                      -> lanes [128, 192)
COL_V = 256      # Wv                      -> lanes [256, 320)

# ---------------------------------------------------------------------------
# Packed parameter layout (2 DMA descriptors instead of 33 tensors).
#   weight slab (bf16): matrices stored [in, out], stacked along rows (16-row aligned),
#     fused/padded so every logical column block starts on a 128-lane boundary.
#   bias slab (f32): one padded row per bias / LayerNorm vector, lane 0 aligned.
# ---------------------------------------------------------------------------
_W_ORDER = [
    ("Wdkv", H, LANES),    # [dW1 | Wk | Wv]  token-0 K/V fused with decomposer matmul
    ("Wqkv1", H, LANES),   # [Wq*scale | Wk | Wv]  token-1 Q/K/V
    ("dW2", H2, H),
    ("Wo", H, H),
    ("Wf1", H, H4),
    ("Wf2", H4, H),
    ("aW1p", H, H),        # aggregator first linear, rows multiplying p0
    ("aW1s", H, H),        # aggregator first linear, rows multiplying subproblems
    ("aW2", H, H),
    ("uW1", H, HALF),
    ("uW2", HALF, 1),
    ("M", H, NHEAD),       # 0/1 head-indicator: per-head score reduction
    ("MT", NHEAD, H),      # transpose: per-head probability broadcast
]
_W_LAYOUT = {}
_r = 0
for _name, _rin, _cout in _W_ORDER:
    _W_LAYOUT[_name] = (_r, _rin, _cout)
    _r += _rin
_W_ROWS = ((_r + 15) // 16) * 16                 # pad rows to bf16 sublane packing

_B_ORDER = [
    ("db1", H2), ("dg", H2), ("dbeta", H2), ("db2", H),
    ("bq", H), ("bk", H), ("bv", H), ("bo", H),
    ("ln1g", H), ("ln1b", H),
    ("bf1", H4), ("bf2", H), ("ln2g", H), ("ln2b", H),
    ("ab1", H), ("ag", H), ("abeta", H), ("ab2", H),
    ("ub1", HALF), ("ub2", 1),
]
_B_ROW = {name: i for i, (name, _) in enumerate(_B_ORDER)}
_B_DIM = dict(_B_ORDER)
_B_ROWS = ((len(_B_ORDER) + 7) // 8) * 8

# head-indicator matrix: M[i, h] = 1 iff hidden index i belongs to head h (exact in bf16)
_M_NP = np.kron(np.eye(NHEAD, dtype=np.float32), np.ones((HEAD_DIM, 1), np.float32))


def _gelu(x):
    # TODO(synk): PyTorch nn.GELU()/F.gelu default is the exact erf GELU; the tanh
    # approximation (max abs err ~1e-3) is used for guaranteed Mosaic lowering.
    c = math.sqrt(2.0 / math.pi)
    return 0.5 * x * (1.0 + jnp.tanh(c * (x + 0.044715 * x * x * x)))


def _layernorm(x, g, b):
    # var = E[x^2] - E[x]^2: the two XLU cross-lane reductions are independent and
    # issue back-to-back (the (x-mu)^2 form serializes them through a VPU square).
    mu = jnp.mean(x, axis=-1, keepdims=True)
    ms = jnp.mean(x * x, axis=-1, keepdims=True)
    var = jnp.maximum(ms - mu * mu, 0.0)
    return (x - mu) * jax.lax.rsqrt(var + LN_EPS) * g + b


def _reasoner_kernel(hs_ref, w_ref, b_ref, out_ref, unc_ref):
    f32, bf16 = jnp.float32, jnp.bfloat16
    nb = hs_ref.shape[0]

    def wmat(name):                                  # bf16 [in, out] static sub-view
        r0, rin, cout = _W_LAYOUT[name]
        return w_ref[r0:r0 + rin, 0:cout]

    def bvec(name):                                  # f32 [1, n] static sub-view
        r = _B_ROW[name]
        return b_ref[r:r + 1, 0:_B_DIM[name]]

    def dot(x, w):                                   # bf16 MXU operands, f32 accumulate
        return jnp.dot(x.astype(bf16), w, preferred_element_type=f32)

    # token-0 read folded into the kernel: problem_repr = hidden_states[:, 0]
    p0 = hs_ref[:, 0, :].astype(f32)                 # [nb, H]

    # hoisted parameter sub-views (recursion loop is unrolled -> load once, reuse)
    Wdkv, Wqkv1, dW2 = wmat("Wdkv"), wmat("Wqkv1"), wmat("dW2")
    db1, dg, dbeta, db2 = bvec("db1"), bvec("dg"), bvec("dbeta"), bvec("db2")
    bq, bk, bv_ = bvec("bq"), bvec("bk"), bvec("bv")
    Wo, bo = wmat("Wo"), bvec("bo")
    ln1g, ln1b = bvec("ln1g"), bvec("ln1b")
    Wf1, bf1, Wf2, bf2 = wmat("Wf1"), bvec("bf1"), wmat("Wf2"), bvec("bf2")
    ln2g, ln2b = bvec("ln2g"), bvec("ln2b")
    Mf = wmat("M").astype(f32)                       # keep scores in f32
    MTf = wmat("MT").astype(f32)

    # p0 half of the aggregator depends only on the input -> off the critical path.
    a_p0 = dot(p0, wmat("aW1p")) + bvec("ab1")       # [nb, H]

    def dec_and_kv(x):
        """Fused: decomposer first linear + token-0 K/V projections in one matmul."""
        pre = dot(x, Wdkv)                           # [nb, 384]
        h1 = pre[:, COL_DEC:COL_DEC + H2] + db1      # decomposer pre-activation
        k0 = pre[:, COL_K:COL_K + H] + bk            # K of sequence token 0 (= x)
        v0 = pre[:, COL_V:COL_V + H] + bv_           # V of sequence token 0
        return h1, k0, v0

    def dec_post(h1):
        # LayerNorm -> GELU -> Dropout (eval: identity) -> Linear(2H, H)
        return dot(_gelu(_layernorm(h1, dg, dbeta)), dW2) + db2

    def encoder_token1(x_sub, k0, v0):
        # nn.TransformerEncoderLayer (post-norm, 8 heads, ff=4H, gelu) on the sequence
        # [x, sub, 0]; only the layer output at token 1 is needed.
        qkv = dot(x_sub, Wqkv1)                      # [nb, 384]
        q1 = qkv[:, COL_Q:COL_Q + H] + bq            # 1/sqrt(head_dim) baked into Wq/bq
        k1 = qkv[:, COL_K:COL_K + H] + bk
        v1 = qkv[:, COL_V:COL_V + H] + bv_
        # zero token: K = bk, V = bv (0 @ W + b). Per-head score reduction via the 0/1
        # indicator matmul, in f32 (no reshape/transpose, no bf16 rounding of q*k).
        qk = jnp.concatenate([q1 * k0, q1 * k1, q1 * bk], axis=0)        # [3nb, H]
        s = jnp.dot(qk, Mf, preferred_element_type=f32)                  # [3nb, NHEAD]
        s0, s1, s2 = s[0:nb], s[nb:2 * nb], s[2 * nb:3 * nb]
        m = jnp.maximum(jnp.maximum(s0, s1), s2)
        e0, e1, e2 = jnp.exp(s0 - m), jnp.exp(s1 - m), jnp.exp(s2 - m)
        inv = pl.reciprocal(e0 + e1 + e2, approx=True)   # EUP slot; ~1e-4 vs exact div
        pr = jnp.concatenate([e0 * inv, e1 * inv, e2 * inv], axis=0)     # [3nb, NHEAD]
        wts = jnp.dot(pr, MTf, preferred_element_type=f32)               # [3nb, H]
        attn = wts[0:nb] * v0 + wts[nb:2 * nb] * v1 + wts[2 * nb:3 * nb] * bv_
        attn = dot(attn, Wo) + bo
        y = _layernorm(x_sub + attn, ln1g, ln1b)         # post-norm residual 1
        ff = dot(_gelu(dot(y, Wf1) + bf1), Wf2) + bf2
        return _layernorm(y + ff, ln2g, ln2b)            # post-norm residual 2

    # --- recursive decomposition ---
    # TODO(synk): PyTorch gates each level with random.random() < recursion_temperature
    # and supports attention_mask; fixed here to the deterministic always-recurse-to-
    # max_recursion_depth path with attention_mask=None.
    x = p0
    for _ in range(MAX_DEPTH):
        h1, k0, v0 = dec_and_kv(x)
        sub = dec_post(h1)
        x = encoder_token1(sub, k0, v0)
    h1, _, _ = dec_and_kv(x)                 # depth == max -> decomposer(x) directly
    subproblems = dec_post(h1)

    # --- aggregation: aggregator(cat([p0, subproblems], -1)), aW1 split by rows ---
    a = a_p0 + dot(subproblems, wmat("aW1s"))
    a = _gelu(_layernorm(a, bvec("ag"), bvec("abeta")))
    solution = dot(a, wmat("aW2")) + bvec("ab2")                          # [nb, H]

    # --- uncertainty estimator (confidence metadata) ---
    u = _gelu(dot(solution, wmat("uW1")) + bvec("ub1"))
    u = dot(u, wmat("uW2")) + bvec("ub2")                                 # [nb, 1]
    unc = 1.0 / (1.0 + jnp.exp(-u))

    # token-0 writeback folded into the kernel. The output block is aliased with the
    # input block, but the pipelined out_spec writes the whole tile back, so copy the
    # block and overwrite row 0 only.
    out_ref[...] = hs_ref[...]
    out_ref[:, 0, :] = solution.astype(out_ref.dtype)
    unc_ref[...] = jnp.broadcast_to(unc, (nb, H)).astype(unc_ref.dtype)


def init_params(key):
    """Deterministic synthetic parameters (weights stored [in, out]; biases 1-D).
    NOTE: PyTorch nn.Linear stores [out, in]; real checkpoints must be transposed,
    in_proj_weight split into Wq/Wk/Wv, and aW1 rows [0:H] must multiply p0 /
    rows [H:2H] subproblems (torch.cat order)."""
    ks = iter(jax.random.split(key, 32))

    def W(*shape):
        return np.asarray(jax.random.normal(next(ks), shape, jnp.float32)) * 0.02

    ones = lambda n: np.ones((n,), np.float32)
    zeros = lambda n: np.zeros((n,), np.float32)
    return {
        # decomposer: Linear(H,2H) -> LayerNorm(2H) -> GELU -> Dropout -> Linear(2H,H)
        "dW1": W(H, H2), "db1": W(H2), "dg": ones(H2), "dbeta": zeros(H2),
        "dW2": W(H2, H), "db2": W(H),
        # TransformerEncoderLayer (nhead=8, ff=4H, gelu, post-norm)
        "Wq": W(H, H), "Wk": W(H, H), "Wv": W(H, H),
        "bq": W(H), "bk": W(H), "bv": W(H),
        "Wo": W(H, H), "bo": W(H),
        "ln1g": ones(H), "ln1b": zeros(H),
        "Wf1": W(H, H4), "bf1": W(H4),
        "Wf2": W(H4, H), "bf2": W(H),
        "ln2g": ones(H), "ln2b": zeros(H),
        # aggregator: Linear(2H,H) -> LayerNorm(H) -> GELU -> Dropout -> Linear(H,H)
        "aW1": W(H2, H), "ab1": W(H),
        "ag": ones(H), "abeta": zeros(H),
        "aW2": W(H, H), "ab2": W(H),
        # uncertainty estimator: Linear(H,H/2) -> GELU -> Linear(H/2,1) -> Sigmoid
        "uW1": W(H, HALF), "ub1": W(HALF),
        "uW2": W(HALF, 1), "ub2": W(1),
    }


def pack_params(p):
    """Pack all parameters into one bf16 weight slab and one f32 bias slab.
    Every logical column block starts on a 128-lane boundary and every bias sits at
    lane 0 of its own row, so the in-kernel slices need no lane rotates."""
    scale = 1.0 / math.sqrt(HEAD_DIM)

    w = np.zeros((_W_ROWS, LANES), np.float32)

    def put(name, mat):
        r0, rin, cout = _W_LAYOUT[name]
        w[r0:r0 + rin, :cout] = np.asarray(mat, np.float32).reshape(rin, cout)

    wdkv = np.zeros((H, LANES), np.float32)
    wdkv[:, COL_DEC:COL_DEC + H2] = np.asarray(p["dW1"], np.float32)
    wdkv[:, COL_K:COL_K + H] = np.asarray(p["Wk"], np.float32)
    wdkv[:, COL_V:COL_V + H] = np.asarray(p["Wv"], np.float32)
    put("Wdkv", wdkv)

    wqkv1 = np.zeros((H, LANES), np.float32)
    wqkv1[:, COL_Q:COL_Q + H] = np.asarray(p["Wq"], np.float32) * scale  # bake softmax scale
    wqkv1[:, COL_K:COL_K + H] = np.asarray(p["Wk"], np.float32)
    wqkv1[:, COL_V:COL_V + H] = np.asarray(p["Wv"], np.float32)
    put("Wqkv1", wqkv1)

    put("dW2", p["dW2"]); put("Wo", p["Wo"])
    put("Wf1", p["Wf1"]); put("Wf2", p["Wf2"])
    put("aW1p", np.asarray(p["aW1"], np.float32)[:H])    # rows multiplying p0
    put("aW1s", np.asarray(p["aW1"], np.float32)[H:])    # rows multiplying subproblems
    put("aW2", p["aW2"])
    put("uW1", p["uW1"]); put("uW2", p["uW2"])
    put("M", _M_NP); put("MT", np.ascontiguousarray(_M_NP.T))

    b = np.zeros((_B_ROWS, LANES), np.float32)
    bias = dict(p)
    bias["bq"] = np.asarray(p["bq"], np.float32) * scale                 # bake softmax scale
    for name, n in _B_ORDER:
        b[_B_ROW[name], :n] = np.asarray(bias[name], np.float32).reshape(-1)

    # bf16 weights: single-pass MXU matmuls with f32 accumulation + half the DMA bytes.
    return jnp.asarray(w, jnp.bfloat16), jnp.asarray(b, jnp.float32)


@jax.jit
def recursive_reasoner_forward(hidden_states, w_slab, b_slab):
    b, s, h = hidden_states.shape
    bb = min(BATCH_BLOCK, b)                     # batch rows per grid step
    pb = pl.cdiv(b, bb) * bb
    hs = hidden_states if pb == b else jnp.pad(
        hidden_states, ((0, pb - b), (0, 0), (0, 0)))

    out_hidden, unc = pl.pallas_call(
        _reasoner_kernel,
        grid=(pb // bb,),
        in_specs=[
            pl.BlockSpec((bb, s, h), lambda i: (i, 0, 0)),
            pl.BlockSpec(w_slab.shape, lambda i: (0, 0)),   # resident across the grid
            pl.BlockSpec(b_slab.shape, lambda i: (0, 0)),   # resident across the grid
        ],
        out_specs=[
            pl.BlockSpec((bb, s, h), lambda i: (i, 0, 0)),
            pl.BlockSpec((bb, h), lambda i: (i, 0)),
        ],
        out_shape=[
            jax.ShapeDtypeStruct((pb, s, h), hidden_states.dtype),
            jax.ShapeDtypeStruct((pb, h), jnp.float32),
        ],
        input_output_aliases={0: 0},             # hidden_states buffer reused in place
        compiler_params=pltpu.CompilerParams(
            dimension_semantics=("parallel",)),  # batch grid shards across v7x's 2 TCs
    )(hs, w_slab, b_slab)

    return out_hidden[:b], unc[:b, :1]


if __name__ == "__main__":
    key = jax.random.PRNGKey(0)
    k_x, k_p = jax.random.split(key)
    hidden_states = jax.random.normal(k_x, (B, S, H), jnp.float32)
    w_slab, b_slab = pack_params(init_params(k_p))

    out, unc = recursive_reasoner_forward(hidden_states, w_slab, b_slab)
    out = jax.block_until_ready(out)
    unc = jax.block_until_ready(unc)

    assert out.shape == (B, S, H) and out.dtype == jnp.float32
    assert unc.shape == (B, 1)
    assert bool(jnp.all(jnp.isfinite(out))) and bool(jnp.all(jnp.isfinite(unc)))
    # tokens 1..S-1 must be untouched (only token 0 is replaced)
    assert bool(jnp.all(out[:, 1:, :] == hidden_states[:, 1:, :]))
    print("KERNEL_OK")
</pallas_src>

<mosaic_0001>
module attributes {stable_mosaic.version = 11 : i64} {
  func.func @_reasoner_kernel(%arg0: i32, %arg1: memref<2x8x64xf32, #tpu.memory_space<vmem>>, %arg2: memref<1008x384xbf16, #tpu.memory_space<vmem>>, %arg3: memref<24x384xf32, #tpu.memory_space<vmem>>, %arg4: memref<2x8x64xf32, #tpu.memory_space<vmem>>, %arg5: memref<2x64xf32, #tpu.memory_space<vmem>>) attributes {dimension_semantics = [#tpu.dimension_semantics<parallel>], iteration_bounds = array<i64: 1>, scalar_prefetch = 0 : i64, scratch_operands = 0 : i64, tpu.core_type = #tpu.core_type<tc>, window_params = [{transform_indices = @transform_0, window_bounds = array<i64: 2, 8, 64>}, {pipeline_mode = #tpu.pipeline_mode<synchronous>, transform_indices = @transform_1, window_bounds = array<i64: 1008, 384>}, {pipeline_mode = #tpu.pipeline_mode<synchronous>, transform_indices = @transform_2, window_bounds = array<i64: 24, 384>}, {transform_indices = @transform_3, window_bounds = array<i64: 2, 8, 64>}, {transform_indices = @transform_4, window_bounds = array<i64: 2, 64>}]} {
    %c0 = arith.constant 0 : index
    %c0_0 = arith.constant 0 : index
    %c0_1 = arith.constant 0 : index
    %0 = vector.load %arg1[%c0, %c0_0, %c0_1] : memref<2x8x64xf32, #tpu.memory_space<vmem>>, vector<2x1x64xf32>
    %1 = vector.shape_cast %0 : vector<2x1x64xf32> to vector<2x64xf32>
    %c0_2 = arith.constant 0 : index
    %c0_3 = arith.constant 0 : index
    %2 = vector.load %arg2[%c0_2, %c0_3] : memref<1008x384xbf16, #tpu.memory_space<vmem>>, vector<64x384xbf16>
    %c64 = arith.constant 64 : index
    %c0_4 = arith.constant 0 : index
    %3 = vector.load %arg2[%c64, %c0_4] : memref<1008x384xbf16, #tpu.memory_space<vmem>>, vector<64x384xbf16>
    %c128 = arith.constant 128 : index
    %c0_5 = arith.constant 0 : index
    %4 = vector.load %arg2[%c128, %c0_5] : memref<1008x384xbf16, #tpu.memory_space<vmem>>, vector<128x64xbf16>
    %c0_6 = arith.constant 0 : index
    %c0_7 = arith.constant 0 : index
    %5 = vector.load %arg3[%c0_6, %c0_7] : memref<24x384xf32, #tpu.memory_space<vmem>>, vector<1x128xf32>
    %c1 = arith.constant 1 : index
    %c0_8 = arith.constant 0 : index
    %6 = vector.load %arg3[%c1, %c0_8] : memref<24x384xf32, #tpu.memory_space<vmem>>, vector<1x128xf32>
    %c2 = arith.constant 2 : index
    %c0_9 = arith.constant 0 : index
    %7 = vector.load %arg3[%c2, %c0_9] : memref<24x384xf32, #tpu.memory_space<vmem>>, vector<1x128xf32>
    %c3 = arith.constant 3 : index
    %c0_10 = arith.constant 0 : index
    %8 = vector.load %arg3[%c3, %c0_10] : memref<24x384xf32, #tpu.memory_space<vmem>>, vector<1x64xf32>
    %c4 = arith.constant 4 : index
    %c0_11 = arith.constant 0 : index
    %9 = vector.load %arg3[%c4, %c0_11] : memref<24x384xf32, #tpu.memory_space<vmem>>, vector<1x64xf32>
    %c5 = arith.constant 5 : index
    %c0_12 = arith.constant 0 : index
    %10 = vector.load %arg3[%c5, %c0_12] : memref<24x384xf32, #tpu.memory_space<vmem>>, vector<1x64xf32>
    %c6 = arith.constant 6 : index
    %c0_13 = arith.constant 0 : index
    %11 = vector.load %arg3[%c6, %c0_13] : memref<24x384xf32, #tpu.memory_space<vmem>>, vector<1x64xf32>
    %c256 = arith.constant 256 : index
    %c0_14 = arith.constant 0 : index
    %12 = vector.load %arg2[%c256, %c0_14] : memref<1008x384xbf16, #tpu.memory_space<vmem>>, vector<64x64xbf16>
    %c7 = arith.constant 7 : index
    %c0_15 = arith.constant 0 : index
    %13 = vector.load %arg3[%c7, %c0_15] : memref<24x384xf32, #tpu.memory_space<vmem>>, vector<1x64xf32>
    %c8 = arith.constant 8 : index
    %c0_16 = arith.constant 0 : index
    %14 = vector.load %arg3[%c8, %c0_16] : memref<24x384xf32, #tpu.memory_space<vmem>>, vector<1x64xf32>
    %c9 = arith.constant 9 : index
    %c0_17 = arith.constant 0 : index
    %15 = vector.load %arg3[%c9, %c0_17] : memref<24x384xf32, #tpu.memory_space<vmem>>, vector<1x64xf32>
    %c320 = arith.constant 320 : index
    %c0_18 = arith.constant 0 : index
    %16 = vector.load %arg2[%c320, %c0_18] : memref<1008x384xbf16, #tpu.memory_space<vmem>>, vector<64x256xbf16>
    %c10 = arith.constant 10 : index
    %c0_19 = arith.constant 0 : index
    %17 = vector.load %arg3[%c10, %c0_19] : memref<24x384xf32, #tpu.memory_space<vmem>>, vector<1x256xf32>
    %c384 = arith.constant 384 : index
    %c0_20 = arith.constant 0 : index
    %18 = vector.load %arg2[%c384, %c0_20] : memref<1008x384xbf16, #tpu.memory_space<vmem>>, vector<256x64xbf16>
    %c11 = arith.constant 11 : index
    %c0_21 = arith.constant 0 : index
    %19 = vector.load %arg3[%c11, %c0_21] : memref<24x384xf32, #tpu.memory_space<vmem>>, vector<1x64xf32>
    %c12 = arith.constant 12 : index
    %c0_22 = arith.constant 0 : index
    %20 = vector.load %arg3[%c12, %c0_22] : memref<24x384xf32, #tpu.memory_space<vmem>>, vector<1x64xf32>
    %c13 = arith.constant 13 : index
    %c0_23 = arith.constant 0 : index
    %21 = vector.load %arg3[%c13, %c0_23] : memref<24x384xf32, #tpu.memory_space<vmem>>, vector<1x64xf32>
    %c928 = arith.constant 928 : index
    %c0_24 = arith.constant 0 : index
    %22 = vector.load %arg2[%c928, %c0_24] : memref<1008x384xbf16, #tpu.memory_space<vmem>>, vector<64x8xbf16>
    %23 = arith.extf %22 : vector<64x8xbf16> to vector<64x8xf32>
    %c992 = arith.constant 992 : index
    %c0_25 = arith.constant 0 : index
    %24 = vector.load %arg2[%c992, %c0_25] : memref<1008x384xbf16, #tpu.memory_space<vmem>>, vector<8x64xbf16>
    %25 = arith.extf %24 : vector<8x64xbf16> to vector<8x64xf32>
    %c640 = arith.constant 640 : index
    %c0_26 = arith.constant 0 : index
    %26 = vector.load %arg2[%c640, %c0_26] : memref<1008x384xbf16, #tpu.memory_space<vmem>>, vector<64x64xbf16>
    %27 = arith.truncf %1 : vector<2x64xf32> to vector<2x64xbf16>
    %cst = arith.constant dense<0.000000e+00> : vector<2x64xf32>
    %28 = tpu.matmul %27, %26, %cst {dimension_numbers = #tpu.dot_dimension_numbers<[1], [0], [0], [1], [0, 0, 1, 1], [], []>} : vector<2x64xbf16>, vector<64x64xbf16>, vector<2x64xf32> -> vector<2x64xf32>
    %c14 = arith.constant 14 : index
    %c0_27 = arith.constant 0 : index
    %29 = vector.load %arg3[%c14, %c0_27] : memref<24x384xf32, #tpu.memory_space<vmem>>, vector<1x64xf32>
    %30 = vector.broadcast %29 : vector<1x64xf32> to vector<2x64xf32>
    %31 = arith.addf %28, %30 : vector<2x64xf32>
    %32 = arith.truncf %1 : vector<2x64xf32> to vector<2x64xbf16>
    %cst_28 = arith.constant dense<0.000000e+00> : vector<2x384xf32>
    %33 = tpu.matmul %32, %2, %cst_28 {dimension_numbers = #tpu.dot_dimension_numbers<[1], [0], [0], [1], [0, 0, 1, 1], [], []>} : vector<2x64xbf16>, vector<64x384xbf16>, vector<2x384xf32> -> vector<2x384xf32>
    %34 = vector.extract_strided_slice %33 {offsets = [0, 0], sizes = [2, 128], strides = [1, 1]} : vector<2x384xf32> to vector<2x128xf32>
    %35 = vector.broadcast %5 : vector<1x128xf32> to vector<2x128xf32>
    %36 = arith.addf %34, %35 : vector<2x128xf32>
    %37 = vector.extract_strided_slice %33 {offsets = [0, 128], sizes = [2, 64], strides = [1, 1]} : vector<2x384xf32> to vector<2x64xf32>
    %38 = vector.broadcast %10 : vector<1x64xf32> to vector<2x64xf32>
    %39 = arith.addf %37, %38 : vector<2x64xf32>
    %40 = vector.extract_strided_slice %33 {offsets = [0, 256], sizes = [2, 64], strides = [1, 1]} : vector<2x384xf32> to vector<2x64xf32>
    %41 = vector.broadcast %11 : vector<1x64xf32> to vector<2x64xf32>
    %42 = arith.addf %40, %41 : vector<2x64xf32>
    %cst_29 = arith.constant dense<0.000000e+00> : vector<2xf32>
    %43 = vector.multi_reduction <add>, %36, %cst_29 [1] : vector<2x128xf32> to vector<2xf32>
    %44 = vector.shape_cast %43 : vector<2xf32> to vector<2x1xf32>
    %cst_30 = arith.constant 1.280000e+02 : f32
    %45 = vector.broadcast %cst_30 : f32 to vector<2x1xf32>
    %46 = arith.divf %44, %45 : vector<2x1xf32>
    %47 = arith.mulf %36, %36 : vector<2x128xf32>
    %cst_31 = arith.constant dense<0.000000e+00> : vector<2xf32>
    %48 = vector.multi_reduction <add>, %47, %cst_31 [1] : vector<2x128xf32> to vector<2xf32>
    %49 = vector.shape_cast %48 : vector<2xf32> to vector<2x1xf32>
    %cst_32 = arith.constant 1.280000e+02 : f32
    %50 = vector.broadcast %cst_32 : f32 to vector<2x1xf32>
    %51 = arith.divf %49, %50 : vector<2x1xf32>
    %52 = arith.mulf %46, %46 : vector<2x1xf32>
    %53 = arith.subf %51, %52 : vector<2x1xf32>
    %cst_33 = arith.constant 0.000000e+00 : f32
    %54 = vector.broadcast %cst_33 : f32 to vector<2x1xf32>
    %55 = arith.maximumf %53, %54 : vector<2x1xf32>
    %56 = vector.broadcast %46 : vector<2x1xf32> to vector<2x128xf32>
    %57 = arith.subf %36, %56 : vector<2x128xf32>
    %cst_34 = arith.constant 9.99999974E-6 : f32
    %58 = vector.broadcast %cst_34 : f32 to vector<2x1xf32>
    %59 = arith.addf %55, %58 : vector<2x1xf32>
    %60 = math.rsqrt %59 : vector<2x1xf32>
    %61 = vector.broadcast %60 : vector<2x1xf32> to vector<2x128xf32>
    %62 = arith.mulf %57, %61 : vector<2x128xf32>
    %63 = vector.broadcast %6 : vector<1x128xf32> to vector<2x128xf32>
    %64 = arith.mulf %62, %63 : vector<2x128xf32>
    %65 = vector.broadcast %7 : vector<1x128xf32> to vector<2x128xf32>
    %66 = arith.addf %64, %65 : vector<2x128xf32>
    %cst_35 = arith.constant 5.000000e-01 : f32
    %67 = vector.broadcast %cst_35 : f32 to vector<2x128xf32>
    %68 = arith.mulf %67, %66 : vector<2x128xf32>
    %cst_36 = arith.constant 4.471500e-02 : f32
    %69 = vector.broadcast %cst_36 : f32 to vector<2x128xf32>
    %70 = arith.mulf %69, %66 : vector<2x128xf32>
    %71 = arith.mulf %70, %66 : vector<2x128xf32>
    %72 = arith.mulf %71, %66 : vector<2x128xf32>
    %73 = arith.addf %66, %72 : vector<2x128xf32>
    %cst_37 = arith.constant 0.797884583 : f32
    %74 = vector.broadcast %cst_37 : f32 to vector<2x128xf32>
    %75 = arith.mulf %74, %73 : vector<2x128xf32>
    %76 = math.tanh %75 : vector<2x128xf32>
    %cst_38 = arith.constant 1.000000e+00 : f32
    %77 = vector.broadcast %cst_38 : f32 to vector<2x128xf32>
    %78 = arith.addf %77, %76 : vector<2x128xf32>
    %79 = arith.mulf %68, %78 : vector<2x128xf32>
    %80 = arith.truncf %79 : vector<2x128xf32> to vector<2x128xbf16>
    %cst_39 = arith.constant dense<0.000000e+00> : vector<2x64xf32>
    %81 = tpu.matmul %80, %4, %cst_39 {dimension_numbers = #tpu.dot_dimension_numbers<[1], [0], [0], [1], [0, 0, 1, 1], [], []>} : vector<2x128xbf16>, vector<128x64xbf16>, vector<2x64xf32> -> vector<2x64xf32>
    %82 = vector.broadcast %8 : vector<1x64xf32> to vector<2x64xf32>
    %83 = arith.addf %81, %82 : vector<2x64xf32>
    %84 = arith.truncf %83 : vector<2x64xf32> to vector<2x64xbf16>
    %cst_40 = arith.constant dense<0.000000e+00> : vector<2x384xf32>
    %85 = tpu.matmul %84, %3, %cst_40 {dimension_numbers = #tpu.dot_dimension_numbers<[1], [0], [0], [1], [0, 0, 1, 1], [], []>} : vector<2x64xbf16>, vector<64x384xbf16>, vector<2x384xf32> -> vector<2x384xf32>
    %86 = vector.extract_strided_slice %85 {offsets = [0, 0], sizes = [2, 64], strides = [1, 1]} : vector<2x384xf32> to vector<2x64xf32>
    %87 = vector.broadcast %9 : vector<1x64xf32> to vector<2x64xf32>
    %88 = arith.addf %86, %87 : vector<2x64xf32>
    %89 = vector.extract_strided_slice %85 {offsets = [0, 128], sizes = [2, 64], strides = [1, 1]} : vector<2x384xf32> to vector<2x64xf32>
    %90 = vector.broadcast %10 : vector<1x64xf32> to vector<2x64xf32>
    %91 = arith.addf %89, %90 : vector<2x64xf32>
    %92 = vector.extract_strided_slice %85 {offsets = [0, 256], sizes = [2, 64], strides = [1, 1]} : vector<2x384xf32> to vector<2x64xf32>
    %93 = vector.broadcast %11 : vector<1x64xf32> to vector<2x64xf32>
    %94 = arith.addf %92, %93 : vector<2x64xf32>
    %95 = arith.mulf %88, %39 : vector<2x64xf32>
    %96 = arith.mulf %88, %91 : vector<2x64xf32>
    %97 = vector.broadcast %10 : vector<1x64xf32> to vector<2x64xf32>
    %98 = arith.mulf %88, %97 : vector<2x64xf32>
    %99 = tpu.concatenate %95, %96, %98 in 0 : vector<2x64xf32>, vector<2x64xf32>, vector<2x64xf32> -> vector<6x64xf32>
    %cst_41 = arith.constant dense<0.000000e+00> : vector<6x8xf32>
    %100 = tpu.matmul %99, %23, %cst_41 {dimension_numbers = #tpu.dot_dimension_numbers<[1], [0], [0], [1], [0, 0, 1, 1], [], []>} : vector<6x64xf32>, vector<64x8xf32>, vector<6x8xf32> -> vector<6x8xf32>
    %101 = vector.extract_strided_slice %100 {offsets = [0, 0], sizes = [2, 8], strides = [1, 1]} : vector<6x8xf32> to vector<2x8xf32>
    %102 = vector.extract_strided_slice %100 {offsets = [2, 0], sizes = [2, 8], strides = [1, 1]} : vector<6x8xf32> to vector<2x8xf32>
    %103 = vector.extract_strided_slice %100 {offsets = [4, 0], sizes = [2, 8], strides = [1, 1]} : vector<6x8xf32> to vector<2x8xf32>
    %104 = arith.maximumf %101, %102 : vector<2x8xf32>
    %105 = arith.maximumf %104, %103 : vector<2x8xf32>
    %106 = arith.subf %101, %105 : vector<2x8xf32>
    %107 = math.exp %106 : vector<2x8xf32>
    %108 = arith.subf %102, %105 : vector<2x8xf32>
    %109 = math.exp %108 : vector<2x8xf32>
    %110 = arith.subf %103, %105 : vector<2x8xf32>
    %111 = math.exp %110 : vector<2x8xf32>
    %112 = arith.addf %107, %109 : vector<2x8xf32>
    %113 = arith.addf %112, %111 : vector<2x8xf32>
    %114 = tpu.reciprocal %113 {approx = true} : vector<2x8xf32> -> vector<2x8xf32>
    %115 = arith.mulf %107, %114 : vector<2x8xf32>
    %116 = arith.mulf %109, %114 : vector<2x8xf32>
    %117 = arith.mulf %111, %114 : vector<2x8xf32>
    %118 = tpu.concatenate %115, %116, %117 in 0 : vector<2x8xf32>, vector<2x8xf32>, vector<2x8xf32> -> vector<6x8xf32>
    %cst_42 = arith.constant dense<0.000000e+00> : vector<6x64xf32>
    %119 = tpu.matmul %118, %25, %cst_42 {dimension_numbers = #tpu.dot_dimension_numbers<[1], [0], [0], [1], [0, 0, 1, 1], [], []>} : vector<6x8xf32>, vector<8x64xf32>, vector<6x64xf32> -> vector<6x64xf32>
    %120 = vector.extract_strided_slice %119 {offsets = [0, 0], sizes = [2, 64], strides = [1, 1]} : vector<6x64xf32> to vector<2x64xf32>
    %121 = arith.mulf %120, %42 : vector<2x64xf32>
    %122 = vector.extract_strided_slice %119 {offsets = [2, 0], sizes = [2, 64], strides = [1, 1]} : vector<6x64xf32> to vector<2x64xf32>
    %123 = arith.mulf %122, %94 : vector<2x64xf32>
    %124 = arith.addf %121, %123 : vector<2x64xf32>
    %125 = vector.extract_strided_slice %119 {offsets = [4, 0], sizes = [2, 64], strides = [1, 1]} : vector<6x64xf32> to vector<2x64xf32>
    %126 = vector.broadcast %11 : vector<1x64xf32> to vector<2x64xf32>
    %127 = arith.mulf %125, %126 : vector<2x64xf32>
    %128 = arith.addf %124, %127 : vector<2x64xf32>
    %129 = arith.truncf %128 : vector<2x64xf32> to vector<2x64xbf16>
    %cst_43 = arith.constant dense<0.000000e+00> : vector<2x64xf32>
    %130 = tpu.matmul %129, %12, %cst_43 {dimension_numbers = #tpu.dot_dimension_numbers<[1], [0], [0], [1], [0, 0, 1, 1], [], []>} : vector<2x64xbf16>, vector<64x64xbf16>, vector<2x64xf32> -> vector<2x64xf32>
    %131 = vector.broadcast %13 : vector<1x64xf32> to vector<2x64xf32>
    %132 = arith.addf %130, %131 : vector<2x64xf32>
    %133 = arith.addf %83, %132 : vector<2x64xf32>
    %cst_44 = arith.constant dense<0.000000e+00> : vector<2xf32>
    %134 = vector.multi_reduction <add>, %133, %cst_44 [1] : vector<2x64xf32> to vector<2xf32>
    %135 = vector.shape_cast %134 : vector<2xf32> to vector<2x1xf32>
    %cst_45 = arith.constant 6.400000e+01 : f32
    %136 = vector.broadcast %cst_45 : f32 to vector<2x1xf32>
    %137 = arith.divf %135, %136 : vector<2x1xf32>
    %138 = arith.mulf %133, %133 : vector<2x64xf32>
    %cst_46 = arith.constant dense<0.000000e+00> : vector<2xf32>
    %139 = vector.multi_reduction <add>, %138, %cst_46 [1] : vector<2x64xf32> to vector<2xf32>
    %140 = vector.shape_cast %139 : vector<2xf32> to vector<2x1xf32>
    %cst_47 = arith.constant 6.400000e+01 : f32
    %141 = vector.broadcast %cst_47 : f32 to vector<2x1xf32>
    %142 = arith.divf %140, %141 : vector<2x1xf32>
    %143 = arith.mulf %137, %137 : vector<2x1xf32>
    %144 = arith.subf %142, %143 : vector<2x1xf32>
    %cst_48 = arith.constant 0.000000e+00 : f32
    %145 = vector.broadcast %cst_48 : f32 to vector<2x1xf32>
    %146 = arith.maximumf %144, %145 : vector<2x1xf32>
    %147 = vector.broadcast %137 : vector<2x1xf32> to vector<2x64xf32>
    %148 = arith.subf %133, %147 : vector<2x64xf32>
    %cst_49 = arith.constant 9.99999974E-6 : f32
    %149 = vector.broadcast %cst_49 : f32 to vector<2x1xf32>
    %150 = arith.addf %146, %149 : vector<2x1xf32>
    %151 = math.rsqrt %150 : vector<2x1xf32>
    %152 = vector.broadcast %151 : vector<2x1xf32> to vector<2x64xf32>
    %153 = arith.mulf %148, %152 : vector<2x64xf32>
    %154 = vector.broadcast %14 : vector<1x64xf32> to vector<2x64xf32>
    %155 = arith.mulf %153, %154 : vector<2x64xf32>
    %156 = vector.broadcast %15 : vector<1x64xf32> to vector<2x64xf32>
    %157 = arith.addf %155, %156 : vector<2x64xf32>
    %158 = arith.truncf %157 : vector<2x64xf32> to vector<2x64xbf16>
    %cst_50 = arith.constant dense<0.000000e+00> : vector<2x256xf32>
    %159 = tpu.matmul %158, %16, %cst_50 {dimension_numbers = #tpu.dot_dimension_numbers<[1], [0], [0], [1], [0, 0, 1, 1], [], []>} : vector<2x64xbf16>, vector<64x256xbf16>, vector<2x256xf32> -> vector<2x256xf32>
    %160 = vector.broadcast %17 : vector<1x256xf32> to vector<2x256xf32>
    %161 = arith.addf %159, %160 : vector<2x256xf32>
    %cst_51 = arith.constant 5.000000e-01 : f32
    %162 = vector.broadcast %cst_51 : f32 to vector<2x256xf32>
    %163 = arith.mulf %162, %161 : vector<2x256xf32>
    %cst_52 = arith.constant 4.471500e-02 : f32
    %164 = vector.broadcast %cst_52 : f32 to vector<2x256xf32>
    %165 = arith.mulf %164, %161 : vector<2x256xf32>
    %166 = arith.mulf %165, %161 : vector<2x256xf32>
    %167 = arith.mulf %166, %161 : vector<2x256xf32>
    %168 = arith.addf %161, %167 : vector<2x256xf32>
    %cst_53 = arith.constant 0.797884583 : f32
    %169 = vector.broadcast %cst_53 : f32 to vector<2x256xf32>
    %170 = arith.mulf %169, %168 : vector<2x256xf32>
    %171 = math.tanh %170 : vector<2x256xf32>
    %cst_54 = arith.constant 1.000000e+00 : f32
    %172 = vector.broadcast %cst_54 : f32 to vector<2x256xf32>
    %173 = arith.addf %172, %171 : vector<2x256xf32>
    %174 = arith.mulf %163, %173 : vector<2x256xf32>
    %175 = arith.truncf %174 : vector<2x256xf32> to vector<2x256xbf16>
    %cst_55 = arith.constant dense<0.000000e+00> : vector<2x64xf32>
    %176 = tpu.matmul %175, %18, %cst_55 {dimension_numbers = #tpu.dot_dimension_numbers<[1], [0], [0], [1], [0, 0, 1, 1], [], []>} : vector<2x256xbf16>, vector<256x64xbf16>, vector<2x64xf32> -> vector<2x64xf32>
    %177 = vector.broadcast %19 : vector<1x64xf32> to vector<2x64xf32>
    %178 = arith.addf %176, %177 : vector<2x64xf32>
    %179 = arith.addf %157, %178 : vector<2x64xf32>
    %cst_56 = arith.constant dense<0.000000e+00> : vector<2xf32>
    %180 = vector.multi_reduction <add>, %179, %cst_56 [1] : vector<2x64xf32> to vector<2xf32>
    %181 = vector.shape_cast %180 : vector<2xf32> to vector<2x1xf32>
    %cst_57 = arith.constant 6.400000e+01 : f32
    %182 = vector.broadcast %cst_57 : f32 to vector<2x1xf32>
    %183 = arith.divf %181, %182 : vector<2x1xf32>
    %184 = arith.mulf %179, %179 : vector<2x64xf32>
    %cst_58 = arith.constant dense<0.000000e+00> : vector<2xf32>
    %185 = vector.multi_reduction <add>, %184, %cst_58 [1] : vector<2x64xf32> to vector<2xf32>
    %186 = vector.shape_cast %185 : vector<2xf32> to vector<2x1xf32>
    %cst_59 = arith.constant 6.400000e+01 : f32
    %187 = vector.broadcast %cst_59 : f32 to vector<2x1xf32>
    %188 = arith.divf %186, %187 : vector<2x1xf32>
    %189 = arith.mulf %183, %183 : vector<2x1xf32>
    %190 = arith.subf %188, %189 : vector<2x1xf32>
    %cst_60 = arith.constant 0.000000e+00 : f32
    %191 = vector.broadcast %cst_60 : f32 to vector<2x1xf32>
    %192 = arith.maximumf %190, %191 : vector<2x1xf32>
    %193 = vector.broadcast %183 : vector<2x1xf32> to vector<2x64xf32>
    %194 = arith.subf %179, %193 : vector<2x64xf32>
    %cst_61 = arith.constant 9.99999974E-6 : f32
    %195 = vector.broadcast %cst_61 : f32 to vector<2x1xf32>
    %196 = arith.addf %192, %195 : vector<2x1xf32>
    %197 = math.rsqrt %196 : vector<2x1xf32>
    %198 = vector.broadcast %197 : vector<2x1xf32> to vector<2x64xf32>
    %199 = arith.mulf %194, %198 : vector<2x64xf32>
    %200 = vector.broadcast %20 : vector<1x64xf32> to vector<2x64xf32>
    %201 = arith.mulf %199, %200 : vector<2x64xf32>
    %202 = vector.broadcast %21 : vector<1x64xf32> to vector<2x64xf32>
    %203 = arith.addf %201, %202 : vector<2x64xf32>
    %204 = arith.truncf %203 : vector<2x64xf32> to vector<2x64xbf16>
    %cst_62 = arith.constant dense<0.000000e+00> : vector<2x384xf32>
    %205 = tpu.matmul %204, %2, %cst_62 {dimension_numbers = #tpu.dot_dimension_numbers<[1], [0], [0], [1], [0, 0, 1, 1], [], []>} : vector<2x64xbf16>, vector<64x384xbf16>, vector<2x384xf32> -> vector<2x384xf32>
    %206 = vector.extract_strided_slice %205 {offsets = [0, 0], sizes = [2, 128], strides = [1, 1]} : vector<2x384xf32> to vector<2x128xf32>
    %207 = vector.broadcast %5 : vector<1x128xf32> to vector<2x128xf32>
    %208 = arith.addf %206, %207 : vector<2x128xf32>
    %209 = vector.extract_strided_slice %205 {offsets = [0, 128], sizes = [2, 64], strides = [1, 1]} : vector<2x384xf32> to vector<2x64xf32>
    %210 = vector.broadcast %10 : vector<1x64xf32> to vector<2x64xf32>
    %211 = arith.addf %209, %210 : vector<2x64xf32>
    %212 = vector.extract_strided_slice %205 {offsets = [0, 256], sizes = [2, 64], strides = [1, 1]} : vector<2x384xf32> to vector<2x64xf32>
    %213 = vector.broadcast %11 : vector<1x64xf32> to vector<2x64xf32>
    %214 = arith.addf %212, %213 : vector<2x64xf32>
    %cst_63 = arith.constant dense<0.000000e+00> : vector<2xf32>
    %215 = vector.multi_reduction <add>, %208, %cst_63 [1] : vector<2x128xf32> to vector<2xf32>
    %216 = vector.shape_cast %215 : vector<2xf32> to vector<2x1xf32>
    %cst_64 = arith.constant 1.280000e+02 : f32
    %217 = vector.broadcast %cst_64 : f32 to vector<2x1xf32>
    %218 = arith.divf %216, %217 : vector<2x1xf32>
    %219 = arith.mulf %208, %208 : vector<2x128xf32>
    %cst_65 = arith.constant dense<0.000000e+00> : vector<2xf32>
    %220 = vector.multi_reduction <add>, %219, %cst_65 [1] : vector<2x128xf32> to vector<2xf32>
    %221 = vector.shape_cast %220 : vector<2xf32> to vector<2x1xf32>
    %cst_66 = arith.constant 1.280000e+02 : f32
    %222 = vector.broadcast %cst_66 : f32 to vector<2x1xf32>
    %223 = arith.divf %221, %222 : vector<2x1xf32>
    %224 = arith.mulf %218, %218 : vector<2x1xf32>
    %225 = arith.subf %223, %224 : vector<2x1xf32>
    %cst_67 = arith.constant 0.000000e+00 : f32
    %226 = vector.broadcast %cst_67 : f32 to vector<2x1xf32>
    %227 = arith.maximumf %225, %226 : vector<2x1xf32>
    %228 = vector.broadcast %218 : vector<2x1xf32> to vector<2x128xf32>
    %229 = arith.subf %208, %228 : vector<2x128xf32>
    %cst_68 = arith.constant 9.99999974E-6 : f32
    %230 = vector.broadcast %cst_68 : f32 to vector<2x1xf32>
    %231 = arith.addf %227, %230 : vector<2x1xf32>
    %232 = math.rsqrt %231 : vector<2x1xf32>
    %233 = vector.broadcast %232 : vector<2x1xf32> to vector<2x128xf32>
    %234 = arith.mulf %229, %233 : vector<2x128xf32>
    %235 = vector.broadcast %6 : vector<1x128xf32> to vector<2x128xf32>
    %236 = arith.mulf %234, %235 : vector<2x128xf32>
    %237 = vector.broadcast %7 : vector<1x128xf32> to vector<2x128xf32>
    %238 = arith.addf %236, %237 : vector<2x128xf32>
    %cst_69 = arith.constant 5.000000e-01 : f32
    %239 = vector.broadcast %cst_69 : f32 to vector<2x128xf32>
    %240 = arith.mulf %239, %238 : vector<2x128xf32>
    %cst_70 = arith.constant 4.471500e-02 : f32
    %241 = vector.broadcast %cst_70 : f32 to vector<2x128xf32>
    %242 = arith.mulf %241, %238 : vector<2x128xf32>
    %243 = arith.mulf %242, %238 : vector<2x128xf32>
    %244 = arith.mulf %243, %238 : vector<2x128xf32>
    %245 = arith.addf %238, %244 : vector<2x128xf32>
    %cst_71 = arith.constant 0.797884583 : f32
    %246 = vector.broadcast %cst_71 : f32 to vector<2x128xf32>
    %247 = arith.mulf %246, %245 : vector<2x128xf32>
    %248 = math.tanh %247 : vector<2x128xf32>
    %cst_72 = arith.constant 1.000000e+00 : f32
    %249 = vector.broadcast %cst_72 : f32 to vector<2x128xf32>
    %250 = arith.addf %249, %248 : vector<2x128xf32>
    %251 = arith.mulf %240, %250 : vector<2x128xf32>
    %252 = arith.truncf %251 : vector<2x128xf32> to vector<2x128xbf16>
    %cst_73 = arith.constant dense<0.000000e+00> : vector<2x64xf32>
    %253 = tpu.matmul %252, %4, %cst_73 {dimension_numbers = #tpu.dot_dimension_numbers<[1], [0], [0], [1], [0, 0, 1, 1], [], []>} : vector<2x128xbf16>, vector<128x64xbf16>, vector<2x64xf32> -> vector<2x64xf32>
    %254 = vector.broadcast %8 : vector<1x64xf32> to vector<2x64xf32>
    %255 = arith.addf %253, %254 : vector<2x64xf32>
    %256 = arith.truncf %255 : vector<2x64xf32> to vector<2x64xbf16>
    %cst_74 = arith.constant dense<0.000000e+00> : vector<2x384xf32>
    %257 = tpu.matmul %256, %3, %cst_74 {dimension_numbers = #tpu.dot_dimension_numbers<[1], [0], [0], [1], [0, 0, 1, 1], [], []>} : vector<2x64xbf16>, vector<64x384xbf16>, vector<2x384xf32> -> vector<2x384xf32>
    %258 = vector.extract_strided_slice %257 {offsets = [0, 0], sizes = [2, 64], strides = [1, 1]} : vector<2x384xf32> to vector<2x64xf32>
    %259 = vector.broadcast %9 : vector<1x64xf32> to vector<2x64xf32>
    %260 = arith.addf %258, %259 : vector<2x64xf32>
    %261 = vector.extract_strided_slice %257 {offsets = [0, 128], sizes = [2, 64], strides = [1, 1]} : vector<2x384xf32> to vector<2x64xf32>
    %262 = vector.broadcast %10 : vector<1x64xf32> to vector<2x64xf32>
    %263 = arith.addf %261, %262 : vector<2x64xf32>
    %264 = vector.extract_strided_slice %257 {offsets = [0, 256], sizes = [2, 64], strides = [1, 1]} : vector<2x384xf32> to vector<2x64xf32>
    %265 = vector.broadcast %11 : vector<1x64xf32> to vector<2x64xf32>
    %266 = arith.addf %264, %265 : vector<2x64xf32>
    %267 = arith.mulf %260, %211 : vector<2x64xf32>
    %268 = arith.mulf %260, %263 : vector<2x64xf32>
    %269 = vector.broadcast %10 : vector<1x64xf32> to vector<2x64xf32>
    %270 = arith.mulf %260, %269 : vector<2x64xf32>
    %271 = tpu.concatenate %267, %268, %270 in 0 : vector<2x64xf32>, vector<2x64xf32>, vector<2x64xf32> -> vector<6x64xf32>
    %cst_75 = arith.constant dense<0.000000e+00> : vector<6x8xf32>
    %272 = tpu.matmul %271, %23, %cst_75 {dimension_numbers = #tpu.dot_dimension_numbers<[1], [0], [0], [1], [0, 0, 1, 1], [], []>} : vector<6x64xf32>, vector<64x8xf32>, vector<6x8xf32> -> vector<6x8xf32>
    %273 = vector.extract_strided_slice %272 {offsets = [0, 0], sizes = [2, 8], strides = [1, 1]} : vector<6x8xf32> to vector<2x8xf32>
    %274 = vector.extract_strided_slice %272 {offsets = [2, 0], sizes = [2, 8], strides = [1, 1]} : vector<6x8xf32> to vector<2x8xf32>
    %275 = vector.extract_strided_slice %272 {offsets = [4, 0], sizes = [2, 8], strides = [1, 1]} : vector<6x8xf32> to vector<2x8xf32>
    %276 = arith.maximumf %273, %274 : vector<2x8xf32>
    %277 = arith.maximumf %276, %275 : vector<2x8xf32>
    %278 = arith.subf %273, %277 : vector<2x8xf32>
    %279 = math.exp %278 : vector<2x8xf32>
    %280 = arith.subf %274, %277 : vector<2x8xf32>
    %281 = math.exp %280 : vector<2x8xf32>
    %282 = arith.subf %275, %277 : vector<2x8xf32>
    %283 = math.exp %282 : vector<2x8xf32>
    %284 = arith.addf %279, %281 : vector<2x8xf32>
    %285 = arith.addf %284, %283 : vector<2x8xf32>
    %286 = tpu.reciprocal %285 {approx = true} : vector<2x8xf32> -> vector<2x8xf32>
    %287 = arith.mulf %279, %286 : vector<2x8xf32>
    %288 = arith.mulf %281, %286 : vector<2x8xf32>
    %289 = arith.mulf %283, %286 : vector<2x8xf32>
    %290 = tpu.concatenate %287, %288, %289 in 0 : vector<2x8xf32>, vector<2x8xf32>, vector<2x8xf32> -> vector<6x8xf32>
    %cst_76 = arith.constant dense<0.000000e+00> : vector<6x64xf32>
    %291 = tpu.matmul %290, %25, %cst_76 {dimension_numbers = #tpu.dot_dimension_numbers<[1], [0], [0], [1], [0, 0, 1, 1], [], []>} : vector<6x8xf32>, vector<8x64xf32>, vector<6x64xf32> -> vector<6x64xf32>
    %292 = vector.extract_strided_slice %291 {offsets = [0, 0], sizes = [2, 64], strides = [1, 1]} : vector<6x64xf32> to vector<2x64xf32>
    %293 = arith.mulf %292, %214 : vector<2x64xf32>
    %294 = vector.extract_strided_slice %291 {offsets = [2, 0], sizes = [2, 64], strides = [1, 1]} : vector<6x64xf32> to vector<2x64xf32>
    %295 = arith.mulf %294, %266 : vector<2x64xf32>
    %296 = arith.addf %293, %295 : vector<2x64xf32>
    %297 = vector.extract_strided_slice %291 {offsets = [4, 0], sizes = [2, 64], strides = [1, 1]} : vector<6x64xf32> to vector<2x64xf32>
    %298 = vector.broadcast %11 : vector<1x64xf32> to vector<2x64xf32>
    %299 = arith.mulf %297, %298 : vector<2x64xf32>
    %300 = arith.addf %296, %299 : vector<2x64xf32>
    %301 = arith.truncf %300 : vector<2x64xf32> to vector<2x64xbf16>
    %cst_77 = arith.constant dense<0.000000e+00> : vector<2x64xf32>
    %302 = tpu.matmul %301, %12, %cst_77 {dimension_numbers = #tpu.dot_dimension_numbers<[1], [0], [0], [1], [0, 0, 1, 1], [], []>} : vector<2x64xbf16>, vector<64x64xbf16>, vector<2x64xf32> -> vector<2x64xf32>
    %303 = vector.broadcast %13 : vector<1x64xf32> to vector<2x64xf32>
    %304 = arith.addf %302, %303 : vector<2x64xf32>
    %305 = arith.addf %255, %304 : vector<2x64xf32>
    %cst_78 = arith.constant dense<0.000000e+00> : vector<2xf32>
    %306 = vector.multi_reduction <add>, %305, %cst_78 [1] : vector<2x64xf32> to vector<2xf32>
    %307 = vector.shape_cast %306 : vector<2xf32> to vector<2x1xf32>
    %cst_79 = arith.constant 6.400000e+01 : f32
    %308 = vector.broadcast %cst_79 : f32 to vector<2x1xf32>
    %309 = arith.divf %307, %308 : vector<2x1xf32>
    %310 = arith.mulf %305, %305 : vector<2x64xf32>
    %cst_80 = arith.constant dense<0.000000e+00> : vector<2xf32>
    %311 = vector.multi_reduction <add>, %310, %cst_80 [1] : vector<2x64xf32> to vector<2xf32>
    %312 = vector.shape_cast %311 : vector<2xf32> to vector<2x1xf32>
    %cst_81 = arith.constant 6.400000e+01 : f32
    %313 = vector.broadcast %cst_81 : f32 to vector<2x1xf32>
    %314 = arith.divf %312, %313 : vector<2x1xf32>
    %315 = arith.mulf %309, %309 : vector<2x1xf32>
    %316 = arith.subf %314, %315 : vector<2x1xf32>
    %cst_82 = arith.constant 0.000000e+00 : f32
    %317 = vector.broadcast %cst_82 : f32 to vector<2x1xf32>
    %318 = arith.maximumf %316, %317 : vector<2x1xf32>
    %319 = vector.broadcast %309 : vector<2x1xf32> to vector<2x64xf32>
    %320 = arith.subf %305, %319 : vector<2x64xf32>
    %cst_83 = arith.constant 9.99999974E-6 : f32
    %321 = vector.broadcast %cst_83 : f32 to vector<2x1xf32>
    %322 = arith.addf %318, %321 : vector<2x1xf32>
    %323 = math.rsqrt %322 : vector<2x1xf32>
    %324 = vector.broadcast %323 : vector<2x1xf32> to vector<2x64xf32>
    %325 = arith.mulf %320, %324 : vector<2x64xf32>
    %326 = vector.broadcast %14 : vector<1x64xf32> to vector<2x64xf32>
    %327 = arith.mulf %325, %326 : vector<2x64xf32>
    %328 = vector.broadcast %15 : vector<1x64xf32> to vector<2x64xf32>
    %329 = arith.addf %327, %328 : vector<2x64xf32>
    %330 = arith.truncf %329 : vector<2x64xf32> to vector<2x64xbf16>
    %cst_84 = arith.constant dense<0.000000e+00> : vector<2x256xf32>
    %331 = tpu.matmul %330, %16, %cst_84 {dimension_numbers = #tpu.dot_dimension_numbers<[1], [0], [0], [1], [0, 0, 1, 1], [], []>} : vector<2x64xbf16>, vector<64x256xbf16>, vector<2x256xf32> -> vector<2x256xf32>
    %332 = vector.broadcast %17 : vector<1x256xf32> to vector<2x256xf32>
    %333 = arith.addf %331, %332 : vector<2x256xf32>
    %cst_85 = arith.constant 5.000000e-01 : f32
    %334 = vector.broadcast %cst_85 : f32 to vector<2x256xf32>
    %335 = arith.mulf %334, %333 : vector<2x256xf32>
    %cst_86 = arith.constant 4.471500e-02 : f32
    %336 = vector.broadcast %cst_86 : f32 to vector<2x256xf32>
    %337 = arith.mulf %336, %333 : vector<2x256xf32>
    %338 = arith.mulf %337, %333 : vector<2x256xf32>
    %339 = arith.mulf %338, %333 : vector<2x256xf32>
    %340 = arith.addf %333, %339 : vector<2x256xf32>
    %cst_87 = arith.constant 0.797884583 : f32
    %341 = vector.broadcast %cst_87 : f32 to vector<2x256xf32>
    %342 = arith.mulf %341, %340 : vector<2x256xf32>
    %343 = math.tanh %342 : vector<2x256xf32>
    %cst_88 = arith.constant 1.000000e+00 : f32
    %344 = vector.broadcast %cst_88 : f32 to vector<2x256xf32>
    %345 = arith.addf %344, %343 : vector<2x256xf32>
    %346 = arith.mulf %335, %345 : vector<2x256xf32>
    %347 = arith.truncf %346 : vector<2x256xf32> to vector<2x256xbf16>
    %cst_89 = arith.constant dense<0.000000e+00> : vector<2x64xf32>
    %348 = tpu.matmul %347, %18, %cst_89 {dimension_numbers = #tpu.dot_dimension_numbers<[1], [0], [0], [1], [0, 0, 1, 1], [], []>} : vector<2x256xbf16>, vector<256x64xbf16>, vector<2x64xf32> -> vector<2x64xf32>
    %349 = vector.broadcast %19 : vector<1x64xf32> to vector<2x64xf32>
    %350 = arith.addf %348, %349 : vector<2x64xf32>
    %351 = arith.addf %329, %350 : vector<2x64xf32>
    %cst_90 = arith.constant dense<0.000000e+00> : vector<2xf32>
    %352 = vector.multi_reduction <add>, %351, %cst_90 [1] : vector<2x64xf32> to vector<2xf32>
    %353 = vector.shape_cast %352 : vector<2xf32> to vector<2x1xf32>
    %cst_91 = arith.constant 6.400000e+01 : f32
    %354 = vector.broadcast %cst_91 : f32 to vector<2x1xf32>
    %355 = arith.divf %353, %354 : vector<2x1xf32>
    %356 = arith.mulf %351, %351 : vector<2x64xf32>
    %cst_92 = arith.constant dense<0.000000e+00> : vector<2xf32>
    %357 = vector.multi_reduction <add>, %356, %cst_92 [1] : vector<2x64xf32> to vector<2xf32>
    %358 = vector.shape_cast %357 : vector<2xf32> to vector<2x1xf32>
    %cst_93 = arith.constant 6.400000e+01 : f32
    %359 = vector.broadcast %cst_93 : f32 to vector<2x1xf32>
    %360 = arith.divf %358, %359 : vector<2x1xf32>
    %361 = arith.mulf %355, %355 : vector<2x1xf32>
    %362 = arith.subf %360, %361 : vector<2x1xf32>
    %cst_94 = arith.constant 0.000000e+00 : f32
    %363 = vector.broadcast %cst_94 : f32 to vector<2x1xf32>
    %364 = arith.maximumf %362, %363 : vector<2x1xf32>
    %365 = vector.broadcast %355 : vector<2x1xf32> to vector<2x64xf32>
    %366 = arith.subf %351, %365 : vector<2x64xf32>
    %cst_95 = arith.constant 9.99999974E-6 : f32
    %367 = vector.broadcast %cst_95 : f32 to vector<2x1xf32>
    %368 = arith.addf %364, %367 : vector<2x1xf32>
    %369 = math.rsqrt %368 : vector<2x1xf32>
    %370 = vector.broadcast %369 : vector<2x1xf32> to vector<2x64xf32>
    %371 = arith.mulf %366, %370 : vector<2x64xf32>
    %372 = vector.broadcast %20 : vector<1x64xf32> to vector<2x64xf32>
    %373 = arith.mulf %371, %372 : vector<2x64xf32>
    %374 = vector.broadcast %21 : vector<1x64xf32> to vector<2x64xf32>
    %375 = arith.addf %373, %374 : vector<2x64xf32>
    %376 = arith.truncf %375 : vector<2x64xf32> to vector<2x64xbf16>
    %cst_96 = arith.constant dense<0.000000e+00> : vector<2x384xf32>
    %377 = tpu.matmul %376, %2, %cst_96 {dimension_numbers = #tpu.dot_dimension_numbers<[1], [0], [0], [1], [0, 0, 1, 1], [], []>} : vector<2x64xbf16>, vector<64x384xbf16>, vector<2x384xf32> -> vector<2x384xf32>
    %378 = vector.extract_strided_slice %377 {offsets = [0, 0], sizes = [2, 128], strides = [1, 1]} : vector<2x384xf32> to vector<2x128xf32>
    %379 = vector.broadcast %5 : vector<1x128xf32> to vector<2x128xf32>
    %380 = arith.addf %378, %379 : vector<2x128xf32>
    %381 = vector.extract_strided_slice %377 {offsets = [0, 128], sizes = [2, 64], strides = [1, 1]} : vector<2x384xf32> to vector<2x64xf32>
    %382 = vector.broadcast %10 : vector<1x64xf32> to vector<2x64xf32>
    %383 = arith.addf %381, %382 : vector<2x64xf32>
    %384 = vector.extract_strided_slice %377 {offsets = [0, 256], sizes = [2, 64], strides = [1, 1]} : vector<2x384xf32> to vector<2x64xf32>
    %385 = vector.broadcast %11 : vector<1x64xf32> to vector<2x64xf32>
    %386 = arith.addf %384, %385 : vector<2x64xf32>
    %cst_97 = arith.constant dense<0.000000e+00> : vector<2xf32>
    %387 = vector.multi_reduction <add>, %380, %cst_97 [1] : vector<2x128xf32> to vector<2xf32>
    %388 = vector.shape_cast %387 : vector<2xf32> to vector<2x1xf32>
    %cst_98 = arith.constant 1.280000e+02 : f32
    %389 = vector.broadcast %cst_98 : f32 to vector<2x1xf32>
    %390 = arith.divf %388, %389 : vector<2x1xf32>
    %391 = arith.mulf %380, %380 : vector<2x128xf32>
    %cst_99 = arith.constant dense<0.000000e+00> : vector<2xf32>
    %392 = vector.multi_reduction <add>, %391, %cst_99 [1] : vector<2x128xf32> to vector<2xf32>
    %393 = vector.shape_cast %392 : vector<2xf32> to vector<2x1xf32>
    %cst_100 = arith.constant 1.280000e+02 : f32
    %394 = vector.broadcast %cst_100 : f32 to vector<2x1xf32>
    %395 = arith.divf %393, %394 : vector<2x1xf32>
    %396 = arith.mulf %390, %390 : vector<2x1xf32>
    %397 = arith.subf %395, %396 : vector<2x1xf32>
    %cst_101 = arith.constant 0.000000e+00 : f32
    %398 = vector.broadcast %cst_101 : f32 to vector<2x1xf32>
    %399 = arith.maximumf %397, %398 : vector<2x1xf32>
    %400 = vector.broadcast %390 : vector<2x1xf32> to vector<2x128xf32>
    %401 = arith.subf %380, %400 : vector<2x128xf32>
    %cst_102 = arith.constant 9.99999974E-6 : f32
    %402 = vector.broadcast %cst_102 : f32 to vector<2x1xf32>
    %403 = arith.addf %399, %402 : vector<2x1xf32>
    %404 = math.rsqrt %403 : vector<2x1xf32>
    %405 = vector.broadcast %404 : vector<2x1xf32> to vector<2x128xf32>
    %406 = arith.mulf %401, %405 : vector<2x128xf32>
    %407 = vector.broadcast %6 : vector<1x128xf32> to vector<2x128xf32>
    %408 = arith.mulf %406, %407 : vector<2x128xf32>
    %409 = vector.broadcast %7 : vector<1x128xf32> to vector<2x128xf32>
    %410 = arith.addf %408, %409 : vector<2x128xf32>
    %cst_103 = arith.constant 5.000000e-01 : f32
    %411 = vector.broadcast %cst_103 : f32 to vector<2x128xf32>
    %412 = arith.mulf %411, %410 : vector<2x128xf32>
    %cst_104 = arith.constant 4.471500e-02 : f32
    %413 = vector.broadcast %cst_104 : f32 to vector<2x128xf32>
    %414 = arith.mulf %413, %410 : vector<2x128xf32>
    %415 = arith.mulf %414, %410 : vector<2x128xf32>
    %416 = arith.mulf %415, %410 : vector<2x128xf32>
    %417 = arith.addf %410, %416 : vector<2x128xf32>
    %cst_105 = arith.constant 0.797884583 : f32
    %418 = vector.broadcast %cst_105 : f32 to vector<2x128xf32>
    %419 = arith.mulf %418, %417 : vector<2x128xf32>
    %420 = math.tanh %419 : vector<2x128xf32>
    %cst_106 = arith.constant 1.000000e+00 : f32
    %421 = vector.broadcast %cst_106 : f32 to vector<2x128xf32>
    %422 = arith.addf %421, %420 : vector<2x128xf32>
    %423 = arith.mulf %412, %422 : vector<2x128xf32>
    %424 = arith.truncf %423 : vector<2x128xf32> to vector<2x128xbf16>
    %cst_107 = arith.constant dense<0.000000e+00> : vector<2x64xf32>
    %425 = tpu.matmul %424, %4, %cst_107 {dimension_numbers = #tpu.dot_dimension_numbers<[1], [0], [0], [1], [0, 0, 1, 1], [], []>} : vector<2x128xbf16>, vector<128x64xbf16>, vector<2x64xf32> -> vector<2x64xf32>
    %426 = vector.broadcast %8 : vector<1x64xf32> to vector<2x64xf32>
    %427 = arith.addf %425, %426 : vector<2x64xf32>
    %428 = arith.truncf %427 : vector<2x64xf32> to vector<2x64xbf16>
    %cst_108 = arith.constant dense<0.000000e+00> : vector<2x384xf32>
    %429 = tpu.matmul %428, %3, %cst_108 {dimension_numbers = #tpu.dot_dimension_numbers<[1], [0], [0], [1], [0, 0, 1, 1], [], []>} : vector<2x64xbf16>, vector<64x384xbf16>, vector<2x384xf32> -> vector<2x384xf32>
    %430 = vector.extract_strided_slice %429 {offsets = [0, 0], sizes = [2, 64], strides = [1, 1]} : vector<2x384xf32> to vector<2x64xf32>
    %431 = vector.broadcast %9 : vector<1x64xf32> to vector<2x64xf32>
    %432 = arith.addf %430, %431 : vector<2x64xf32>
    %433 = vector.extract_strided_slice %429 {offsets = [0, 128], sizes = [2, 64], strides = [1, 1]} : vector<2x384xf32> to vector<2x64xf32>
    %434 = vector.broadcast %10 : vector<1x64xf32> to vector<2x64xf32>
    %435 = arith.addf %433, %434 : vector<2x64xf32>
    %436 = vector.extract_strided_slice %429 {offsets = [0, 256], sizes = [2, 64], strides = [1, 1]} : vector<2x384xf32> to vector<2x64xf32>
    %437 = vector.broadcast %11 : vector<1x64xf32> to vector<2x64xf32>
    %438 = arith.addf %436, %437 : vector<2x64xf32>
    %439 = arith.mulf %432, %383 : vector<2x64xf32>
    %440 = arith.mulf %432, %435 : vector<2x64xf32>
    %441 = vector.broadcast %10 : vector<1x64xf32> to vector<2x64xf32>
    %442 = arith.mulf %432, %441 : vector<2x64xf32>
    %443 = tpu.concatenate %439, %440, %442 in 0 : vector<2x64xf32>, vector<2x64xf32>, vector<2x64xf32> -> vector<6x64xf32>
    %cst_109 = arith.constant dense<0.000000e+00> : vector<6x8xf32>
    %444 = tpu.matmul %443, %23, %cst_109 {dimension_numbers = #tpu.dot_dimension_numbers<[1], [0], [0], [1], [0, 0, 1, 1], [], []>} : vector<6x64xf32>, vector<64x8xf32>, vector<6x8xf32> -> vector<6x8xf32>
    %445 = vector.extract_strided_slice %444 {offsets = [0, 0], sizes = [2, 8], strides = [1, 1]} : vector<6x8xf32> to vector<2x8xf32>
    %446 = vector.extract_strided_slice %444 {offsets = [2, 0], sizes = [2, 8], strides = [1, 1]} : vector<6x8xf32> to vector<2x8xf32>
    %447 = vector.extract_strided_slice %444 {offsets = [4, 0], sizes = [2, 8], strides = [1, 1]} : vector<6x8xf32> to vector<2x8xf32>
    %448 = arith.maximumf %445, %446 : vector<2x8xf32>
    %449 = arith.maximumf %448, %447 : vector<2x8xf32>
    %450 = arith.subf %445, %449 : vector<2x8xf32>
    %451 = math.exp %450 : vector<2x8xf32>
    %452 = arith.subf %446, %449 : vector<2x8xf32>
    %453 = math.exp %452 : vector<2x8xf32>
    %454 = arith.subf %447, %449 : vector<2x8xf32>
    %455 = math.exp %454 : vector<2x8xf32>
    %456 = arith.addf %451, %453 : vector<2x8xf32>
    %457 = arith.addf %456, %455 : vector<2x8xf32>
    %458 = tpu.reciprocal %457 {approx = true} : vector<2x8xf32> -> vector<2x8xf32>
    %459 = arith.mulf %451, %458 : vector<2x8xf32>
    %460 = arith.mulf %453, %458 : vector<2x8xf32>
    %461 = arith.mulf %455, %458 : vector<2x8xf32>
    %462 = tpu.concatenate %459, %460, %461 in 0 : vector<2x8xf32>, vector<2x8xf32>, vector<2x8xf32> -> vector<6x8xf32>
    %cst_110 = arith.constant dense<0.000000e+00> : vector<6x64xf32>
    %463 = tpu.matmul %462, %25, %cst_110 {dimension_numbers = #tpu.dot_dimension_numbers<[1], [0], [0], [1], [0, 0, 1, 1], [], []>} : vector<6x8xf32>, vector<8x64xf32>, vector<6x64xf32> -> vector<6x64xf32>
    %464 = vector.extract_strided_slice %463 {offsets = [0, 0], sizes = [2, 64], strides = [1, 1]} : vector<6x64xf32> to vector<2x64xf32>
    %465 = arith.mulf %464, %386 : vector<2x64xf32>
    %466 = vector.extract_strided_slice %463 {offsets = [2, 0], sizes = [2, 64], strides = [1, 1]} : vector<6x64xf32> to vector<2x64xf32>
    %467 = arith.mulf %466, %438 : vector<2x64xf32>
    %468 = arith.addf %465, %467 : vector<2x64xf32>
    %469 = vector.extract_strided_slice %463 {offsets = [4, 0], sizes = [2, 64], strides = [1, 1]} : vector<6x64xf32> to vector<2x64xf32>
    %470 = vector.broadcast %11 : vector<1x64xf32> to vector<2x64xf32>
    %471 = arith.mulf %469, %470 : vector<2x64xf32>
    %472 = arith.addf %468, %471 : vector<2x64xf32>
    %473 = arith.truncf %472 : vector<2x64xf32> to vector<2x64xbf16>
    %cst_111 = arith.constant dense<0.000000e+00> : vector<2x64xf32>
    %474 = tpu.matmul %473, %12, %cst_111 {dimension_numbers = #tpu.dot_dimension_numbers<[1], [0], [0], [1], [0, 0, 1, 1], [], []>} : vector<2x64xbf16>, vector<64x64xbf16>, vector<2x64xf32> -> vector<2x64xf32>
    %475 = vector.broadcast %13 : vector<1x64xf32> to vector<2x64xf32>
    %476 = arith.addf %474, %475 : vector<2x64xf32>
    %477 = arith.addf %427, %476 : vector<2x64xf32>
    %cst_112 = arith.constant dense<0.000000e+00> : vector<2xf32>
    %478 = vector.multi_reduction <add>, %477, %cst_112 [1] : vector<2x64xf32> to vector<2xf32>
    %479 = vector.shape_cast %478 : vector<2xf32> to vector<2x1xf32>
    %cst_113 = arith.constant 6.400000e+01 : f32
    %480 = vector.broadcast %cst_113 : f32 to vector<2x1xf32>
    %481 = arith.divf %479, %480 : vector<2x1xf32>
    %482 = arith.mulf %477, %477 : vector<2x64xf32>
    %cst_114 = arith.constant dense<0.000000e+00> : vector<2xf32>
    %483 = vector.multi_reduction <add>, %482, %cst_114 [1] : vector<2x64xf32> to vector<2xf32>
    %484 = vector.shape_cast %483 : vector<2xf32> to vector<2x1xf32>
    %cst_115 = arith.constant 6.400000e+01 : f32
    %485 = vector.broadcast %cst_115 : f32 to vector<2x1xf32>
    %486 = arith.divf %484, %485 : vector<2x1xf32>
    %487 = arith.mulf %481, %481 : vector<2x1xf32>
    %488 = arith.subf %486, %487 : vector<2x1xf32>
    %cst_116 = arith.constant 0.000000e+00 : f32
    %489 = vector.broadcast %cst_116 : f32 to vector<2x1xf32>
    %490 = arith.maximumf %488, %489 : vector<2x1xf32>
    %491 = vector.broadcast %481 : vector<2x1xf32> to vector<2x64xf32>
    %492 = arith.subf %477, %491 : vector<2x64xf32>
    %cst_117 = arith.constant 9.99999974E-6 : f32
    %493 = vector.broadcast %cst_117 : f32 to vector<2x1xf32>
    %494 = arith.addf %490, %493 : vector<2x1xf32>
    %495 = math.rsqrt %494 : vector<2x1xf32>
    %496 = vector.broadcast %495 : vector<2x1xf32> to vector<2x64xf32>
    %497 = arith.mulf %492, %496 : vector<2x64xf32>
    %498 = vector.broadcast %14 : vector<1x64xf32> to vector<2x64xf32>
    %499 = arith.mulf %497, %498 : vector<2x64xf32>
    %500 = vector.broadcast %15 : vector<1x64xf32> to vector<2x64xf32>
    %501 = arith.addf %499, %500 : vector<2x64xf32>
    %502 = arith.truncf %501 : vector<2x64xf32> to vector<2x64xbf16>
    %cst_118 = arith.constant dense<0.000000e+00> : vector<2x256xf32>
    %503 = tpu.matmul %502, %16, %cst_118 {dimension_numbers = #tpu.dot_dimension_numbers<[1], [0], [0], [1], [0, 0, 1, 1], [], []>} : vector<2x64xbf16>, vector<64x256xbf16>, vector<2x256xf32> -> vector<2x256xf32>
    %504 = vector.broadcast %17 : vector<1x256xf32> to vector<2x256xf32>
    %505 = arith.addf %503, %504 : vector<2x256xf32>
    %cst_119 = arith.constant 5.000000e-01 : f32
    %506 = vector.broadcast %cst_119 : f32 to vector<2x256xf32>
    %507 = arith.mulf %506, %505 : vector<2x256xf32>
    %cst_120 = arith.constant 4.471500e-02 : f32
    %508 = vector.broadcast %cst_120 : f32 to vector<2x256xf32>
    %509 = arith.mulf %508, %505 : vector<2x256xf32>
    %510 = arith.mulf %509, %505 : vector<2x256xf32>
    %511 = arith.mulf %510, %505 : vector<2x256xf32>
    %512 = arith.addf %505, %511 : vector<2x256xf32>
    %cst_121 = arith.constant 0.797884583 : f32
    %513 = vector.broadcast %cst_121 : f32 to vector<2x256xf32>
    %514 = arith.mulf %513, %512 : vector<2x256xf32>
    %515 = math.tanh %514 : vector<2x256xf32>
    %cst_122 = arith.constant 1.000000e+00 : f32
    %516 = vector.broadcast %cst_122 : f32 to vector<2x256xf32>
    %517 = arith.addf %516, %515 : vector<2x256xf32>
    %518 = arith.mulf %507, %517 : vector<2x256xf32>
    %519 = arith.truncf %518 : vector<2x256xf32> to vector<2x256xbf16>
    %cst_123 = arith.constant dense<0.000000e+00> : vector<2x64xf32>
    %520 = tpu.matmul %519, %18, %cst_123 {dimension_numbers = #tpu.dot_dimension_numbers<[1], [0], [0], [1], [0, 0, 1, 1], [], []>} : vector<2x256xbf16>, vector<256x64xbf16>, vector<2x64xf32> -> vector<2x64xf32>
    %521 = vector.broadcast %19 : vector<1x64xf32> to vector<2x64xf32>
    %522 = arith.addf %520, %521 : vector<2x64xf32>
    %523 = arith.addf %501, %522 : vector<2x64xf32>
    %cst_124 = arith.constant dense<0.000000e+00> : vector<2xf32>
    %524 = vector.multi_reduction <add>, %523, %cst_124 [1] : vector<2x64xf32> to vector<2xf32>
    %525 = vector.shape_cast %524 : vector<2xf32> to vector<2x1xf32>
    %cst_125 = arith.constant 6.400000e+01 : f32
    %526 = vector.broadcast %cst_125 : f32 to vector<2x1xf32>
    %527 = arith.divf %525, %526 : vector<2x1xf32>
    %528 = arith.mulf %523, %523 : vector<2x64xf32>
    %cst_126 = arith.constant dense<0.000000e+00> : vector<2xf32>
    %529 = vector.multi_reduction <add>, %528, %cst_126 [1] : vector<2x64xf32> to vector<2xf32>
    %530 = vector.shape_cast %529 : vector<2xf32> to vector<2x1xf32>
    %cst_127 = arith.constant 6.400000e+01 : f32
    %531 = vector.broadcast %cst_127 : f32 to vector<2x1xf32>
    %532 = arith.divf %530, %531 : vector<2x1xf32>
    %533 = arith.mulf %527, %527 : vector<2x1xf32>
    %534 = arith.subf %532, %533 : vector<2x1xf32>
    %cst_128 = arith.constant 0.000000e+00 : f32
    %535 = vector.broadcast %cst_128 : f32 to vector<2x1xf32>
    %536 = arith.maximumf %534, %535 : vector<2x1xf32>
    %537 = vector.broadcast %527 : vector<2x1xf32> to vector<2x64xf32>
    %538 = arith.subf %523, %537 : vector<2x64xf32>
    %cst_129 = arith.constant 9.99999974E-6 : f32
    %539 = vector.broadcast %cst_129 : f32 to vector<2x1xf32>
    %540 = arith.addf %536, %539 : vector<2x1xf32>
    %541 = math.rsqrt %540 : vector<2x1xf32>
    %542 = vector.broadcast %541 : vector<2x1xf32> to vector<2x64xf32>
    %543 = arith.mulf %538, %542 : vector<2x64xf32>
    %544 = vector.broadcast %20 : vector<1x64xf32> to vector<2x64xf32>
    %545 = arith.mulf %543, %544 : vector<2x64xf32>
    %546 = vector.broadcast %21 : vector<1x64xf32> to vector<2x64xf32>
    %547 = arith.addf %545, %546 : vector<2x64xf32>
    %548 = arith.truncf %547 : vector<2x64xf32> to vector<2x64xbf16>
    %cst_130 = arith.constant dense<0.000000e+00> : vector<2x384xf32>
    %549 = tpu.matmul %548, %2, %cst_130 {dimension_numbers = #tpu.dot_dimension_numbers<[1], [0], [0], [1], [0, 0, 1, 1], [], []>} : vector<2x64xbf16>, vector<64x384xbf16>, vector<2x384xf32> -> vector<2x384xf32>
    %550 = vector.extract_strided_slice %549 {offsets = [0, 0], sizes = [2, 128], strides = [1, 1]} : vector<2x384xf32> to vector<2x128xf32>
    %551 = vector.broadcast %5 : vector<1x128xf32> to vector<2x128xf32>
    %552 = arith.addf %550, %551 : vector<2x128xf32>
    %cst_131 = arith.constant dense<0.000000e+00> : vector<2xf32>
    %553 = vector.multi_reduction <add>, %552, %cst_131 [1] : vector<2x128xf32> to vector<2xf32>
    %554 = vector.shape_cast %553 : vector<2xf32> to vector<2x1xf32>
    %cst_132 = arith.constant 1.280000e+02 : f32
    %555 = vector.broadcast %cst_132 : f32 to vector<2x1xf32>
    %556 = arith.divf %554, %555 : vector<2x1xf32>
    %557 = arith.mulf %552, %552 : vector<2x128xf32>
    %cst_133 = arith.constant dense<0.000000e+00> : vector<2xf32>
    %558 = vector.multi_reduction <add>, %557, %cst_133 [1] : vector<2x128xf32> to vector<2xf32>
    %559 = vector.shape_cast %558 : vector<2xf32> to vector<2x1xf32>
    %cst_134 = arith.constant 1.280000e+02 : f32
    %560 = vector.broadcast %cst_134 : f32 to vector<2x1xf32>
    %561 = arith.divf %559, %560 : vector<2x1xf32>
    %562 = arith.mulf %556, %556 : vector<2x1xf32>
    %563 = arith.subf %561, %562 : vector<2x1xf32>
    %cst_135 = arith.constant 0.000000e+00 : f32
    %564 = vector.broadcast %cst_135 : f32 to vector<2x1xf32>
    %565 = arith.maximumf %563, %564 : vector<2x1xf32>
    %566 = vector.broadcast %556 : vector<2x1xf32> to vector<2x128xf32>
    %567 = arith.subf %552, %566 : vector<2x128xf32>
    %cst_136 = arith.constant 9.99999974E-6 : f32
    %568 = vector.broadcast %cst_136 : f32 to vector<2x1xf32>
    %569 = arith.addf %565, %568 : vector<2x1xf32>
    %570 = math.rsqrt %569 : vector<2x1xf32>
    %571 = vector.broadcast %570 : vector<2x1xf32> to vector<2x128xf32>
    %572 = arith.mulf %567, %571 : vector<2x128xf32>
    %573 = vector.broadcast %6 : vector<1x128xf32> to vector<2x128xf32>
    %574 = arith.mulf %572, %573 : vector<2x128xf32>
    %575 = vector.broadcast %7 : vector<1x128xf32> to vector<2x128xf32>
    %576 = arith.addf %574, %575 : vector<2x128xf32>
    %cst_137 = arith.constant 5.000000e-01 : f32
    %577 = vector.broadcast %cst_137 : f32 to vector<2x128xf32>
    %578 = arith.mulf %577, %576 : vector<2x128xf32>
    %cst_138 = arith.constant 4.471500e-02 : f32
    %579 = vector.broadcast %cst_138 : f32 to vector<2x128xf32>
    %580 = arith.mulf %579, %576 : vector<2x128xf32>
    %581 = arith.mulf %580, %576 : vector<2x128xf32>
    %582 = arith.mulf %581, %576 : vector<2x128xf32>
    %583 = arith.addf %576, %582 : vector<2x128xf32>
    %cst_139 = arith.constant 0.797884583 : f32
    %584 = vector.broadcast %cst_139 : f32 to vector<2x128xf32>
    %585 = arith.mulf %584, %583 : vector<2x128xf32>
    %586 = math.tanh %585 : vector<2x128xf32>
    %cst_140 = arith.constant 1.000000e+00 : f32
    %587 = vector.broadcast %cst_140 : f32 to vector<2x128xf32>
    %588 = arith.addf %587, %586 : vector<2x128xf32>
    %589 = arith.mulf %578, %588 : vector<2x128xf32>
    %590 = arith.truncf %589 : vector<2x128xf32> to vector<2x128xbf16>
    %cst_141 = arith.constant dense<0.000000e+00> : vector<2x64xf32>
    %591 = tpu.matmul %590, %4, %cst_141 {dimension_numbers = #tpu.dot_dimension_numbers<[1], [0], [0], [1], [0, 0, 1, 1], [], []>} : vector<2x128xbf16>, vector<128x64xbf16>, vector<2x64xf32> -> vector<2x64xf32>
    %592 = vector.broadcast %8 : vector<1x64xf32> to vector<2x64xf32>
    %593 = arith.addf %591, %592 : vector<2x64xf32>
    %c704 = arith.constant 704 : index
    %c0_142 = arith.constant 0 : index
    %594 = vector.load %arg2[%c704, %c0_142] : memref<1008x384xbf16, #tpu.memory_space<vmem>>, vector<64x64xbf16>
    %595 = arith.truncf %593 : vector<2x64xf32> to vector<2x64xbf16>
    %cst_143 = arith.constant dense<0.000000e+00> : vector<2x64xf32>
    %596 = tpu.matmul %595, %594, %cst_143 {dimension_numbers = #tpu.dot_dimension_numbers<[1], [0], [0], [1], [0, 0, 1, 1], [], []>} : vector<2x64xbf16>, vector<64x64xbf16>, vector<2x64xf32> -> vector<2x64xf32>
    %597 = arith.addf %31, %596 : vector<2x64xf32>
    %c15 = arith.constant 15 : index
    %c0_144 = arith.constant 0 : index
    %598 = vector.load %arg3[%c15, %c0_144] : memref<24x384xf32, #tpu.memory_space<vmem>>, vector<1x64xf32>
    %c16 = arith.constant 16 : index
    %c0_145 = arith.constant 0 : index
    %599 = vector.load %arg3[%c16, %c0_145] : memref<24x384xf32, #tpu.memory_space<vmem>>, vector<1x64xf32>
    %cst_146 = arith.constant dense<0.000000e+00> : vector<2xf32>
    %600 = vector.multi_reduction <add>, %597, %cst_146 [1] : vector<2x64xf32> to vector<2xf32>
    %601 = vector.shape_cast %600 : vector<2xf32> to vector<2x1xf32>
    %cst_147 = arith.constant 6.400000e+01 : f32
    %602 = vector.broadcast %cst_147 : f32 to vector<2x1xf32>
    %603 = arith.divf %601, %602 : vector<2x1xf32>
    %604 = arith.mulf %597, %597 : vector<2x64xf32>
    %cst_148 = arith.constant dense<0.000000e+00> : vector<2xf32>
    %605 = vector.multi_reduction <add>, %604, %cst_148 [1] : vector<2x64xf32> to vector<2xf32>
    %606 = vector.shape_cast %605 : vector<2xf32> to vector<2x1xf32>
    %cst_149 = arith.constant 6.400000e+01 : f32
    %607 = vector.broadcast %cst_149 : f32 to vector<2x1xf32>
    %608 = arith.divf %606, %607 : vector<2x1xf32>
    %609 = arith.mulf %603, %603 : vector<2x1xf32>
    %610 = arith.subf %608, %609 : vector<2x1xf32>
    %cst_150 = arith.constant 0.000000e+00 : f32
    %611 = vector.broadcast %cst_150 : f32 to vector<2x1xf32>
    %612 = arith.maximumf %610, %611 : vector<2x1xf32>
    %613 = vector.broadcast %603 : vector<2x1xf32> to vector<2x64xf32>
    %614 = arith.subf %597, %613 : vector<2x64xf32>
    %cst_151 = arith.constant 9.99999974E-6 : f32
    %615 = vector.broadcast %cst_151 : f32 to vector<2x1xf32>
    %616 = arith.addf %612, %615 : vector<2x1xf32>
    %617 = math.rsqrt %616 : vector<2x1xf32>
    %618 = vector.broadcast %617 : vector<2x1xf32> to vector<2x64xf32>
    %619 = arith.mulf %614, %618 : vector<2x64xf32>
    %620 = vector.broadcast %598 : vector<1x64xf32> to vector<2x64xf32>
    %621 = arith.mulf %619, %620 : vector<2x64xf32>
    %622 = vector.broadcast %599 : vector<1x64xf32> to vector<2x64xf32>
    %623 = arith.addf %621, %622 : vector<2x64xf32>
    %cst_152 = arith.constant 5.000000e-01 : f32
    %624 = vector.broadcast %cst_152 : f32 to vector<2x64xf32>
    %625 = arith.mulf %624, %623 : vector<2x64xf32>
    %cst_153 = arith.constant 4.471500e-02 : f32
    %626 = vector.broadcast %cst_153 : f32 to vector<2x64xf32>
    %627 = arith.mulf %626, %623 : vector<2x64xf32>
    %628 = arith.mulf %627, %623 : vector<2x64xf32>
    %629 = arith.mulf %628, %623 : vector<2x64xf32>
    %630 = arith.addf %623, %629 : vector<2x64xf32>
    %cst_154 = arith.constant 0.797884583 : f32
    %631 = vector.broadcast %cst_154 : f32 to vector<2x64xf32>
    %632 = arith.mulf %631, %630 : vector<2x64xf32>
    %633 = math.tanh %632 : vector<2x64xf32>
    %cst_155 = arith.constant 1.000000e+00 : f32
    %634 = vector.broadcast %cst_155 : f32 to vector<2x64xf32>
    %635 = arith.addf %634, %633 : vector<2x64xf32>
    %636 = arith.mulf %625, %635 : vector<2x64xf32>
    %c768 = arith.constant 768 : index
    %c0_156 = arith.constant 0 : index
    %637 = vector.load %arg2[%c768, %c0_156] : memref<1008x384xbf16, #tpu.memory_space<vmem>>, vector<64x64xbf16>
    %638 = arith.truncf %636 : vector<2x64xf32> to vector<2x64xbf16>
    %cst_157 = arith.constant dense<0.000000e+00> : vector<2x64xf32>
    %639 = tpu.matmul %638, %637, %cst_157 {dimension_numbers = #tpu.dot_dimension_numbers<[1], [0], [0], [1], [0, 0, 1, 1], [], []>} : vector<2x64xbf16>, vector<64x64xbf16>, vector<2x64xf32> -> vector<2x64xf32>
    %c17 = arith.constant 17 : index
    %c0_158 = arith.constant 0 : index
    %640 = vector.load %arg3[%c17, %c0_158] : memref<24x384xf32, #tpu.memory_space<vmem>>, vector<1x64xf32>
    %641 = vector.broadcast %640 : vector<1x64xf32> to vector<2x64xf32>
    %642 = arith.addf %639, %641 : vector<2x64xf32>
    %c832 = arith.constant 832 : index
    %c0_159 = arith.constant 0 : index
    %643 = vector.load %arg2[%c832, %c0_159] : memref<1008x384xbf16, #tpu.memory_space<vmem>>, vector<64x32xbf16>
    %644 = arith.truncf %642 : vector<2x64xf32> to vector<2x64xbf16>
    %cst_160 = arith.constant dense<0.000000e+00> : vector<2x32xf32>
    %645 = tpu.matmul %644, %643, %cst_160 {dimension_numbers = #tpu.dot_dimension_numbers<[1], [0], [0], [1], [0, 0, 1, 1], [], []>} : vector<2x64xbf16>, vector<64x32xbf16>, vector<2x32xf32> -> vector<2x32xf32>
    %c18 = arith.constant 18 : index
    %c0_161 = arith.constant 0 : index
    %646 = vector.load %arg3[%c18, %c0_161] : memref<24x384xf32, #tpu.memory_space<vmem>>, vector<1x32xf32>
    %647 = vector.broadcast %646 : vector<1x32xf32> to vector<2x32xf32>
    %648 = arith.addf %645, %647 : vector<2x32xf32>
    %cst_162 = arith.constant 5.000000e-01 : f32
    %649 = vector.broadcast %cst_162 : f32 to vector<2x32xf32>
    %650 = arith.mulf %649, %648 : vector<2x32xf32>
    %cst_163 = arith.constant 4.471500e-02 : f32
    %651 = vector.broadcast %cst_163 : f32 to vector<2x32xf32>
    %652 = arith.mulf %651, %648 : vector<2x32xf32>
    %653 = arith.mulf %652, %648 : vector<2x32xf32>
    %654 = arith.mulf %653, %648 : vector<2x32xf32>
    %655 = arith.addf %648, %654 : vector<2x32xf32>
    %cst_164 = arith.constant 0.797884583 : f32
    %656 = vector.broadcast %cst_164 : f32 to vector<2x32xf32>
    %657 = arith.mulf %656, %655 : vector<2x32xf32>
    %658 = math.tanh %657 : vector<2x32xf32>
    %cst_165 = arith.constant 1.000000e+00 : f32
    %659 = vector.broadcast %cst_165 : f32 to vector<2x32xf32>
    %660 = arith.addf %659, %658 : vector<2x32xf32>
    %661 = arith.mulf %650, %660 : vector<2x32xf32>
    %c896 = arith.constant 896 : index
    %c0_166 = arith.constant 0 : index
    %662 = vector.load %arg2[%c896, %c0_166] : memref<1008x384xbf16, #tpu.memory_space<vmem>>, vector<32x1xbf16>
    %663 = arith.truncf %661 : vector<2x32xf32> to vector<2x32xbf16>
    %cst_167 = arith.constant dense<0.000000e+00> : vector<2x1xf32>
    %664 = tpu.matmul %663, %662, %cst_167 {dimension_numbers = #tpu.dot_dimension_numbers<[1], [0], [0], [1], [0, 0, 1, 1], [], []>} : vector<2x32xbf16>, vector<32x1xbf16>, vector<2x1xf32> -> vector<2x1xf32>
    %c19 = arith.constant 19 : index
    %c0_168 = arith.constant 0 : index
    %665 = vector.load %arg3[%c19, %c0_168] : memref<24x384xf32, #tpu.memory_space<vmem>>, vector<1x1xf32>
    %666 = vector.broadcast %665 : vector<1x1xf32> to vector<2x1xf32>
    %667 = arith.addf %664, %666 : vector<2x1xf32>
    %cst_169 = arith.constant 0.000000e+00 : f32
    %668 = vector.broadcast %cst_169 : f32 to vector<2x1xf32>
    %669 = arith.subf %668, %667 : vector<2x1xf32>
    %670 = math.exp %669 : vector<2x1xf32>
    %cst_170 = arith.constant 1.000000e+00 : f32
    %671 = vector.broadcast %cst_170 : f32 to vector<2x1xf32>
    %672 = arith.addf %671, %670 : vector<2x1xf32>
    %cst_171 = arith.constant 1.000000e+00 : f32
    %673 = vector.broadcast %cst_171 : f32 to vector<2x1xf32>
    %674 = arith.divf %673, %672 : vector<2x1xf32>
    %c0_172 = arith.constant 0 : index
    %c0_173 = arith.constant 0 : index
    %c0_174 = arith.constant 0 : index
    %675 = vector.load %arg1[%c0_172, %c0_173, %c0_174] : memref<2x8x64xf32, #tpu.memory_space<vmem>>, vector<2x8x64xf32>
    %c0_175 = arith.constant 0 : index
    %c0_176 = arith.constant 0 : index
    %c0_177 = arith.constant 0 : index
    %676 = vector.load %arg4[%c0_175, %c0_176, %c0_177] : memref<2x8x64xf32, #tpu.memory_space<vmem>>, vector<2x8x64xf32>
    tpu.vector_store %arg4[%c0_175, %c0_176, %c0_177], %675 {strides = array<i32>} : memref<2x8x64xf32, #tpu.memory_space<vmem>>, vector<2x8x64xf32>,
    %c0_178 = arith.constant 0 : index
    %c0_179 = arith.constant 0 : index
    %c0_180 = arith.constant 0 : index
    %677 = vector.load %arg4[%c0_178, %c0_179, %c0_180] : memref<2x8x64xf32, #tpu.memory_space<vmem>>, vector<2x1x64xf32>
    %678 = vector.shape_cast %677 : vector<2x1x64xf32> to vector<2x64xf32>
    %679 = vector.shape_cast %642 : vector<2x64xf32> to vector<2x1x64xf32>
    tpu.vector_store %arg4[%c0_178, %c0_179, %c0_180], %679 {strides = array<i32>} : memref<2x8x64xf32, #tpu.memory_space<vmem>>, vector<2x1x64xf32>,
    %680 = vector.shape_cast %674 : vector<2x1xf32> to vector<2x1xf32>
    %681 = vector.broadcast %680 : vector<2x1xf32> to vector<2x64xf32>
    %c0_181 = arith.constant 0 : index
    %c0_182 = arith.constant 0 : index
    %682 = vector.load %arg5[%c0_181, %c0_182] : memref<2x64xf32, #tpu.memory_space<vmem>>, vector<2x64xf32>
    tpu.vector_store %arg5[%c0_181, %c0_182], %681 {strides = array<i32>} : memref<2x64xf32, #tpu.memory_space<vmem>>, vector<2x64xf32>,
    return
  }
  func.func @transform_0(%arg0: i32) -> (i32, i32, i32) {
    %c0_i32 = arith.constant 0 : i32
    %c0_i32_0 = arith.constant 0 : i32
    %c0_i32_1 = arith.constant 0 : i32
    return %arg0, %c0_i32, %c0_i32_0 : i32, i32, i32
  }
  func.func @transform_1(%arg0: i32) -> (i32, i32) {
    %c0_i32 = arith.constant 0 : i32
    %c0_i32_0 = arith.constant 0 : i32
    %c0_i32_1 = arith.constant 0 : i32
    return %c0_i32, %c0_i32_0 : i32, i32
  }
  func.func @transform_2(%arg0: i32) -> (i32, i32) {
    %c0_i32 = arith.constant 0 : i32
    %c0_i32_0 = arith.constant 0 : i32
    %c0_i32_1 = arith.constant 0 : i32
    return %c0_i32, %c0_i32_0 : i32, i32
  }
  func.func @transform_3(%arg0: i32) -> (i32, i32, i32) {
    %c0_i32 = arith.constant 0 : i32
    %c0_i32_0 = arith.constant 0 : i32
    %c0_i32_1 = arith.constant 0 : i32
    return %arg0, %c0_i32, %c0_i32_0 : i32, i32, i32
  }
  func.func @transform_4(%arg0: i32) -> (i32, i32) {
    %c0_i32 = arith.constant 0 : i32
    %c0_i32_0 = arith.constant 0 : i32
    return %arg0, %c0_i32 : i32, i32
  }
}

</mosaic_0001>

<bundles_post_ra>
// kernel: recursive_reasoner_forward.1
= control target key start
LH: loop header
LB: loop body
LE: loop exit
PB: predicated region body
PF: predicated region fallthrough
CT: control target
= control target key end

     0   :  { %10 = vsyncpa [#allocation3], 0  ;;  %s4805_s0 = inlined_call_operand.vmem [shape: f32[2,8,64], index: 0, kind: input, shape index: {}, may-alias: {0,3}]   ;;  %s4806_s1 = inlined_call_operand.hbm [shape: bf16[1008,384], index: 1, kind: input, shape index: {}]   ;;  %s4807_s2 = inlined_call_operand.hbm [shape: f32[24,384], index: 2, kind: input, shape index: {}]   ;;  %s4808_s3 = inlined_call_operand.vmem [shape: f32[2,8,64], index: 3, kind: output, shape index: {0}, may-alias: {0,3}]   ;;  %s4809_s4 = inlined_call_operand.vmem [shape: f32[2,64], index: 4, kind: output, shape index: {1}]  }
   0x1   :  { %11 = vsyncpa [#allocation5], 0  ;;  %s4021_s15 = smov [#allocation2]   ;;  %s3973_s19 = scalar_lea.hbm %s4806_s1, 24192 }
   0x2   :  { %s19_s16 = sshll.u32 %s4021_s15, 4  ;;  %p3974_p0 = scmp.ne.s32.totalorder %s4806_s1, %s3973_s19  ;;  %s20_s16 = int_to_ptr.vmem [resolvable:$true] %s19_s16 }
   0x3   :  { %p3977_p1 = scmp.lt.u32.totalorder %s3973_s19, %s4806_s1 }
   0x5   :  { %p3979_p2 = pnand %p3977_p1, %p3974_p0 }
   0x7   :  { %3982 = shalt.err (!%p3979_p2)
}
   0x8   :  { %s3983_s24 = scalar_lea.vmem %s20_s16, 24192  ;;  %p3988_p4 = scmp.lt.s32.totalorder %s20_s16, %s20_s16 }
   0x9   :  { %p3984_p3 = scmp.ne.s32.totalorder %s20_s16, %s3983_s24  ;;  %p3989_p5 = scmp.lt.s32.totalorder %s3983_s24, %s3983_s24 }
   0xb   :  { %p3990_p6 = por %p3989_p5, %p3988_p4 }
   0xd   :  { %p3991_p7 = pnand %p3990_p6, %p3984_p3 }
   0xf   :  { %3994 = shalt.err (!%p3991_p7)
}
  0x10   :  { %s4022_s25 = smov 192   ;;  %s4023_s26 = smov 12  }
  0x11   :  { %25 = dma.hbm_to_vmem [thread:$0]  %s4806_s1, 24192, %s20_s16, [#allocation3], %s4022_s25, %s4022_s25, %s4023_s26  }
  0x12   :  { %s4024_s29 = smov [#allocation4]   ;;  %s3995_s7 = scalar_lea.hbm %s4807_s2, 1152 }
  0x13   :  { %s31_s30 = sshll.u32 %s4024_s29, 4  ;;  %p3996_p8 = scmp.ne.s32.totalorder %s4807_s2, %s3995_s7  ;;  %s32_s30 = int_to_ptr.vmem [resolvable:$true] %s31_s30 }
  0x14   :  { %p3999_p9 = scmp.lt.u32.totalorder %s3995_s7, %s4807_s2 }
  0x16   :  { %p4001_p10 = pnand %p3999_p9, %p3996_p8 }
  0x18   :  { %4004 = shalt.err (!%p4001_p10)
}
  0x19   :  { %s4005_s12 = scalar_lea.vmem %s32_s30, 1152  ;;  %p4010_p12 = scmp.lt.s32.totalorder %s32_s30, %s32_s30 }
  0x1a   :  { %p4006_p11 = scmp.ne.s32.totalorder %s32_s30, %s4005_s12  ;;  %p4011_p13 = scmp.lt.s32.totalorder %s4005_s12, %s4005_s12 }
  0x1c   :  { %p4012_p0 = por %p4011_p13, %p4010_p12 }
  0x1e   :  { %p4013_p1 = pnand %p4012_p0, %p4006_p11 }
  0x20   :  { %4016 = shalt.err (!%p4013_p1)
}
  0x21   :  { %s4025_s1 = smov 384   ;;  %s4026_s13 = smov 24  }
  0x22   :  { %37 = dma.hbm_to_vmem [thread:$0]  %s4807_s2, 1152, %s32_s30, [#allocation5], %s4025_s1, %s4025_s1, %s4026_s13  }
  0x23   :  { %4017 = dma.done.wait [#allocation3], 24192  }
  0x24   :  { %4018 = vsyncadd [#allocation3], 4294943104 }
  0x25   :  { %4019 = dma.done.wait [#allocation5], 1152  }
  0x26   :  { %4020 = vsyncadd [#allocation5], 4294966144  ;;  %v4812_v0 = vmov 0   ;;  %v4083_v1 = vld [vmem:[#allocation2 + $0x4] ss:$12 sps:$4 sm:$0xff]   ;;  %vm192_vm0 = vcmask 1041409  }
  0x27   :  { %359 = vmatprep.mubr.bf16.mxu1 %v4812_v0  ;;  %3727 = vset.pattern.permute.xlu0 %v4812_v0  ;;  %v4085_v2 = vld [vmem:[#allocation2] ss:$12 sps:$4 sm:$0xff]   ;;  %v4088_v3 = vld [vmem:[#allocation2 + $0x1c] ss:$12 sps:$4 sm:$0xff]   ;;  %v4091_v4 = vld [vmem:[#allocation2 + $0x18] ss:$12 sps:$4 sm:$0xff]  }
  0x28   :  { %327 = vmatprep.subr.bf16.mxu1 %v4083_v1  ;;  %v4094_v5 = vld [vmem:[#allocation2 + $0x34] ss:$12 sps:$4 sm:$0xff]   ;;  %v4096_v6 = vld [vmem:[#allocation2 + $0x30] ss:$12 sps:$4 sm:$0xff]   ;;  %v46_v8 = vld [vmem:[%s4805_s0 + $0x8] sm:$0x1] }
  0x29   :  { %328 = vmatpush1.bf16.msra.mxu1 %v4085_v2  ;;  %v45_v7 = vld [vmem:[%s4805_s0] sm:$0x1]  ;;  %v4104_v9 = vld [vmem:[#allocation2 + $0x4c] ss:$12 sps:$4 sm:$0xff]   ;;  %v185_v11 = vpack.c.bf16 %v46_v8, %v46_v8  ;;  %vm219_vm1 = vcmask 523264   ;;  %vm411_vm2 = vcmask 1041408  }
  0x2a   :  { %329 = vmatprep.subr.bf16.mxu1 %v4088_v3  ;;  %v184_v10 = vpack.c.bf16 %v45_v7, %v45_v7  ;;  %v2989_v12 = vld [vmem:[%s4805_s0 + $0x8] sm:$0xff]  ;;  %v4814_v29 = vmov 0.0   ;;  %v4143_v30 = vld [vmem:[#allocation2 + $0xd8] ss:$12 sps:$4 sm:$0xff]   ;;  %v4146_v31 = vld [vmem:[#allocation2 + $0xf0] ss:$12 sps:$4 sm:$0xff]  }
  0x2b   :  { %2991 = vst.msk [vmem:[%s4808_s3 + $0x8] sm:$0xff] %vm219_vm1, %v2989_v12  ;;  %v190_v14 = vunpack.c.l.b16 %v185_v11  ;;  %v4115_v15 = vld [vmem:[#allocation2 + $0x48] ss:$12 sps:$4 sm:$0xff]   ;;  %v4137_v28 = vld [vmem:[#allocation2 + $0xc0] ss:$12 sps:$4 sm:$0xff]   ;;  %3347 = vmatprep.subr.bf16.mxu0 %v4814_v29  ;;  %vm4029_vm3 = vmmov 0  }
  0x2c   :  { %v189_v13 = vunpack.c.l.b16 %v184_v10  ;;  %v4125_v19 = vld [vmem:[#allocation4] ss:$0 sm:$0xff]  ;;  %3355 = vmatprep.mubr.msk.bf16.mxu0 %vm4029_vm3, %v4814_v29  ;;  %v4158_v33 = vld [vmem:[#allocation2 + $0x120] ss:$12 sps:$4 sm:$0xff]   ;;  %v4162_v34 = vld [vmem:[#allocation2 + $0x138] ss:$12 sps:$4 sm:$0xff]  }
  0x2d   :  { %330 = vmatpush1.bf16.msra.mxu1 %v4091_v4  ;;  %v191_v16 = vrot.slane %v190_v14, 7  ;;  %v4154_v32 = vld [vmem:[#allocation2 + $0x108] ss:$12 sps:$4 sm:$0xff]   ;;  %v4166_v35 = vld [vmem:[#allocation2 + $0x150] ss:$12 sps:$4 sm:$0xff]   ;;  %vm691_vm4 = vcmask 1043456  }
  0x2e   :  { %331 = vmatprep.subr.bf16.mxu1 %v4094_v5  ;;  %v4170_v36 = vld [vmem:[#allocation2 + $0x168] ss:$12 sps:$4 sm:$0xff]   ;;  %v3748_v37 = vld [vmem:[#allocation2 + $0x3c0] ss:$12 sps:$4 sm:$0xff]   ;;  %v3749_v38 = vld [vmem:[#allocation2 + $0x3d8] ss:$12 sps:$4 sm:$0xff]  }
  0x2f   :  { %v193_v17 = vsel %vm192_vm0, %v191_v16, %v189_v13  ;;  %3348 = vmatpush3.bf16.msra.mxu0 %v3748_v37  ;;  %v3750_v39 = vld [vmem:[#allocation2 + $0x3f0] ss:$12 sps:$4 sm:$0xff]   ;;  %v3751_v40 = vld [vmem:[#allocation2 + $0x408] ss:$12 sps:$4 sm:$0xff]   ;;  %v4183_v42 = vld [vmem:[#allocation2 + $0x20] ss:$12 sps:$4 sm:$0xff]  }
  0x30   :  { %v4120_v18 = vpack.c.b16 %v193_v17, %v193_v17  ;;  %3349 = vmatprep.subr.bf16.mxu0 %v4814_v29  ;;  %v4177_v41 = vld [vmem:[#allocation2 + $0x8] ss:$12 sps:$4 sm:$0xff]   ;;  %v4189_v43 = vld [vmem:[#allocation2 + $0x38] ss:$12 sps:$4 sm:$0xff]   ;;  %v4193_v44 = vld [vmem:[#allocation2 + $0x50] ss:$12 sps:$4 sm:$0xff]  }
  0x31   :  { %332 = vmatpush1.bf16.msra.mxu1 %v4096_v6  ;;  %v4196_v45 = vld [vmem:[#allocation2 + $0x64] ss:$12 sps:$4 sm:$0xff]   ;;  %v4199_v46 = vld [vmem:[#allocation2 + $0x60] ss:$12 sps:$4 sm:$0xff]   ;;  %v4202_v47 = vld [vmem:[#allocation2 + $0x7c] ss:$12 sps:$4 sm:$0xff]  }
  0x32   :  { %333 = vmatprep.subr.bf16.mxu1 %v4104_v9  ;;  %v4207_v48 = vld [vmem:[#allocation2 + $0x78] ss:$12 sps:$4 sm:$0xff]   ;;  %v4211_v49 = vld [vmem:[#allocation2 + $0x94] ss:$12 sps:$4 sm:$0xff]   ;;  %v4214_v50 = vld [vmem:[#allocation2 + $0x90] ss:$12 sps:$4 sm:$0xff]  }
  0x33   :  { %3350 = vmatpush3.bf16.msra.mxu0 %v3749_v38  ;;  %v4219_v61 = vld [vmem:[#allocation4 + $0x1] ss:$0 sm:$0xff]  ;;  %v4221_v63 = vld [vmem:[#allocation4 + $0x2] ss:$0 sm:$0xff]  ;;  %vm806_vm5 = vcmask 64512   ;;  %vm963_vm6 = vcmask 517120  }
  0x34   :  { %3351 = vmatprep.subr.bf16.mxu0 %v4814_v29  ;;  %vm3017_vm7 = vcmask 516096   ;;  %vm2938_vm8 = vcmask 261120  }
  0x35   :  { %334 = vmatpush1.bf16.msra.mxu1 %v4115_v15 }
  0x36   :  { %3371 = vmatprep.subr.bf16.mxu1 %v4814_v29 }
  0x37   :  { %3352 = vmatpush3.bf16.msra.mxu0 %v3750_v39 }
  0x38   :  { %3053 = vmatmul.mubr.msk.bf16.vlgmr.msra.gmra.mrb[0].mxu1 %vm219_vm1, %v4120_v18  ;;  %3353 = vmatprep.subr.bf16.mxu0 %v4814_v29 }
  0x39   :  { %3372 = vmatpush3.bf16.msra.mxu1 %v4137_v28  ;;  %3387 = vmatprep.mubr.msk.bf16.mxu1 %vm4029_vm3, %v4814_v29 }
  0x3a   :  { %3373 = vmatprep.subr.bf16.mxu1 %v4814_v29 }
  0x3b   :  { %3354 = vmatpush3.bf16.msra.mxu0 %v3751_v40 }
  0x3c   :  { %3359 = vmatprep.subr.bf16.mxu0 %v4814_v29 }
  0x3d   :  { %3374 = vmatpush3.bf16.msra.mxu1 %v4143_v30 }
  0x3e   :  { %3375 = vmatprep.subr.bf16.mxu1 %v4814_v29  ;;  %3356 = vmatmul.mubr.msk.bf16.vlgmr.msra.gmra.mrb[0].mxu0 %vm219_vm1, %v4120_v18 }
  0x3f   :  { %3360 = vmatpush3.bf16.msra.mxu0 %v4177_v41  ;;  %3367 = vmatprep.mubr.msk.bf16.mxu0 %vm4029_vm3, %v4814_v29 }
  0x40   :  { %3361 = vmatprep.subr.bf16.mxu0 %v4814_v29 }
  0x41   :  { %3376 = vmatpush3.bf16.msra.mxu1 %v4146_v31 }
  0x42   :  { %3377 = vmatprep.subr.bf16.mxu1 %v4814_v29 }
  0x43   :  { %3362 = vmatpush3.bf16.msra.mxu0 %v4183_v42 }
  0x44   :  { %3363 = vmatprep.subr.bf16.mxu0 %v4814_v29 }
  0x45   :  { %3378 = vmatpush3.bf16.msra.mxu1 %v4154_v32 }
  0x46   :  { %3379 = vmatprep.subr.bf16.mxu1 %v4814_v29 }
  0x47   :  { %3364 = vmatpush3.bf16.msra.mxu0 %v4189_v43 }
  0x48   :  { %3365 = vmatprep.subr.bf16.mxu0 %v4814_v29 }
  0x49   :  { %3380 = vmatpush3.bf16.msra.mxu1 %v4158_v33 }
  0x4a   :  { %3381 = vmatprep.subr.bf16.mxu1 %v4814_v29 }
  0x4b   :  { %3366 = vmatpush3.bf16.msra.mxu0 %v4193_v44 }
  0x4c   :  { %597 = vmatprep.subr.bf16.mxu0 %v4196_v45 }
  0x4d   :  { %3382 = vmatpush3.bf16.msra.mxu1 %v4162_v34 }
  0x4e   :  { %3383 = vmatprep.subr.bf16.mxu1 %v4814_v29  ;;  %3368 = vmatmul.mubr.msk.bf16.vlgmr.msra.gmra.mrb[4].mxu0 %vm219_vm1, %v4120_v18 }
  0x4f   :  { %598 = vmatpush1.bf16.msra.mxu0 %v4199_v46  ;;  %629 = vmatprep.mubr.bf16.mxu0 %v4812_v0 }
  0x50   :  { %599 = vmatprep.subr.bf16.mxu0 %v4202_v47 }
  0x51   :  { %3384 = vmatpush3.bf16.msra.mxu1 %v4166_v35 }
  0x52   :  { %3385 = vmatprep.subr.bf16.mxu1 %v4814_v29 }
  0x53   :  { %600 = vmatpush1.bf16.msra.mxu0 %v4207_v48 }
  0x54   :  { %601 = vmatprep.subr.bf16.mxu0 %v4211_v49 }
  0x55   :  { %3386 = vmatpush3.bf16.msra.mxu1 %v4170_v36 }
  0x57   :  { %602 = vmatpush1.bf16.msra.mxu0 %v4214_v50 }
 0x10b   :  { %v361_v20 = vpop.f32.mrb[0].mxu1 }
 0x10c   :  { %v4128_v21 = vadd.f32 %v361_v20, %v4125_v19  ;;  %v4130_v22 = vpop.f32.mrb[1].mxu1 }
 0x10d   :  { %v365_v23 = vpop.f32.mrb[2].mxu1 }
 0x10e   :  { %v366_v24 = vpop.f32.mrb[3].mxu1  ;;  %v412_v25 = vsel %vm411_vm2, %v4128_v21, 0.0  ;;  %v417_v26 = vmul.f32 %v4128_v21, %v4128_v21  ;;  %v4227_v23 = vld [vmem:[#allocation2 + $0xac] ss:$12 sps:$4 sm:$0xff]  }
 0x10f   :  { %413 = vadd.xlane.f32.xlu0 %v412_v25  ;;  %v4229_v24 = vld [vmem:[#allocation2 + $0xa8] ss:$12 sps:$4 sm:$0xff]   ;;  %603 = vmatprep.subr.bf16.mxu0 %v4227_v23  ;;  %v4234_v25 = vld [vmem:[#allocation2 + $0x570] ss:$12 sps:$4 sm:$0xff]  }
 0x110   :  { %v418_v27 = vsel %vm411_vm2, %v417_v26, 0.0  ;;  %604 = vmatpush1.bf16.msra.mxu0 %v4229_v24  ;;  %v4810_v26 = vmov 0.0|0.0  }
 0x111   :  { %3391 = vmatprep.subr.bf16.mxu0 %v4814_v29  ;;  %3663 = vmatprep.subr.bf16.mxu1 %v4810_v26 }
 0x113   :  { %419 = vadd.xlane.f32.xlu0 %v418_v27  ;;  %v4238_v27 = vld [vmem:[#allocation2 + $0x588] ss:$12 sps:$4 sm:$0xff]  }
 0x121   :  { %v4243_v37 = vpop.f32.mrb[4].mxu0 }
 0x122   :  { %v3369_v38 = vpop.f32.mrb[5].mxu0 }
 0x123   :  { %v405_v39 = vpop.f32.mrb[6].mxu0 }
 0x124   :  { %v3370_v40 = vpop.f32.mrb[7].mxu0 }
 0x19c   :  { %v414_v51 = vpop.xlane.xlu0 %413 }
 0x19d   :  { %v416_v52 = vmul.f32 0.0078125, %v414_v51  ;;  %v4245_v51 = vld [vmem:[#allocation4 + $0x3] ss:$0 sm:$0xff] }
 0x19f   :  { %v422_v54 = vmul.f32 %v416_v52, %v416_v52  ;;  %v425_v59 = vsub.f32 %v4128_v21, %v416_v52 }
 0x1a0   :  { %v420_v53 = vpop.xlane.xlu0 %419 }
 0x1a1   :  { %v421_v55 = vmul.f32 0.0078125, %v420_v53 }
 0x1a3   :  { %v423_v56 = vsub.f32 %v421_v55, %v422_v54 }
 0x1a5   :  { %v424_v57 = vmax.f32 %v423_v56, 0.0  ;;  %v4250_v56 = vld [vmem:[#allocation2 + $0x68] ss:$12 sps:$4 sm:$0xff]  }
 0x1a7   :  { %v426_v58 = vadd.f32 1e-05, %v424_v57 }
 0x1a9   :  { %3822 = vrsqrt.f32 %v426_v58 }
 0x1b3   :  { %v3823_v60 = vpop.eup %3822 }
 0x1b4   :  { %v428_v62 = vmul.f32 %v3823_v60, %v425_v59  ;;  %v4256_v59 = vld [vmem:[#allocation2 + $0x80] ss:$12 sps:$4 sm:$0xff]   ;;  %v4262_v60 = vld [vmem:[#allocation2 + $0x98] ss:$12 sps:$4 sm:$0xff]  }
 0x1b6   :  { %v429_v7 = vmul.f32 %v428_v62, %v4219_v61  ;;  %v4266_v62 = vld [vmem:[#allocation2 + $0xb0] ss:$12 sps:$4 sm:$0xff]  }
 0x1b8   :  { %v430_v8 = vadd.f32 %v429_v7, %v4221_v63  ;;  %v4274_v7 = vld [vmem:[#allocation2 + $0x5a0] ss:$12 sps:$4 sm:$0xff]  }
 0x1ba   :  { %v432_v10 = vmul.f32 0.044715, %v430_v8  ;;  %v431_v17 = vmul.f32 0.5, %v430_v8 }
 0x1bc   :  { %v433_v11 = vmul.f32 %v432_v10, %v430_v8  ;;  %v4282_v10 = vld [vmem:[#allocation4 + $0x5] ss:$0 sm:$0xff] }
 0x1bd   :  { %4851 = vst [vmem:[#allocation8_spill] sm:$0xff] %v4282_v10 }
 0x1be   :  { %v434_v12 = vmul.f32 %v433_v11, %v430_v8  ;;  %v4284_v11 = vld [vmem:[#allocation4 + $0x4] ss:$0 sm:$0xff] }
 0x1bf   :  { %4852 = vst [vmem:[#allocation9_spill] sm:$0xff] %v4284_v11 }
 0x1c0   :  { %v435_v13 = vadd.f32 %v434_v12, %v430_v8  ;;  %v4278_v8 = vld [vmem:[#allocation2 + $0x5b8] ss:$12 sps:$4 sm:$0xff]  }
 0x1c2   :  { %v436_v14 = vmul.f32 0.7978846, %v435_v13  ;;  %v409_v13 = vadd.f32 %v4130_v22, %v4282_v10 }
 0x1c4   :  { %3824 = vtanh.f32 %v436_v14 }
 0x1ce   :  { %v3825_v16 = vpop.eup %3824 }
 0x1cf   :  { %v438_v18 = vadd.f32 1.0, %v3825_v16 }
 0x1d1   :  { %v439_v20 = vmul.f32 %v438_v18, %v431_v17 }
 0x1d3   :  { %v440_v21 = vpack.c.bf16 %v439_v20, %v439_v20 }
 0x1d5   :  { %3388 = vmatmul.mubr.bf16.vlgmr.msra.gmra.mrb[4].mxu1 %v440_v21 }
 0x1d6   :  { %3419 = vmatprep.mubr.msk.f32.mxu1 %vm4029_vm3, %v4814_v29  ;;  %3665 = vmatpush3.bf16.msra.mxu1 %v4234_v25 }
 0x1d7   :  { %3666 = vmatprep.subr.bf16.mxu1 %v4810_v26 }
 0x1da   :  { %3668 = vmatpush3.bf16.msra.mxu1 %v4238_v27 }
 0x1db   :  { %3669 = vmatprep.subr.bf16.mxu1 %v4810_v26 }
 0x1de   :  { %3671 = vmatpush3.bf16.msra.mxu1 %v4274_v7 }
 0x1df   :  { %3672 = vmatprep.subr.bf16.mxu1 %v4810_v26 }
 0x1e2   :  { %3674 = vmatpush3.bf16.msra.mxu1 %v4278_v8 }
 0x1e3   :  { %3422 = vmatprep.subr.mxu1 %v4814_v29 }
 0x2a8   :  { %v523_v52 = vpop.f32.mrb[4].mxu1 }
 0x2a9   :  { %v4248_v53 = vadd.f32 %v523_v52, %v4245_v51  ;;  %v3389_v54 = vpop.f32.mrb[5].mxu1 }
 0x2aa   :  { %v526_v55 = vpop.f32.mrb[6].mxu1 }
 0x2ab   :  { %v529_v57 = vpack.c.bf16 %v4248_v53, %v4248_v53  ;;  %v3390_v58 = vpop.f32.mrb[7].mxu1 }
 0x2ad   :  { %3075 = vmatmul.mubr.msk.bf16.vlgmr.msra.gmra.mrb[8].mxu0 %vm219_vm1, %v529_v57 }
 0x2ae   :  { %3392 = vmatpush3.bf16.msra.mxu0 %v4250_v56  ;;  %3399 = vmatprep.mubr.msk.bf16.mxu0 %vm4029_vm3, %v4814_v29 }
 0x2af   :  { %3393 = vmatprep.subr.bf16.mxu0 %v4814_v29 }
 0x2b2   :  { %3394 = vmatpush3.bf16.msra.mxu0 %v4256_v59 }
 0x2b3   :  { %3395 = vmatprep.subr.bf16.mxu0 %v4814_v29 }
 0x2b6   :  { %3396 = vmatpush3.bf16.msra.mxu0 %v4262_v60 }
 0x2b7   :  { %3397 = vmatprep.subr.bf16.mxu0 %v4814_v29 }
 0x2ba   :  { %3398 = vmatpush3.bf16.msra.mxu0 %v4266_v62 }
 0x2bb   :  { %3427 = vmatprep.subr.bf16.mxu0 %v4814_v29 }
 0x2bd   :  { %3400 = vmatmul.mubr.msk.bf16.vlgmr.msra.gmra.mrb[12].mxu0 %vm219_vm1, %v529_v57 }
 0x2be   :  { %3435 = vmatprep.mubr.msk.bf16.mxu0 %vm4029_vm3, %v4814_v29 }
 0x380   :  { %v631_v12 = vpop.f32.mrb[8].mxu0 }
 0x381   :  { %v678_v14 = vadd.f32 %v631_v12, %v4284_v11  ;;  %v633_v16 = vpop.f32.mrb[9].mxu0 }
 0x382   :  { %v679_v17 = vadd.f32 %v633_v16, %v4282_v10  ;;  %v635_v18 = vpop.f32.mrb[10].mxu0 }
 0x383   :  { %v681_v20 = vmul.f32 %v678_v14, %v409_v13  ;;  %v683_v21 = vmul.f32 %v678_v14, %v4282_v10  ;;  %v636_v38 = vpop.f32.mrb[11].mxu0  ;;  %v174_v13 = vld [vmem:[#allocation2 + $0x5d0] sm:$0xf] }
 0x384   :  { %v682_v39 = vmul.f32 %v679_v17, %v678_v14  ;;  %v4296_v16 = vunpack.c.l.bf16 %v174_v13  ;;  %v4299_v14 = vld [vmem:[#allocation2 + $0x180] ss:$12 sps:$4 sm:$0xff]  }
 0x385   :  { %v688_v52 = vrot.slane %v683_v21, 4  ;;  %4853 = vst [vmem:[#allocation10_spill] sm:$0xff] %v4299_v14  ;;  %3428 = vmatpush3.bf16.msra.mxu0 %v4299_v14 }
 0x386   :  { %v685_v40 = vrot.slane %v682_v39, 6  ;;  %3429 = vmatprep.subr.bf16.mxu0 %v4814_v29 }
 0x388   :  { %v690_v54 = vsel %vm411_vm2, %v681_v20, %v685_v40 }
 0x389   :  { %v692_v55 = vsel %vm691_vm4, %v690_v54, %v688_v52 }
 0x38a   :  { %3420 = vmatmul.mubr.msk.f32.vlgmr.msra.gmra.mrb[8].mxu1 %vm219_vm1, %v692_v55 }
 0x38b   :  { %3424 = vmatprep.mubr.msk.f32.mxu1 %vm4029_vm3, %v4814_v29  ;;  %3423 = vmatpush3.msra.mxu1 %v4296_v16 }
 0x390   :  { %v672_v22 = vpop.f32.mrb[12].mxu0 }
 0x391   :  { %v3401_v57 = vpop.f32.mrb[13].mxu0 }
 0x392   :  { %v675_v58 = vpop.f32.mrb[14].mxu0 }
 0x393   :  { %v3402_v12 = vpop.f32.mrb[15].mxu0 }
 0x45d   :  { %v762_v17 = vpop.f32.mrb[8].mxu1 }
 0x45e   :  { %v767_v18 = vrot.slane %v762_v17, 2  ;;  %v3421_v20 = vpop.f32.mrb[9].mxu1  ;;  %v770_v38 = vrot.slane %v762_v17, 4 }
 0x460   :  { %v769_v21 = vmax.f32 %v762_v17, %v767_v18 }
 0x462   :  { %v772_v39 = vmax.f32 %v769_v21, %v770_v38 }
 0x464   :  { %v773_v40 = vsub.f32 %v762_v17, %v772_v39  ;;  %v777_v52 = vrot.slane %v772_v39, 6  ;;  %v782_v54 = vrot.slane %v772_v39, 4 }
 0x466   :  { %v779_v55 = vsub.f32 %v762_v17, %v777_v52  ;;  %v784_v57 = vsub.f32 %v762_v17, %v782_v54  ;;  %v774_v58 = vmul.f32 1.442695, %v773_v40 }
 0x468   :  { %v780_v12 = vmul.f32 1.442695, %v779_v55  ;;  %v785_v13 = vmul.f32 1.442695, %v784_v57  ;;  %v4854_v55 = vmov 0  }
 0x469   :  { %v4307_v57 = vld [vmem:[#allocation2 + $0x198] ss:$12 sps:$4 sm:$0xff]  }
 0x46a   :  { %3826 = vpow2.f32 %v780_v12  ;;  %4855 = vst [vmem:[#allocation11_spill] sm:$0xff] %v4307_v57  ;;  %3430 = vmatpush3.bf16.msra.mxu0 %v4307_v57 }
 0x46b   :  { %3828 = vpow2.f32 %v785_v13 }
 0x46c   :  { %3830 = vpow2.f32 %v774_v58 }
 0x474   :  { %v3827_v26 = vpop.eup %3826 }
 0x475   :  { %v3829_v0 = vpop.eup %3828  ;;  %v788_v29 = vrot.slane %v3827_v26, 2 }
 0x476   :  { %v3831_v14 = vpop.eup %3830  ;;  %v792_v20 = vrot.slane %v3829_v0, 4 }
 0x477   :  { %v790_v11 = vadd.f32 %v3831_v14, %v788_v29  ;;  %v4856_v29 = vmov 0.0  }
 0x478   :  { %3431 = vmatprep.subr.bf16.mxu0 %v4856_v29 }
 0x479   :  { %v794_v18 = vadd.f32 %v792_v20, %v790_v11  ;;  %v4311_v11 = vld [vmem:[#allocation2 + $0x1b0] ss:$12 sps:$4 sm:$0xff]  }
 0x47a   :  { %4857 = vst [vmem:[#allocation12_spill] sm:$0xff] %v4311_v11  ;;  %3432 = vmatpush3.bf16.msra.mxu0 %v4311_v11  ;;  %v4356_v11 = vld [vmem:[#allocation4 + $0x18] ss:$0 sm:$0xff] }
 0x47b   :  { %3832 = vrcp.f32 %v794_v18  ;;  %3433 = vmatprep.subr.bf16.mxu0 %v4856_v29  ;;  %4863 = vst [vmem:[#allocation18_spill] sm:$0xff] %v4356_v11 }
 0x485   :  { %v3833_v21 = vpop.eup %3832 }
 0x486   :  { %v798_v38 = vrot.slane %v3833_v21, 6  ;;  %v801_v10 = vrot.slane %v3833_v21, 4  ;;  %v796_v39 = vmul.f32 %v3833_v21, %v3831_v14 }
 0x488   :  { %v800_v52 = vmul.f32 %v3827_v26, %v798_v38  ;;  %v803_v17 = vmul.f32 %v3829_v0, %v801_v10  ;;  %v4315_v0 = vld [vmem:[#allocation2 + $0x1c8] ss:$12 sps:$4 sm:$0xff]   ;;  %v4318_v26 = vld [vmem:[#allocation4 + $0x6] ss:$0 sm:$0xff] }
 0x489   :  { %4858 = vst [vmem:[#allocation13_spill] sm:$0xff] %v4315_v0  ;;  %3434 = vmatpush3.bf16.msra.mxu0 %v4315_v0  ;;  %4859 = vst [vmem:[#allocation14_spill] sm:$0xff] %v4318_v26  ;;  %v680_v10 = vadd.f32 %v672_v22, %v4318_v26  ;;  %v410_v14 = vadd.f32 %v4243_v37, %v4318_v26 }
 0x48a   :  { %v804_v40 = vsel %vm411_vm2, %v796_v39, %v800_v52 }
 0x48b   :  { %v805_v54 = vsel %vm691_vm4, %v804_v40, %v803_v17  ;;  %v882_v58 = vrot.slane %v680_v10, 6 }
 0x48c   :  { %3425 = vmatmul.mubr.msk.f32.vlgmr.msra.gmra.mrb[10].mxu1 %vm806_vm5, %v805_v54  ;;  %v4325_v54 = vld [vmem:[#allocation4 + $0x7] ss:$0 sm:$0xff] }
 0x48d   :  { %1070 = vmatprep.mubr.bf16.mxu1 %v4854_v55  ;;  %4860 = vst [vmem:[#allocation15_spill] sm:$0xff] %v4325_v54 }
 0x55f   :  { %v876_v12 = vpop.f32.mrb[10].mxu1 }
 0x560   :  { %v880_v13 = vmul.f32 %v876_v12, %v410_v14  ;;  %v884_v20 = vmul.f32 %v882_v58, %v876_v12  ;;  %v889_v18 = vmul.f32 %v876_v12, %v4318_v26  ;;  %v3426_v21 = vpop.f32.mrb[11].mxu1 }
 0x561   :  { %v4333_v21 = vld [vmem:[#allocation2 + $0x1e0] ss:$12 sps:$4 sm:$0xff]  }
 0x562   :  { %v886_v38 = vrot.slane %v884_v20, 2  ;;  %v891_v52 = vrot.slane %v889_v18, 4  ;;  %v4331_v18 = vld [vmem:[#allocation2 + $0x1e4] ss:$12 sps:$4 sm:$0xff]  }
 0x563   :  { %1038 = vmatprep.subr.bf16.mxu1 %v4331_v18 }
 0x564   :  { %v888_v39 = vadd.f32 %v886_v38, %v880_v13  ;;  %1039 = vmatpush1.bf16.msra.mxu1 %v4333_v21  ;;  %v4337_v38 = vld [vmem:[#allocation2 + $0x1fc] ss:$12 sps:$4 sm:$0xff]  }
 0x565   :  { %1040 = vmatprep.subr.bf16.mxu1 %v4337_v38 }
 0x566   :  { %v893_v17 = vadd.f32 %v891_v52, %v888_v39  ;;  %v4339_v39 = vld [vmem:[#allocation2 + $0x1f8] ss:$12 sps:$4 sm:$0xff]  }
 0x567   :  { %v4347_v52 = vld [vmem:[#allocation2 + $0x22c] ss:$12 sps:$4 sm:$0xff]  }
 0x568   :  { %v894_v40 = vpack.c.bf16 %v893_v17, %v893_v17  ;;  %1041 = vmatpush1.bf16.msra.mxu1 %v4339_v39  ;;  %v4351_v17 = vld [vmem:[#allocation2 + $0x228] ss:$12 sps:$4 sm:$0xff]  }
 0x569   :  { %4862 = vst [vmem:[#allocation17_spill] sm:$0xff] %v4351_v17 }
 0x56a   :  { %3436 = vmatmul.mubr.msk.bf16.vlgmr.msra.gmra.mrb[16].mxu0 %vm219_vm1, %v894_v40 }
 0x63d   :  { %v956_v22 = vpop.f32.mrb[16].mxu0 }
 0x63e   :  { %v957_v0 = vadd.f32 %v956_v22, %v4325_v54  ;;  %v3437_v37 = vpop.f32.mrb[17].mxu0 }
 0x63f   :  { %v959_v10 = vpop.f32.mrb[18].mxu0 }
 0x640   :  { %v962_v14 = vadd.f32 %v957_v0, %v4248_v53  ;;  %v3438_v58 = vpop.f32.mrb[19].mxu0  ;;  %v4343_v53 = vld [vmem:[#allocation2 + $0x214] ss:$12 sps:$4 sm:$0xff]   ;;  %v4345_v0 = vld [vmem:[#allocation2 + $0x210] ss:$12 sps:$4 sm:$0xff]  }
 0x641   :  { %4861 = vst [vmem:[#allocation16_spill] sm:$0xff] %v4345_v0  ;;  %1042 = vmatprep.subr.bf16.mxu1 %v4343_v53 }
 0x642   :  { %v964_v12 = vsel %vm963_vm6, %v962_v14, 0.0  ;;  %v969_v20 = vmul.f32 %v962_v14, %v962_v14  ;;  %1043 = vmatpush1.bf16.msra.mxu1 %v4345_v0  ;;  %v4358_v0 = vld [vmem:[#allocation4 + $0x19] ss:$0 sm:$0xff] }
 0x643   :  { %965 = vadd.xlane.f32.xlu1 %v964_v12  ;;  %1044 = vmatprep.subr.bf16.mxu1 %v4347_v52  ;;  %4864 = vst [vmem:[#allocation19_spill] sm:$0xff] %v4358_v0 }
 0x644   :  { %v970_v13 = vsel %vm963_vm6, %v969_v20, 0.0 }
 0x646   :  { %1045 = vmatpush1.bf16.msra.mxu1 %v4351_v17 }
 0x647   :  { %971 = vadd.xlane.f32.xlu1 %v970_v13  ;;  %1258 = vmatprep.subr.bf16.mxu1 %v4083_v1 }
 0x6d0   :  { %v966_v40 = vpop.xlane.xlu1 %965 }
 0x6d1   :  { %v968_v22 = vmul.f32 0.015625, %v966_v40 }
 0x6d3   :  { %v974_v10 = vmul.f32 %v968_v22, %v968_v22  ;;  %v977_v54 = vsub.f32 %v962_v14, %v968_v22  ;;  %v4405_v14 = vld [vmem:[#allocation2 + $0x378] ss:$12 sps:$4 sm:$0xff]   ;;  %v4411_v22 = vld [vmem:[#allocation2 + $0x390] ss:$12 sps:$4 sm:$0xff]  }
 0x6d4   :  { %v972_v37 = vpop.xlane.xlu1 %971  ;;  %4875 = vst [vmem:[#allocation30_spill] sm:$0xff] %v4405_v14  ;;  %4877 = vst [vmem:[#allocation32_spill] sm:$0xff] %v4411_v22 }
 0x6d5   :  { %v973_v58 = vmul.f32 0.015625, %v972_v37  ;;  %v4414_v37 = vld [vmem:[#allocation2 + $0x2d0] ss:$12 sps:$4 sm:$0xff]  }
 0x6d6   :  { %4878 = vst [vmem:[#allocation33_spill] sm:$0xff] %v4414_v37 }
 0x6d7   :  { %v975_v12 = vsub.f32 %v973_v58, %v974_v10  ;;  %v4417_v10 = vld [vmem:[#allocation2 + $0x3a8] ss:$12 sps:$4 sm:$0xff]  }
 0x6d8   :  { %4879 = vst [vmem:[#allocation34_spill] sm:$0xff] %v4417_v10  ;;  %v4420_v58 = vld [vmem:[#allocation2 + $0x2e8] ss:$12 sps:$4 sm:$0xff]  }
 0x6d9   :  { %v976_v20 = vmax.f32 %v975_v12, 0.0  ;;  %4880 = vst [vmem:[#allocation35_spill] sm:$0xff] %v4420_v58  ;;  %v985_v12 = vlaneseq }
 0x6db   :  { %v978_v13 = vadd.f32 1e-05, %v976_v20  ;;  %v4425_v20 = vshrl.u32 %v985_v12, 7 }
 0x6dd   :  { %3834 = vrsqrt.f32 %v978_v13  ;;  %4881 = vst [vmem:[#allocation36_spill] sm:$0xff] %v4425_v20  ;;  %v987_v13 = vsub.s32 0, %v4425_v20 }
 0x6e7   :  { %v3835_v26 = vpop.eup %3834 }
 0x6e8   :  { %v980_v57 = vmul.f32 %v3835_v26, %v977_v54  ;;  %v4378_v26 = vld [vmem:[#allocation2 + $0x240] ss:$12 sps:$4 sm:$0xff]  }
 0x6e9   :  { %4866 = vst [vmem:[#allocation21_spill] sm:$0xff] %v4378_v26  ;;  %v4402_v54 = vld [vmem:[#allocation2 + $0x2a0] ss:$12 sps:$4 sm:$0xff]  }
 0x6ea   :  { %v981_v17 = vmul.f32 %v980_v57, %v4356_v11  ;;  %v4376_v57 = vld [vmem:[#allocation2 + $0x300] ss:$12 sps:$4 sm:$0xff]   ;;  %4874 = vst [vmem:[#allocation29_spill] sm:$0xff] %v4402_v54 }
 0x6eb   :  { %4865 = vst [vmem:[#allocation20_spill] sm:$0xff] %v4376_v57  ;;  %3184 = vmatprep.subr.bf16.mxu0 %v4376_v57 }
 0x6ec   :  { %v4362_v1 = vadd.f32 %v981_v17, %v4358_v0  ;;  %3185 = vmatpush3.bf16.msra.mxu0 %v4378_v26  ;;  %v4408_v17 = vld [vmem:[#allocation2 + $0x2b8] ss:$12 sps:$4 sm:$0xff]   ;;  %v991_v0 = vsub.s32 1, %v4425_v20 }
 0x6ed   :  { %4876 = vst [vmem:[#allocation31_spill] sm:$0xff] %v4408_v17 }
 0x6ee   :  { %v983_v40 = vpack.c.bf16 %v4362_v1, %v4362_v1 }
 0x6f0   :  { %3092 = vmatmul.mubr.msk.bf16.vlgmr.msra.gmra.mrb[12].mxu1 %vm219_vm1, %v983_v40  ;;  %v122_v40 = vld [vmem:[#allocation4 + $0x1a] ss:$8 sm:$0x3] }
 0x6f1   :  { %1259 = vmatpush1.bf16.msra.mxu1 %v4085_v2  ;;  %1290 = vmatprep.mubr.bf16.mxu1 %v4854_v55  ;;  %v4382_v2 = vld [vmem:[#allocation2 + $0x318] ss:$12 sps:$4 sm:$0xff]   ;;  %v4429_v11 = vrot.slane %v122_v40, %v987_v13 }
 0x6f2   :  { %1260 = vmatprep.subr.bf16.mxu1 %v4088_v3  ;;  %4867 = vst [vmem:[#allocation22_spill] sm:$0xff] %v4382_v2  ;;  %v4384_v3 = vld [vmem:[#allocation2 + $0x258] ss:$12 sps:$4 sm:$0xff]   ;;  %3186 = vmatprep.subr.bf16.mxu0 %v4382_v2 }
 0x6f3   :  { %4868 = vst [vmem:[#allocation23_spill] sm:$0xff] %v4384_v3  ;;  %3187 = vmatpush3.bf16.msra.mxu0 %v4384_v3  ;;  %4882 = vst [vmem:[#allocation37_spill] sm:$0xff] %v4429_v11 }
 0x6f5   :  { %1261 = vmatpush1.bf16.msra.mxu1 %v4091_v4  ;;  %v4388_v4 = vld [vmem:[#allocation2 + $0x330] ss:$12 sps:$4 sm:$0xff]  }
 0x6f6   :  { %1262 = vmatprep.subr.bf16.mxu1 %v4094_v5  ;;  %4869 = vst [vmem:[#allocation24_spill] sm:$0xff] %v4388_v4  ;;  %v4390_v5 = vld [vmem:[#allocation2 + $0x270] ss:$12 sps:$4 sm:$0xff]   ;;  %3188 = vmatprep.subr.bf16.mxu0 %v4388_v4 }
 0x6f7   :  { %4870 = vst [vmem:[#allocation25_spill] sm:$0xff] %v4390_v5  ;;  %3189 = vmatpush3.bf16.msra.mxu0 %v4390_v5 }
 0x6f9   :  { %1263 = vmatpush1.bf16.msra.mxu1 %v4096_v6  ;;  %v4393_v6 = vld [vmem:[#allocation2 + $0x348] ss:$12 sps:$4 sm:$0xff]  }
 0x6fa   :  { %1264 = vmatprep.subr.bf16.mxu1 %v4104_v9  ;;  %4871 = vst [vmem:[#allocation26_spill] sm:$0xff] %v4393_v6  ;;  %v4396_v9 = vld [vmem:[#allocation2 + $0x288] ss:$12 sps:$4 sm:$0xff]   ;;  %3190 = vmatprep.subr.bf16.mxu0 %v4393_v6 }
 0x6fb   :  { %4872 = vst [vmem:[#allocation27_spill] sm:$0xff] %v4396_v9  ;;  %3191 = vmatpush3.bf16.msra.mxu0 %v4396_v9 }
 0x6fd   :  { %1265 = vmatpush1.bf16.msra.mxu1 %v4115_v15  ;;  %v4399_v15 = vld [vmem:[#allocation2 + $0x360] ss:$12 sps:$4 sm:$0xff]  }
 0x6fe   :  { %3439 = vmatprep.subr.bf16.mxu1 %v4856_v29  ;;  %4873 = vst [vmem:[#allocation28_spill] sm:$0xff] %v4399_v15  ;;  %3192 = vmatprep.subr.bf16.mxu0 %v4399_v15 }
 0x6ff   :  { %3193 = vmatpush3.bf16.msra.mxu0 %v4402_v54 }
 0x700   :  { %3194 = vmatprep.subr.bf16.mxu0 %v4405_v14 }
 0x703   :  { %3195 = vmatpush3.bf16.msra.mxu0 %v4408_v17 }
 0x704   :  { %3196 = vmatprep.subr.bf16.mxu0 %v4411_v22  ;;  %v4431_v22 = vrot.slane %v122_v40, %v991_v0 }
 0x706   :  { %4883 = vst [vmem:[#allocation38_spill] sm:$0xff] %v4431_v22 }
 0x707   :  { %3197 = vmatpush3.bf16.msra.mxu0 %v4414_v37 }
 0x708   :  { %3198 = vmatprep.subr.bf16.mxu0 %v4417_v10 }
 0x70b   :  { %3199 = vmatpush3.bf16.msra.mxu0 %v4420_v58 }
 0x70c   :  { %3451 = vmatprep.subr.bf16.mxu0 %v4856_v29 }
 0x7c3   :  { %v1072_v37 = vpop.f32.mrb[12].mxu1 }
 0x7c4   :  { %v1073_v17 = vadd.f32 %v1072_v37, %v4429_v11  ;;  %v1074_v10 = vpop.f32.mrb[13].mxu1 }
 0x7c5   :  { %v1075_v58 = vadd.f32 %v1074_v10, %v4431_v22  ;;  %v1076_v14 = vpop.f32.mrb[14].mxu1 }
 0x7c6   :  { %v1081_v54 = vmul.f32 0.044715, %v1073_v17  ;;  %v1077_v15 = vpop.f32.mrb[15].mxu1  ;;  %v1079_v37 = vmul.f32 0.5, %v1073_v17 }
 0x7c7   :  { %v1082_v12 = vmul.f32 0.044715, %v1075_v58  ;;  %v1080_v26 = vmul.f32 0.5, %v1075_v58 }
 0x7c8   :  { %v1083_v9 = vmul.f32 %v1081_v54, %v1073_v17 }
 0x7c9   :  { %v1084_v6 = vmul.f32 %v1082_v12, %v1075_v58  ;;  %v4459_v12 = vld [vmem:[#allocation4 + $0x1c] ss:$0 sm:$0xff] }
 0x7ca   :  { %v1085_v5 = vmul.f32 %v1083_v9, %v1073_v17 }
 0x7cb   :  { %v1086_v4 = vmul.f32 %v1084_v6, %v1075_v58 }
 0x7cc   :  { %v1087_v3 = vadd.f32 %v1085_v5, %v1073_v17 }
 0x7cd   :  { %v1088_v20 = vadd.f32 %v1086_v4, %v1075_v58 }
 0x7ce   :  { %v1089_v13 = vmul.f32 0.7978846, %v1087_v3 }
 0x7cf   :  { %v1090_v2 = vmul.f32 0.7978846, %v1088_v20 }
 0x7d0   :  { %3836 = vtanh.f32 %v1089_v13  ;;  %v4461_v13 = vld [vmem:[#allocation4 + $0x1d] ss:$0 sm:$0xff] }
 0x7d1   :  { %3838 = vtanh.f32 %v1090_v2 }
 0x7da   :  { %v3837_v0 = vpop.eup %3836 }
 0x7db   :  { %v3839_v40 = vpop.eup %3838  ;;  %v1093_v11 = vadd.f32 1.0, %v3837_v0 }
 0x7dc   :  { %v1094_v10 = vadd.f32 1.0, %v3839_v40 }
 0x7dd   :  { %v1095_v14 = vmul.f32 %v1093_v11, %v1079_v37 }
 0x7de   :  { %v1096_v22 = vmul.f32 %v1094_v10, %v1080_v26 }
 0x7df   :  { %v1097_v57 = vpack.c.bf16 %v1095_v14, %v1095_v14 }
 0x7e0   :  { %v1098_v15 = vpack.c.bf16 %v1096_v22, %v1096_v22 }
 0x7e2   :  { %1227 = vmatprep.mubr.bf16.mxu0 %v1098_v15 }
 0x7e3   :  { %1228 = vmatmul.mubr.bf16.vlgmr.msra.gmra.mrb[20].mxu0 %v1097_v57 }
 0x7e4   :  { %3452 = vmatpush3.bf16.msra.mxu0 %v4137_v28  ;;  %3467 = vmatprep.mubr.msk.bf16.mxu0 %vm4029_vm3, %v4856_v29  ;;  %v4884_v28 = vmov 0.0|0.0  }
 0x7e5   :  { %3453 = vmatprep.subr.bf16.mxu0 %v4856_v29 }
 0x7e8   :  { %3454 = vmatpush3.bf16.msra.mxu0 %v4143_v30 }
 0x7e9   :  { %3455 = vmatprep.subr.bf16.mxu0 %v4856_v29 }
 0x7ec   :  { %3456 = vmatpush3.bf16.msra.mxu0 %v4146_v31  ;;  %v4453_v31 = vld [vmem:[#allocation4 + $0x1b] ss:$0 sm:$0xff] }
 0x7ed   :  { %3457 = vmatprep.subr.bf16.mxu0 %v4856_v29 }
 0x7f0   :  { %3458 = vmatpush3.bf16.msra.mxu0 %v4154_v32 }
 0x7f1   :  { %3459 = vmatprep.subr.bf16.mxu0 %v4856_v29 }
 0x7f4   :  { %3460 = vmatpush3.bf16.msra.mxu0 %v4158_v33 }
 0x7f5   :  { %3461 = vmatprep.subr.bf16.mxu0 %v4856_v29 }
 0x7f8   :  { %3462 = vmatpush3.bf16.msra.mxu0 %v4162_v34 }
 0x7f9   :  { %3463 = vmatprep.subr.bf16.mxu0 %v4856_v29 }
 0x7fc   :  { %3464 = vmatpush3.bf16.msra.mxu0 %v4166_v35 }
 0x7fd   :  { %3465 = vmatprep.subr.bf16.mxu0 %v4856_v29 }
 0x800   :  { %3466 = vmatpush3.bf16.msra.mxu0 %v4170_v36 }
 0x801   :  { %3675 = vmatprep.subr.bf16.mxu0 %v4884_v28 }
 0x8b6   :  { %v3200_v30 = vpop.f32.mrb[20].mxu0 }
 0x8b7   :  { %v3201_v32 = vpop.f32.mrb[21].mxu0 }
 0x8b8   :  { %v3202_v11 = vadd.f32 %v3201_v32, %v3200_v30  ;;  %v3203_v33 = vpop.f32.mrb[22].mxu0 }
 0x8b9   :  { %v3204_v57 = vpop.f32.mrb[23].mxu0 }
 0x8ba   :  { %v1230_v26 = vadd.f32 %v3202_v11, %v4453_v31 }
 0x8bc   :  { %v1235_v34 = vadd.f32 %v1230_v26, %v4362_v1 }
 0x8be   :  { %v1236_v2 = vsel %vm963_vm6, %v1235_v34, 0.0  ;;  %v1240_v35 = vmul.f32 %v1235_v34, %v1235_v34 }
 0x8bf   :  { %1237 = vadd.xlane.f32.xlu0 %v1236_v2 }
 0x8c0   :  { %v1241_v3 = vsel %vm963_vm6, %v1240_v35, 0.0 }
 0x8c1   :  { %1242 = vadd.xlane.f32.xlu1 %v1241_v3 }
 0x94c   :  { %v1238_v36 = vpop.xlane.xlu0 %1237 }
 0x94d   :  { %v1239_v4 = vmul.f32 0.015625, %v1238_v36 }
 0x94e   :  { %v1243_v5 = vpop.xlane.xlu1 %1242 }
 0x94f   :  { %v1245_v6 = vmul.f32 %v1239_v4, %v1239_v4  ;;  %v1244_v9 = vmul.f32 0.015625, %v1243_v5  ;;  %v1248_v58 = vsub.f32 %v1235_v34, %v1239_v4 }
 0x951   :  { %v1246_v54 = vsub.f32 %v1244_v9, %v1245_v6 }
 0x953   :  { %v1247_v17 = vmax.f32 %v1246_v54, 0.0 }
 0x955   :  { %v1249_v22 = vadd.f32 1e-05, %v1247_v17 }
 0x957   :  { %3840 = vrsqrt.f32 %v1249_v22 }
 0x961   :  { %v3841_v20 = vpop.eup %3840 }
 0x962   :  { %v1251_v1 = vmul.f32 %v3841_v20, %v1248_v58 }
 0x964   :  { %v1252_v0 = vmul.f32 %v1251_v1, %v4459_v12 }
 0x966   :  { %v1253_v40 = vadd.f32 %v1252_v0, %v4461_v13 }
 0x968   :  { %v1254_v37 = vpack.c.bf16 %v1253_v40, %v1253_v40 }
 0x96a   :  { %3109 = vmatmul.mubr.msk.bf16.vlgmr.msra.gmra.mrb[16].mxu1 %vm219_vm1, %v1254_v37 }
 0x96b   :  { %3440 = vmatpush3.bf16.msra.mxu1 %v4177_v41  ;;  %3447 = vmatprep.mubr.msk.bf16.mxu1 %vm4029_vm3, %v4856_v29 }
 0x96c   :  { %3441 = vmatprep.subr.bf16.mxu1 %v4856_v29 }
 0x96f   :  { %3442 = vmatpush3.bf16.msra.mxu1 %v4183_v42 }
 0x970   :  { %3443 = vmatprep.subr.bf16.mxu1 %v4856_v29 }
 0x973   :  { %3444 = vmatpush3.bf16.msra.mxu1 %v4189_v43 }
 0x974   :  { %3445 = vmatprep.subr.bf16.mxu1 %v4856_v29 }
 0x977   :  { %3446 = vmatpush3.bf16.msra.mxu1 %v4193_v44 }
 0x978   :  { %1414 = vmatprep.subr.bf16.mxu1 %v4196_v45 }
 0x97a   :  { %3448 = vmatmul.mubr.msk.bf16.vlgmr.msra.gmra.mrb[20].mxu1 %vm219_vm1, %v1254_v37 }
 0x97b   :  { %1415 = vmatpush1.bf16.msra.mxu1 %v4199_v46  ;;  %1446 = vmatprep.mubr.bf16.mxu1 %v4854_v55 }
 0x97c   :  { %1416 = vmatprep.subr.bf16.mxu1 %v4202_v47 }
 0x97f   :  { %1417 = vmatpush1.bf16.msra.mxu1 %v4207_v48 }
 0x980   :  { %1418 = vmatprep.subr.bf16.mxu1 %v4211_v49 }
 0x983   :  { %1419 = vmatpush1.bf16.msra.mxu1 %v4214_v50 }
 0x984   :  { %1420 = vmatprep.subr.bf16.mxu1 %v4227_v23 }
 0x987   :  { %1421 = vmatpush1.bf16.msra.mxu1 %v4229_v24 }
 0x988   :  { %3471 = vmatprep.subr.bf16.mxu1 %v4856_v29 }
 0xa3d   :  { %v1292_v41 = vpop.f32.mrb[16].mxu1 }
 0xa3e   :  { %v1339_v42 = vadd.f32 %v1292_v41, %v4125_v19  ;;  %v4487_v43 = vpop.f32.mrb[17].mxu1 }
 0xa3f   :  { %v1296_v44 = vpop.f32.mrb[18].mxu1 }
 0xa40   :  { %v1297_v45 = vpop.f32.mrb[19].mxu1  ;;  %v1342_v46 = vsel %vm411_vm2, %v1339_v42, 0.0  ;;  %v1346_v47 = vmul.f32 %v1339_v42, %v1339_v42 }
 0xa41   :  { %1343 = vadd.xlane.f32.xlu0 %v1342_v46 }
 0xa42   :  { %v1347_v48 = vsel %vm411_vm2, %v1346_v47, 0.0 }
 0xa43   :  { %1348 = vadd.xlane.f32.xlu1 %v1347_v48 }
 0xa4d   :  { %v4491_v49 = vpop.f32.mrb[20].mxu1 }
 0xa4e   :  { %v3449_v50 = vpop.f32.mrb[21].mxu1 }
 0xa4f   :  { %v1336_v23 = vpop.f32.mrb[22].mxu1 }
 0xa50   :  { %v3450_v24 = vpop.f32.mrb[23].mxu1  ;;  %v4887_v23 = vld [vmem:[#allocation16_spill] sm:$0xff] }
 0xa51   :  { %v4888_v24 = vld [vmem:[#allocation17_spill] sm:$0xff] }
 0xace   :  { %v1344_v10 = vpop.xlane.xlu0 %1343 }
 0xacf   :  { %v1345_v14 = vmul.f32 0.0078125, %v1344_v10  ;;  %v4542_v10 = vld [vmem:[#allocation2 + $0x4] ss:$12 sps:$4 sm:$0xff]  }
 0xad0   :  { %v1349_v15 = vpop.xlane.xlu1 %1348 }
 0xad1   :  { %v1351_v19 = vmul.f32 %v1345_v14, %v1345_v14  ;;  %v1350_v30 = vmul.f32 0.0078125, %v1349_v15  ;;  %v1354_v57 = vsub.f32 %v1339_v42, %v1345_v14 }
 0xad3   :  { %v1352_v32 = vsub.f32 %v1350_v30, %v1351_v19 }
 0xad5   :  { %v1353_v11 = vmax.f32 %v1352_v32, 0.0 }
 0xad7   :  { %v1355_v33 = vadd.f32 1e-05, %v1353_v11 }
 0xad9   :  { %3842 = vrsqrt.f32 %v1355_v33 }
 0xae3   :  { %v3843_v26 = vpop.eup %3842 }
 0xae4   :  { %v1357_v34 = vmul.f32 %v3843_v26, %v1354_v57 }
 0xae6   :  { %v1358_v2 = vmul.f32 %v1357_v34, %v4219_v61 }
 0xae8   :  { %v1359_v35 = vadd.f32 %v1358_v2, %v4221_v63 }
 0xaea   :  { %v1361_v3 = vmul.f32 0.044715, %v1359_v35  ;;  %v1360_v54 = vmul.f32 0.5, %v1359_v35 }
 0xaec   :  { %v1362_v36 = vmul.f32 %v1361_v3, %v1359_v35 }
 0xaee   :  { %v1363_v4 = vmul.f32 %v1362_v36, %v1359_v35 }
 0xaf0   :  { %v1364_v5 = vadd.f32 %v1363_v4, %v1359_v35 }
 0xaf2   :  { %v1365_v6 = vmul.f32 0.7978846, %v1364_v5 }
 0xaf4   :  { %3844 = vtanh.f32 %v1365_v6 }
 0xafe   :  { %v3845_v9 = vpop.eup %3844 }
 0xaff   :  { %v1367_v17 = vadd.f32 1.0, %v3845_v9 }
 0xb01   :  { %v1368_v22 = vmul.f32 %v1367_v17, %v1360_v54 }
 0xb03   :  { %v1369_v58 = vpack.c.bf16 %v1368_v22, %v1368_v22 }
 0xb05   :  { %3468 = vmatmul.mubr.bf16.vlgmr.msra.gmra.mrb[24].mxu0 %v1369_v58 }
 0xb06   :  { %3677 = vmatpush3.bf16.msra.mxu0 %v4234_v25  ;;  %3499 = vmatprep.mubr.msk.f32.mxu0 %vm4029_vm3, %v4856_v29 }
 0xb07   :  { %3678 = vmatprep.subr.bf16.mxu0 %v4884_v28 }
 0xb0a   :  { %3680 = vmatpush3.bf16.msra.mxu0 %v4238_v27 }
 0xb0b   :  { %3681 = vmatprep.subr.bf16.mxu0 %v4884_v28 }
 0xb0e   :  { %3683 = vmatpush3.bf16.msra.mxu0 %v4274_v7 }
 0xb0f   :  { %3684 = vmatprep.subr.bf16.mxu0 %v4884_v28 }
 0xb12   :  { %3686 = vmatpush3.bf16.msra.mxu0 %v4278_v8 }
 0xb13   :  { %1776 = vmatprep.subr.bf16.mxu0 %v4331_v18 }
 0xbd8   :  { %v1404_v61 = vpop.f32.mrb[24].mxu0 }
 0xbd9   :  { %v4506_v63 = vadd.f32 %v1404_v61, %v4245_v51  ;;  %v3469_v25 = vpop.f32.mrb[25].mxu0 }
 0xbda   :  { %v1407_v20 = vpop.f32.mrb[26].mxu0 }
 0xbdb   :  { %v1410_v1 = vpack.c.bf16 %v4506_v63, %v4506_v63  ;;  %v3470_v27 = vpop.f32.mrb[27].mxu0  ;;  %v4889_v20 = vld [vmem:[#allocation10_spill] sm:$0xff] }
 0xbdc   :  { %v4891_v27 = vld [vmem:[#allocation12_spill] sm:$0xff] }
 0xbdd   :  { %3111 = vmatmul.mubr.msk.bf16.vlgmr.msra.gmra.mrb[24].mxu1 %vm219_vm1, %v1410_v1 }
 0xbde   :  { %3472 = vmatpush3.bf16.msra.mxu1 %v4250_v56  ;;  %3479 = vmatprep.mubr.msk.bf16.mxu1 %vm4029_vm3, %v4856_v29  ;;  %v4885_v56 = vld [vmem:[#allocation8_spill] sm:$0xff] }
 0xbdf   :  { %3473 = vmatprep.subr.bf16.mxu1 %v4856_v29 }
 0xbe2   :  { %3474 = vmatpush3.bf16.msra.mxu1 %v4256_v59  ;;  %v1340_v59 = vadd.f32 %v4487_v43, %v4885_v56 }
 0xbe3   :  { %3475 = vmatprep.subr.bf16.mxu1 %v4856_v29 }
 0xbe6   :  { %3476 = vmatpush3.bf16.msra.mxu1 %v4262_v60  ;;  %v4886_v60 = vld [vmem:[#allocation9_spill] sm:$0xff] }
 0xbe7   :  { %3477 = vmatprep.subr.bf16.mxu1 %v4856_v29 }
 0xbea   :  { %3478 = vmatpush3.bf16.msra.mxu1 %v4266_v62 }
 0xbeb   :  { %3502 = vmatprep.subr.mxu1 %v4856_v29 }
 0xbed   :  { %3480 = vmatmul.mubr.msk.bf16.vlgmr.msra.gmra.mrb[28].mxu1 %vm219_vm1, %v1410_v1  ;;  %v4890_v1 = vld [vmem:[#allocation11_spill] sm:$0xff] }
 0xbee   :  { %3503 = vmatpush3.msra.mxu1 %v4296_v16  ;;  %3504 = vmatprep.mubr.msk.f32.mxu1 %vm4029_vm3, %v4856_v29 }
 0xbef   :  { %3507 = vmatprep.subr.bf16.mxu1 %v4856_v29 }
 0xcb0   :  { %v1448_v51 = vpop.f32.mrb[24].mxu1 }
 0xcb1   :  { %v1495_v7 = vadd.f32 %v1448_v51, %v4886_v60  ;;  %v1450_v8 = vpop.f32.mrb[25].mxu1  ;;  %v4892_v51 = vld [vmem:[#allocation13_spill] sm:$0xff] }
 0xcb2   :  { %v1496_v62 = vadd.f32 %v1450_v8, %v4885_v56  ;;  %v1452_v18 = vpop.f32.mrb[26].mxu1 }
 0xcb3   :  { %v1498_v0 = vmul.f32 %v1495_v7, %v1340_v59  ;;  %v1500_v40 = vmul.f32 %v1495_v7, %v4885_v56  ;;  %v1453_v37 = vpop.f32.mrb[27].mxu1  ;;  %v4893_v56 = vld [vmem:[#allocation20_spill] sm:$0xff]  ;;  %v4894_v59 = vld [vmem:[#allocation14_spill] sm:$0xff] }
 0xcb4   :  { %v1499_v41 = vmul.f32 %v1496_v62, %v1495_v7  ;;  %v1341_v7 = vadd.f32 %v4491_v49, %v4894_v59  ;;  %v4898_v49 = vld [vmem:[#allocation24_spill] sm:$0xff] }
 0xcb5   :  { %v1505_v44 = vrot.slane %v1500_v40, 4 }
 0xcb6   :  { %v1502_v42 = vrot.slane %v1499_v41, 6 }
 0xcb8   :  { %v1507_v45 = vsel %vm411_vm2, %v1498_v0, %v1502_v42 }
 0xcb9   :  { %v1508_v46 = vsel %vm691_vm4, %v1507_v45, %v1505_v44 }
 0xcba   :  { %3500 = vmatmul.mubr.msk.f32.vlgmr.msra.gmra.mrb[28].mxu0 %vm219_vm1, %v1508_v46 }
 0xcbb   :  { %1777 = vmatpush1.bf16.msra.mxu0 %v4333_v21  ;;  %1808 = vmatprep.mubr.bf16.mxu0 %v4854_v55 }
 0xcbc   :  { %1778 = vmatprep.subr.bf16.mxu0 %v4337_v38 }
 0xcbf   :  { %1779 = vmatpush1.bf16.msra.mxu0 %v4339_v39 }
 0xcc0   :  { %v1489_v43 = vpop.f32.mrb[28].mxu1  ;;  %1780 = vmatprep.subr.bf16.mxu0 %v4343_v53 }
 0xcc1   :  { %v3481_v47 = vpop.f32.mrb[29].mxu1  ;;  %v1497_v60 = vadd.f32 %v1489_v43, %v4894_v59  ;;  %v4896_v43 = vld [vmem:[#allocation22_spill] sm:$0xff] }
 0xcc2   :  { %v1492_v48 = vpop.f32.mrb[30].mxu1  ;;  %v4895_v47 = vld [vmem:[#allocation21_spill] sm:$0xff] }
 0xcc3   :  { %v3482_v50 = vpop.f32.mrb[31].mxu1  ;;  %1781 = vmatpush1.bf16.msra.mxu0 %v4887_v23  ;;  %v1697_v8 = vrot.slane %v1497_v60, 6  ;;  %v4897_v48 = vld [vmem:[#allocation23_spill] sm:$0xff]  ;;  %v4900_v23 = vld [vmem:[#allocation26_spill] sm:$0xff] }
 0xcc4   :  { %1782 = vmatprep.subr.bf16.mxu0 %v4347_v52  ;;  %v4899_v50 = vld [vmem:[#allocation25_spill] sm:$0xff] }
 0xcc5   :  { %v4597_v60 = vld [vmem:[#allocation2 + $0x18] ss:$12 sps:$4 sm:$0xff]  }
 0xcc7   :  { %1783 = vmatpush1.bf16.msra.mxu0 %v4888_v24  ;;  %v4901_v24 = vld [vmem:[#allocation27_spill] sm:$0xff] }
 0xcc8   :  { %1900 = vmatprep.subr.bf16.mxu0 %v4542_v10 }
 0xd8d   :  { %v1578_v21 = vpop.f32.mrb[28].mxu0 }
 0xd8e   :  { %v1583_v38 = vrot.slane %v1578_v21, 2  ;;  %v3501_v14 = vpop.f32.mrb[29].mxu0  ;;  %v1586_v15 = vrot.slane %v1578_v21, 4 }
 0xd8f   :  { %v4904_v14 = vld [vmem:[#allocation30_spill] sm:$0xff] }
 0xd90   :  { %v1585_v39 = vmax.f32 %v1578_v21, %v1583_v38  ;;  %v4903_v38 = vld [vmem:[#allocation29_spill] sm:$0xff] }
 0xd92   :  { %v1588_v19 = vmax.f32 %v1585_v39, %v1586_v15  ;;  %v4905_v39 = vld [vmem:[#allocation31_spill] sm:$0xff]  ;;  %v4906_v15 = vld [vmem:[#allocation32_spill] sm:$0xff] }
 0xd94   :  { %v1589_v53 = vsub.f32 %v1578_v21, %v1588_v19  ;;  %v1593_v30 = vrot.slane %v1588_v19, 6  ;;  %v1598_v32 = vrot.slane %v1588_v19, 4  ;;  %v4907_v19 = vld [vmem:[#allocation33_spill] sm:$0xff] }
 0xd96   :  { %v1595_v11 = vsub.f32 %v1578_v21, %v1593_v30  ;;  %v1600_v33 = vsub.f32 %v1578_v21, %v1598_v32  ;;  %v1590_v57 = vmul.f32 1.442695, %v1589_v53  ;;  %v4902_v21 = vld [vmem:[#allocation28_spill] sm:$0xff]  ;;  %v4908_v53 = vld [vmem:[#allocation34_spill] sm:$0xff]  ;;  %v4909_v30 = vld [vmem:[#allocation35_spill] sm:$0xff] }
 0xd98   :  { %v1596_v26 = vmul.f32 1.442695, %v1595_v11  ;;  %v1601_v52 = vmul.f32 1.442695, %v1600_v33  ;;  %v4910_v11 = vld [vmem:[#allocation15_spill] sm:$0xff] }
 0xd9a   :  { %3846 = vpow2.f32 %v1596_v26 }
 0xd9b   :  { %3848 = vpow2.f32 %v1601_v52 }
 0xd9c   :  { %3850 = vpow2.f32 %v1590_v57 }
 0xda4   :  { %v3847_v34 = vpop.eup %3846 }
 0xda5   :  { %v3849_v2 = vpop.eup %3848  ;;  %v1604_v35 = vrot.slane %v3847_v34, 2 }
 0xda6   :  { %v3851_v3 = vpop.eup %3850  ;;  %v1608_v4 = vrot.slane %v3849_v2, 4 }
 0xda7   :  { %v1606_v36 = vadd.f32 %v3851_v3, %v1604_v35 }
 0xda9   :  { %v1610_v5 = vadd.f32 %v1608_v4, %v1606_v36 }
 0xdab   :  { %3852 = vrcp.f32 %v1610_v5 }
 0xdb5   :  { %v3853_v6 = vpop.eup %3852 }
 0xdb6   :  { %v1614_v9 = vrot.slane %v3853_v6, 6  ;;  %v1617_v54 = vrot.slane %v3853_v6, 4  ;;  %v1612_v17 = vmul.f32 %v3853_v6, %v3851_v3 }
 0xdb8   :  { %v1616_v22 = vmul.f32 %v3847_v34, %v1614_v9  ;;  %v1619_v58 = vmul.f32 %v3849_v2, %v1617_v54 }
 0xdba   :  { %v1620_v61 = vsel %vm411_vm2, %v1612_v17, %v1616_v22 }
 0xdbb   :  { %v1621_v25 = vsel %vm691_vm4, %v1620_v61, %v1619_v58 }
 0xdbc   :  { %3505 = vmatmul.mubr.msk.f32.vlgmr.msra.gmra.mrb[32].mxu1 %vm806_vm5, %v1621_v25  ;;  %v4911_v25 = vld [vmem:[#allocation18_spill] sm:$0xff] }
 0xdbd   :  { %3508 = vmatpush3.bf16.msra.mxu1 %v4889_v20  ;;  %3515 = vmatprep.mubr.msk.bf16.mxu1 %vm4029_vm3, %v4856_v29 }
 0xdbe   :  { %3509 = vmatprep.subr.bf16.mxu1 %v4856_v29 }
 0xdc1   :  { %3510 = vmatpush3.bf16.msra.mxu1 %v4890_v1  ;;  %v4912_v1 = vld [vmem:[#allocation19_spill] sm:$0xff] }
 0xdc2   :  { %3511 = vmatprep.subr.bf16.mxu1 %v4856_v29 }
 0xdc5   :  { %3512 = vmatpush3.bf16.msra.mxu1 %v4891_v27 }
 0xdc6   :  { %3513 = vmatprep.subr.bf16.mxu1 %v4856_v29 }
 0xdc9   :  { %3514 = vmatpush3.bf16.msra.mxu1 %v4892_v51 }
 0xdca   :  { %3241 = vmatprep.subr.bf16.mxu1 %v4893_v56  ;;  %v4590_v56 = vld [vmem:[#allocation2] ss:$12 sps:$4 sm:$0xff]  }
 0xe8f   :  { %v1691_v62 = vpop.f32.mrb[32].mxu1 }
 0xe90   :  { %v1695_v18 = vmul.f32 %v1691_v62, %v1341_v7  ;;  %v1699_v0 = vmul.f32 %v1697_v8, %v1691_v62  ;;  %v1704_v40 = vmul.f32 %v1691_v62, %v4894_v59  ;;  %v3506_v37 = vpop.f32.mrb[33].mxu1  ;;  %v4594_v59 = vld [vmem:[#allocation2 + $0x1c] ss:$12 sps:$4 sm:$0xff]   ;;  %v4600_v7 = vld [vmem:[#allocation2 + $0x34] ss:$12 sps:$4 sm:$0xff]  }
 0xe91   :  { %v4603_v8 = vld [vmem:[#allocation2 + $0x30] ss:$12 sps:$4 sm:$0xff]   ;;  %v4606_v62 = vld [vmem:[#allocation2 + $0x4c] ss:$12 sps:$4 sm:$0xff]  }
 0xe92   :  { %v1701_v41 = vrot.slane %v1699_v0, 2  ;;  %v1706_v44 = vrot.slane %v1704_v40, 4  ;;  %v4913_v40 = vld [vmem:[#allocation37_spill] sm:$0xff] }
 0xe94   :  { %v1703_v42 = vadd.f32 %v1701_v41, %v1695_v18  ;;  %v4609_v18 = vld [vmem:[#allocation2 + $0x48] ss:$12 sps:$4 sm:$0xff]  }
 0xe96   :  { %v1708_v45 = vadd.f32 %v1706_v44, %v1703_v42  ;;  %v4914_v42 = vld [vmem:[#allocation38_spill] sm:$0xff] }
 0xe98   :  { %v1709_v46 = vpack.c.bf16 %v1708_v45, %v1708_v45 }
 0xe9a   :  { %3516 = vmatmul.mubr.msk.bf16.vlgmr.msra.gmra.mrb[36].mxu1 %vm219_vm1, %v1709_v46 }
 0xe9b   :  { %3242 = vmatpush3.bf16.msra.mxu1 %v4895_v47 }
 0xe9c   :  { %3243 = vmatprep.subr.bf16.mxu1 %v4896_v43 }
 0xe9f   :  { %3244 = vmatpush3.bf16.msra.mxu1 %v4897_v48 }
 0xea0   :  { %3245 = vmatprep.subr.bf16.mxu1 %v4898_v49 }
 0xea3   :  { %3246 = vmatpush3.bf16.msra.mxu1 %v4899_v50 }
 0xea4   :  { %3247 = vmatprep.subr.bf16.mxu1 %v4900_v23 }
 0xea7   :  { %3248 = vmatpush3.bf16.msra.mxu1 %v4901_v24 }
 0xea8   :  { %3249 = vmatprep.subr.bf16.mxu1 %v4902_v21 }
 0xeab   :  { %3250 = vmatpush3.bf16.msra.mxu1 %v4903_v38 }
 0xeac   :  { %3251 = vmatprep.subr.bf16.mxu1 %v4904_v14 }
 0xeaf   :  { %3252 = vmatpush3.bf16.msra.mxu1 %v4905_v39 }
 0xeb0   :  { %3253 = vmatprep.subr.bf16.mxu1 %v4906_v15 }
 0xeb3   :  { %3254 = vmatpush3.bf16.msra.mxu1 %v4907_v19 }
 0xeb4   :  { %3255 = vmatprep.subr.bf16.mxu1 %v4908_v53 }
 0xeb7   :  { %3256 = vmatpush3.bf16.msra.mxu1 %v4909_v30 }
 0xeb8   :  { %3531 = vmatprep.subr.bf16.mxu1 %v4856_v29 }
 0xf6d   :  { %v1747_v32 = vpop.f32.mrb[36].mxu1 }
 0xf6e   :  { %v1748_v33 = vadd.f32 %v1747_v32, %v4910_v11  ;;  %v3517_v57 = vpop.f32.mrb[37].mxu1 }
 0xf6f   :  { %v1750_v26 = vpop.f32.mrb[38].mxu1 }
 0xf70   :  { %v1753_v52 = vadd.f32 %v1748_v33, %v4506_v63  ;;  %v3518_v34 = vpop.f32.mrb[39].mxu1 }
 0xf71   :  { %v4621_v34 = vld [vmem:[#allocation2 + $0xd8] ss:$12 sps:$4 sm:$0xff]  }
 0xf72   :  { %v1754_v2 = vsel %vm963_vm6, %v1753_v52, 0.0  ;;  %v1758_v35 = vmul.f32 %v1753_v52, %v1753_v52 }
 0xf73   :  { %1755 = vadd.xlane.f32.xlu0 %v1754_v2  ;;  %v4625_v2 = vld [vmem:[#allocation2 + $0xf0] ss:$12 sps:$4 sm:$0xff]  }
 0xf74   :  { %v1759_v3 = vsel %vm963_vm6, %v1758_v35, 0.0  ;;  %v4629_v35 = vld [vmem:[#allocation2 + $0x108] ss:$12 sps:$4 sm:$0xff]  }
 0xf75   :  { %1760 = vadd.xlane.f32.xlu1 %v1759_v3  ;;  %v4633_v3 = vld [vmem:[#allocation2 + $0x120] ss:$12 sps:$4 sm:$0xff]  }
0x1000   :  { %v1756_v36 = vpop.xlane.xlu0 %1755 }
0x1001   :  { %v1757_v4 = vmul.f32 0.015625, %v1756_v36  ;;  %v4637_v36 = vld [vmem:[#allocation2 + $0x138] ss:$12 sps:$4 sm:$0xff]  }
0x1002   :  { %v1761_v5 = vpop.xlane.xlu1 %1760 }
0x1003   :  { %v1763_v6 = vmul.f32 %v1757_v4, %v1757_v4  ;;  %v1762_v9 = vmul.f32 0.015625, %v1761_v5  ;;  %v1766_v58 = vsub.f32 %v1753_v52, %v1757_v4  ;;  %v4615_v52 = vld [vmem:[#allocation2 + $0xc0] ss:$12 sps:$4 sm:$0xff]   ;;  %v4641_v4 = vld [vmem:[#allocation2 + $0x150] ss:$12 sps:$4 sm:$0xff]  }
0x1004   :  { %v4645_v5 = vld [vmem:[#allocation2 + $0x168] ss:$12 sps:$4 sm:$0xff]  }
0x1005   :  { %v1764_v54 = vsub.f32 %v1762_v9, %v1763_v6 }
0x1007   :  { %v1765_v17 = vmax.f32 %v1764_v54, 0.0 }
0x1009   :  { %v1767_v22 = vadd.f32 1e-05, %v1765_v17 }
0x100b   :  { %3854 = vrsqrt.f32 %v1767_v22 }
0x1015   :  { %v3855_v61 = vpop.eup %3854 }
0x1016   :  { %v1769_v63 = vmul.f32 %v3855_v61, %v1766_v58 }
0x1018   :  { %v1770_v20 = vmul.f32 %v1769_v63, %v4911_v25 }
0x101a   :  { %v4585_v27 = vadd.f32 %v1770_v20, %v4912_v1 }
0x101c   :  { %v1772_v51 = vpack.c.bf16 %v4585_v27, %v4585_v27 }
0x101e   :  { %3116 = vmatmul.mubr.msk.bf16.vlgmr.msra.gmra.mrb[32].mxu0 %vm219_vm1, %v1772_v51 }
0x101f   :  { %1901 = vmatpush1.bf16.msra.mxu0 %v4590_v56  ;;  %1932 = vmatprep.mubr.bf16.mxu0 %v4854_v55 }
0x1020   :  { %1902 = vmatprep.subr.bf16.mxu0 %v4594_v59 }
0x1023   :  { %1903 = vmatpush1.bf16.msra.mxu0 %v4597_v60 }
0x1024   :  { %1904 = vmatprep.subr.bf16.mxu0 %v4600_v7 }
0x1027   :  { %1905 = vmatpush1.bf16.msra.mxu0 %v4603_v8 }
0x1028   :  { %1906 = vmatprep.subr.bf16.mxu0 %v4606_v62 }
0x102b   :  { %1907 = vmatpush1.bf16.msra.mxu0 %v4609_v18 }
0x102c   :  { %3519 = vmatprep.subr.bf16.mxu0 %v4856_v29 }
0x10f1   :  { %v1810_v0 = vpop.f32.mrb[32].mxu0 }
0x10f2   :  { %v1811_v37 = vadd.f32 %v1810_v0, %v4913_v40  ;;  %v1812_v41 = vpop.f32.mrb[33].mxu0 }
0x10f3   :  { %v1813_v44 = vadd.f32 %v1812_v41, %v4914_v42  ;;  %v1814_v45 = vpop.f32.mrb[34].mxu0 }
0x10f4   :  { %v1819_v46 = vmul.f32 0.044715, %v1811_v37  ;;  %v1815_v47 = vpop.f32.mrb[35].mxu0  ;;  %v1817_v19 = vmul.f32 0.5, %v1811_v37 }
0x10f5   :  { %v1820_v43 = vmul.f32 0.044715, %v1813_v44  ;;  %v1818_v30 = vmul.f32 0.5, %v1813_v44 }
0x10f6   :  { %v1821_v48 = vmul.f32 %v1819_v46, %v1811_v37 }
0x10f7   :  { %v1822_v49 = vmul.f32 %v1820_v43, %v1813_v44 }
0x10f8   :  { %v1823_v50 = vmul.f32 %v1821_v48, %v1811_v37 }
0x10f9   :  { %v1824_v23 = vmul.f32 %v1822_v49, %v1813_v44 }
0x10fa   :  { %v1825_v24 = vadd.f32 %v1823_v50, %v1811_v37  ;;  %v3912_v50 = vld [vmem:[#allocation2 + $0x8] ss:$12 sps:$4 sm:$0xff]  }
0x10fb   :  { %v1826_v21 = vadd.f32 %v1824_v23, %v1813_v44  ;;  %v3913_v23 = vld [vmem:[#allocation2 + $0x20] ss:$12 sps:$4 sm:$0xff]  }
0x10fc   :  { %v1827_v38 = vmul.f32 0.7978846, %v1825_v24  ;;  %v3914_v24 = vld [vmem:[#allocation2 + $0x38] ss:$12 sps:$4 sm:$0xff]  }
0x10fd   :  { %v1828_v14 = vmul.f32 0.7978846, %v1826_v21  ;;  %v3917_v21 = vld [vmem:[#allocation2 + $0x60] ss:$12 sps:$4 sm:$0xff]  }
0x10fe   :  { %3856 = vtanh.f32 %v1827_v38  ;;  %v3918_v38 = vld [vmem:[#allocation2 + $0x7c] ss:$12 sps:$4 sm:$0xff]  }
0x10ff   :  { %3858 = vtanh.f32 %v1828_v14  ;;  %v3919_v14 = vld [vmem:[#allocation2 + $0x78] ss:$12 sps:$4 sm:$0xff]  }
0x1108   :  { %v3857_v39 = vpop.eup %3856 }
0x1109   :  { %v3859_v15 = vpop.eup %3858  ;;  %v1831_v53 = vadd.f32 1.0, %v3857_v39  ;;  %v3920_v39 = vld [vmem:[#allocation2 + $0x94] ss:$12 sps:$4 sm:$0xff]  }
0x110a   :  { %v1832_v32 = vadd.f32 1.0, %v3859_v15  ;;  %v3921_v15 = vld [vmem:[#allocation2 + $0x90] ss:$12 sps:$4 sm:$0xff]  }
0x110b   :  { %v1833_v11 = vmul.f32 %v1831_v53, %v1817_v19  ;;  %v3922_v19 = vld [vmem:[#allocation2 + $0xac] ss:$12 sps:$4 sm:$0xff]   ;;  %v3923_v53 = vld [vmem:[#allocation2 + $0xa8] ss:$12 sps:$4 sm:$0xff]  }
0x110c   :  { %v1834_v33 = vmul.f32 %v1832_v32, %v1818_v30  ;;  %v4664_v32 = vld [vmem:[#allocation4] ss:$0 sm:$0xff] }
0x110d   :  { %v1835_v26 = vpack.c.bf16 %v1833_v11, %v1833_v11 }
0x110e   :  { %v1836_v57 = vpack.c.bf16 %v1834_v33, %v1834_v33 }
0x1110   :  { %1869 = vmatprep.mubr.bf16.mxu1 %v1836_v57 }
0x1111   :  { %1870 = vmatmul.mubr.bf16.vlgmr.msra.gmra.mrb[40].mxu1 %v1835_v26 }
0x1112   :  { %3532 = vmatpush3.bf16.msra.mxu1 %v4615_v52  ;;  %3547 = vmatprep.mubr.msk.bf16.mxu1 %vm4029_vm3, %v4856_v29 }
0x1113   :  { %3533 = vmatprep.subr.bf16.mxu1 %v4856_v29 }
0x1116   :  { %3534 = vmatpush3.bf16.msra.mxu1 %v4621_v34 }
0x1117   :  { %3535 = vmatprep.subr.bf16.mxu1 %v4856_v29 }
0x111a   :  { %3536 = vmatpush3.bf16.msra.mxu1 %v4625_v2 }
0x111b   :  { %3537 = vmatprep.subr.bf16.mxu1 %v4856_v29 }
0x111e   :  { %3538 = vmatpush3.bf16.msra.mxu1 %v4629_v35 }
0x111f   :  { %3539 = vmatprep.subr.bf16.mxu1 %v4856_v29 }
0x1122   :  { %3540 = vmatpush3.bf16.msra.mxu1 %v4633_v3 }
0x1123   :  { %3541 = vmatprep.subr.bf16.mxu1 %v4856_v29 }
0x1126   :  { %3542 = vmatpush3.bf16.msra.mxu1 %v4637_v36 }
0x1127   :  { %3543 = vmatprep.subr.bf16.mxu1 %v4856_v29 }
0x112a   :  { %3544 = vmatpush3.bf16.msra.mxu1 %v4641_v4 }
0x112b   :  { %3545 = vmatprep.subr.bf16.mxu1 %v4856_v29 }
0x112e   :  { %3546 = vmatpush3.bf16.msra.mxu1 %v4645_v5 }
0x112f   :  { %3687 = vmatprep.subr.bf16.mxu1 %v4884_v28 }
0x11e4   :  { %v3257_v6 = vpop.f32.mrb[40].mxu1 }
0x11e5   :  { %v3258_v9 = vpop.f32.mrb[41].mxu1 }
0x11e6   :  { %v3259_v54 = vadd.f32 %v3258_v9, %v3257_v6  ;;  %v3260_v17 = vpop.f32.mrb[42].mxu1 }
0x11e7   :  { %v3261_v22 = vpop.f32.mrb[43].mxu1 }
0x11e8   :  { %v1872_v58 = vadd.f32 %v3259_v54, %v4453_v31 }
0x11ea   :  { %v1877_v61 = vadd.f32 %v1872_v58, %v4585_v27 }
0x11ec   :  { %v1878_v63 = vsel %vm963_vm6, %v1877_v61, 0.0  ;;  %v1882_v25 = vmul.f32 %v1877_v61, %v1877_v61 }
0x11ed   :  { %1879 = vadd.xlane.f32.xlu0 %v1878_v63 }
0x11ee   :  { %v1883_v20 = vsel %vm963_vm6, %v1882_v25, 0.0 }
0x11ef   :  { %1884 = vadd.xlane.f32.xlu1 %v1883_v20 }
0x127a   :  { %v1880_v1 = vpop.xlane.xlu0 %1879 }
0x127b   :  { %v1881_v51 = vmul.f32 0.015625, %v1880_v1 }
0x127c   :  { %v1885_v0 = vpop.xlane.xlu1 %1884 }
0x127d   :  { %v1887_v37 = vmul.f32 %v1881_v51, %v1881_v51  ;;  %v1886_v41 = vmul.f32 0.015625, %v1885_v0  ;;  %v1890_v47 = vsub.f32 %v1877_v61, %v1881_v51 }
0x127f   :  { %v1888_v44 = vsub.f32 %v1886_v41, %v1887_v37 }
0x1281   :  { %v1889_v45 = vmax.f32 %v1888_v44, 0.0 }
0x1283   :  { %v1891_v46 = vadd.f32 1e-05, %v1889_v45 }
0x1285   :  { %3860 = vrsqrt.f32 %v1891_v46 }
0x128f   :  { %v3861_v31 = vpop.eup %3860 }
0x1290   :  { %v1893_v43 = vmul.f32 %v3861_v31, %v1890_v47  ;;  %v4673_v47 = vld [vmem:[#allocation4 + $0x1] ss:$0 sm:$0xff] }
0x1292   :  { %v1894_v27 = vmul.f32 %v1893_v43, %v4459_v12  ;;  %v3915_v12 = vld [vmem:[#allocation2 + $0x50] ss:$12 sps:$4 sm:$0xff]   ;;  %v4676_v43 = vld [vmem:[#allocation4 + $0x2] ss:$0 sm:$0xff] }
0x1294   :  { %v1895_v48 = vadd.f32 %v1894_v27, %v4461_v13  ;;  %v3916_v13 = vld [vmem:[#allocation2 + $0x64] ss:$12 sps:$4 sm:$0xff]  }
0x1296   :  { %v1896_v49 = vpack.c.bf16 %v1895_v48, %v1895_v48 }
0x1298   :  { %3117 = vmatmul.mubr.msk.bf16.vlgmr.msra.gmra.mrb[36].mxu0 %vm219_vm1, %v1896_v49 }
0x1299   :  { %3520 = vmatpush3.bf16.msra.mxu0 %v3912_v50  ;;  %3527 = vmatprep.mubr.msk.bf16.mxu0 %vm4029_vm3, %v4856_v29 }
0x129a   :  { %3521 = vmatprep.subr.bf16.mxu0 %v4856_v29 }
0x129d   :  { %3522 = vmatpush3.bf16.msra.mxu0 %v3913_v23 }
0x129e   :  { %3523 = vmatprep.subr.bf16.mxu0 %v4856_v29 }
0x12a1   :  { %3524 = vmatpush3.bf16.msra.mxu0 %v3914_v24 }
0x12a2   :  { %3525 = vmatprep.subr.bf16.mxu0 %v4856_v29 }
0x12a5   :  { %3526 = vmatpush3.bf16.msra.mxu0 %v3915_v12 }
0x12a6   :  { %2056 = vmatprep.subr.bf16.mxu0 %v3916_v13 }
0x12a8   :  { %3528 = vmatmul.mubr.msk.bf16.vlgmr.msra.gmra.mrb[40].mxu0 %vm219_vm1, %v1896_v49 }
0x12a9   :  { %2057 = vmatpush1.bf16.msra.mxu0 %v3917_v21  ;;  %2088 = vmatprep.mubr.bf16.mxu0 %v4854_v55 }
0x12aa   :  { %2058 = vmatprep.subr.bf16.mxu0 %v3918_v38 }
0x12ad   :  { %2059 = vmatpush1.bf16.msra.mxu0 %v3919_v14 }
0x12ae   :  { %2060 = vmatprep.subr.bf16.mxu0 %v3920_v39  ;;  %v3927_v39 = vld [vmem:[#allocation2 + $0x570] ss:$12 sps:$4 sm:$0xff]  }
0x12b1   :  { %2061 = vmatpush1.bf16.msra.mxu0 %v3921_v15  ;;  %v3928_v15 = vld [vmem:[#allocation2 + $0x588] ss:$12 sps:$4 sm:$0xff]  }
0x12b2   :  { %2062 = vmatprep.subr.bf16.mxu0 %v3922_v19  ;;  %v3929_v19 = vld [vmem:[#allocation2 + $0x5a0] ss:$12 sps:$4 sm:$0xff]  }
0x12b5   :  { %2063 = vmatpush1.bf16.msra.mxu0 %v3923_v53  ;;  %v3930_v53 = vld [vmem:[#allocation2 + $0x5b8] ss:$12 sps:$4 sm:$0xff]  }
0x12b6   :  { %3551 = vmatprep.subr.bf16.mxu0 %v4856_v29 }
0x136b   :  { %v1934_v30 = vpop.f32.mrb[36].mxu0 }
0x136c   :  { %v1981_v11 = vadd.f32 %v4664_v32, %v1934_v30  ;;  %v4667_v33 = vpop.f32.mrb[37].mxu0  ;;  %v3931_v30 = vld [vmem:[#allocation2 + $0x1e4] ss:$12 sps:$4 sm:$0xff]  }
0x136d   :  { %v1938_v57 = vpop.f32.mrb[38].mxu0 }
0x136e   :  { %v1939_v26 = vpop.f32.mrb[39].mxu0  ;;  %v1984_v6 = vsel %vm411_vm2, %v1981_v11, 0.0  ;;  %v1988_v9 = vmul.f32 %v1981_v11, %v1981_v11  ;;  %v4684_v57 = vld [vmem:[#allocation4 + $0x3] ss:$0 sm:$0xff] }
0x136f   :  { %1985 = vadd.xlane.f32.xlu0 %v1984_v6 }
0x1370   :  { %v1989_v54 = vsel %vm411_vm2, %v1988_v9, 0.0 }
0x1371   :  { %1990 = vadd.xlane.f32.xlu1 %v1989_v54 }
0x137b   :  { %v4671_v17 = vpop.f32.mrb[40].mxu0 }
0x137c   :  { %v3529_v22 = vpop.f32.mrb[41].mxu0 }
0x137d   :  { %v1978_v58 = vpop.f32.mrb[42].mxu0 }
0x137e   :  { %v3530_v61 = vpop.f32.mrb[43].mxu0  ;;  %v3933_v58 = vld [vmem:[#allocation2 + $0x68] ss:$12 sps:$4 sm:$0xff]  }
0x137f   :  { %v3935_v61 = vld [vmem:[#allocation2 + $0x98] ss:$12 sps:$4 sm:$0xff]  }
0x13fc   :  { %v1986_v63 = vpop.xlane.xlu0 %1985 }
0x13fd   :  { %v1987_v25 = vmul.f32 0.0078125, %v1986_v63  ;;  %v3936_v63 = vld [vmem:[#allocation2 + $0xb0] ss:$12 sps:$4 sm:$0xff]  }
0x13fe   :  { %v1991_v20 = vpop.xlane.xlu1 %1990 }
0x13ff   :  { %v1993_v1 = vmul.f32 %v1987_v25, %v1987_v25  ;;  %v1992_v51 = vmul.f32 0.0078125, %v1991_v20  ;;  %v1996_v44 = vsub.f32 %v1981_v11, %v1987_v25  ;;  %v3937_v20 = vld [vmem:[#allocation4 + $0x5] ss:$0 sm:$0xff] }
0x1401   :  { %v1994_v0 = vsub.f32 %v1992_v51, %v1993_v1  ;;  %v1982_v1 = vadd.f32 %v3937_v20, %v4667_v33  ;;  %v3938_v51 = vld [vmem:[#allocation4 + $0x4] ss:$0 sm:$0xff]  ;;  %v3940_v33 = vld [vmem:[#allocation2 + $0x1fc] ss:$12 sps:$4 sm:$0xff]  }
0x1403   :  { %v1995_v37 = vmax.f32 %v1994_v0, 0.0 }
0x1405   :  { %v1997_v41 = vadd.f32 1e-05, %v1995_v37 }
0x1407   :  { %3862 = vrsqrt.f32 %v1997_v41 }
0x1411   :  { %v3863_v45 = vpop.eup %3862 }
0x1412   :  { %v1999_v46 = vmul.f32 %v3863_v45, %v1996_v44 }
0x1414   :  { %v2000_v31 = vmul.f32 %v4673_v47, %v1999_v46 }
0x1416   :  { %v2001_v27 = vadd.f32 %v4676_v43, %v2000_v31 }
0x1418   :  { %v2003_v48 = vmul.f32 0.044715, %v2001_v27  ;;  %v2002_v13 = vmul.f32 0.5, %v2001_v27 }
0x141a   :  { %v2004_v49 = vmul.f32 %v2003_v48, %v2001_v27 }
0x141c   :  { %v2005_v50 = vmul.f32 %v2004_v49, %v2001_v27 }
0x141e   :  { %v2006_v23 = vadd.f32 %v2005_v50, %v2001_v27 }
0x1420   :  { %v2007_v24 = vmul.f32 0.7978846, %v2006_v23  ;;  %v3939_v23 = vld [vmem:[#allocation2 + $0x1e0] ss:$12 sps:$4 sm:$0xff]  }
0x1422   :  { %3864 = vtanh.f32 %v2007_v24  ;;  %v3941_v24 = vld [vmem:[#allocation2 + $0x1f8] ss:$12 sps:$4 sm:$0xff]  }
0x142c   :  { %v3865_v12 = vpop.eup %3864 }
0x142d   :  { %v2009_v21 = vadd.f32 1.0, %v3865_v12 }
0x142f   :  { %v2010_v38 = vmul.f32 %v2009_v21, %v2002_v13  ;;  %v3942_v13 = vld [vmem:[#allocation2 + $0x214] ss:$12 sps:$4 sm:$0xff]  }
0x1431   :  { %v2011_v14 = vpack.c.bf16 %v2010_v38, %v2010_v38 }
0x1433   :  { %3548 = vmatmul.mubr.bf16.vlgmr.msra.gmra.mrb[44].mxu1 %v2011_v14 }
0x1434   :  { %3689 = vmatpush3.bf16.msra.mxu1 %v3927_v39  ;;  %3579 = vmatprep.mubr.msk.f32.mxu1 %vm4029_vm3, %v4856_v29  ;;  %v3943_v39 = vld [vmem:[#allocation2 + $0x210] ss:$12 sps:$4 sm:$0xff]  }
0x1435   :  { %3690 = vmatprep.subr.bf16.mxu1 %v4884_v28 }
0x1438   :  { %3692 = vmatpush3.bf16.msra.mxu1 %v3928_v15  ;;  %v3944_v15 = vld [vmem:[#allocation2 + $0x22c] ss:$12 sps:$4 sm:$0xff]  }
0x1439   :  { %3693 = vmatprep.subr.bf16.mxu1 %v4884_v28 }
0x143c   :  { %3695 = vmatpush3.bf16.msra.mxu1 %v3929_v19  ;;  %v3945_v19 = vld [vmem:[#allocation2 + $0x228] ss:$12 sps:$4 sm:$0xff]  }
0x143d   :  { %3696 = vmatprep.subr.bf16.mxu1 %v4884_v28  ;;  %v3934_v28 = vld [vmem:[#allocation2 + $0x80] ss:$12 sps:$4 sm:$0xff]  }
0x1440   :  { %3698 = vmatpush3.bf16.msra.mxu1 %v3930_v53 }
0x1441   :  { %2418 = vmatprep.subr.bf16.mxu1 %v3931_v30 }
0x1506   :  { %v2046_v11 = vpop.f32.mrb[44].mxu1 }
0x1507   :  { %v4687_v26 = vadd.f32 %v4684_v57, %v2046_v11  ;;  %v3549_v6 = vpop.f32.mrb[45].mxu1 }
0x1508   :  { %v2049_v9 = vpop.f32.mrb[46].mxu1 }
0x1509   :  { %v2052_v54 = vpack.c.bf16 %v4687_v26, %v4687_v26  ;;  %v3550_v22 = vpop.f32.mrb[47].mxu1 }
0x150b   :  { %3119 = vmatmul.mubr.msk.bf16.vlgmr.msra.gmra.mrb[44].mxu0 %vm219_vm1, %v2052_v54 }
0x150c   :  { %3552 = vmatpush3.bf16.msra.mxu0 %v3933_v58  ;;  %3559 = vmatprep.mubr.msk.bf16.mxu0 %vm4029_vm3, %v4856_v29 }
0x150d   :  { %3553 = vmatprep.subr.bf16.mxu0 %v4856_v29 }
0x1510   :  { %3554 = vmatpush3.bf16.msra.mxu0 %v3934_v28 }
0x1511   :  { %3555 = vmatprep.subr.bf16.mxu0 %v4856_v29 }
0x1514   :  { %3556 = vmatpush3.bf16.msra.mxu0 %v3935_v61 }
0x1515   :  { %3557 = vmatprep.subr.bf16.mxu0 %v4856_v29 }
0x1518   :  { %3558 = vmatpush3.bf16.msra.mxu0 %v3936_v63 }
0x1519   :  { %3582 = vmatprep.subr.mxu0 %v4856_v29 }
0x151b   :  { %3560 = vmatmul.mubr.msk.bf16.vlgmr.msra.gmra.mrb[48].mxu0 %vm219_vm1, %v2052_v54 }
0x151c   :  { %3583 = vmatpush3.msra.mxu0 %v4296_v16  ;;  %3584 = vmatprep.mubr.msk.f32.mxu0 %vm4029_vm3, %v4856_v29 }
0x151d   :  { %3587 = vmatprep.subr.bf16.mxu0 %v4856_v29 }
0x15de   :  { %v2090_v25 = vpop.f32.mrb[44].mxu0 }
0x15df   :  { %v2137_v0 = vadd.f32 %v3938_v51, %v2090_v25  ;;  %v2092_v37 = vpop.f32.mrb[45].mxu0 }
0x15e0   :  { %v2138_v41 = vadd.f32 %v3937_v20, %v2092_v37  ;;  %v2094_v44 = vpop.f32.mrb[46].mxu0 }
0x15e1   :  { %v2140_v45 = vmul.f32 %v2137_v0, %v1982_v1  ;;  %v2142_v46 = vmul.f32 %v3937_v20, %v2137_v0  ;;  %v2095_v31 = vpop.f32.mrb[47].mxu0 }
0x15e2   :  { %v2141_v27 = vmul.f32 %v2138_v41, %v2137_v0 }
0x15e3   :  { %v2147_v16 = vrot.slane %v2142_v46, 4 }
0x15e4   :  { %v2144_v48 = vrot.slane %v2141_v27, 6 }
0x15e6   :  { %v2149_v49 = vsel %vm411_vm2, %v2140_v45, %v2144_v48 }
0x15e7   :  { %v2150_v50 = vsel %vm691_vm4, %v2149_v49, %v2147_v16 }
0x15e8   :  { %3580 = vmatmul.mubr.msk.f32.vlgmr.msra.gmra.mrb[34].mxu1 %vm219_vm1, %v2150_v50 }
0x15e9   :  { %2419 = vmatpush1.bf16.msra.mxu1 %v3939_v23  ;;  %2450 = vmatprep.mubr.bf16.mxu1 %v4854_v55 }
0x15ea   :  { %2420 = vmatprep.subr.bf16.mxu1 %v3940_v33  ;;  %v3946_v33 = vld [vmem:[#allocation2 + $0x180] ss:$12 sps:$4 sm:$0xff]  }
0x15ed   :  { %2421 = vmatpush1.bf16.msra.mxu1 %v3941_v24  ;;  %v3947_v24 = vld [vmem:[#allocation2 + $0x198] ss:$12 sps:$4 sm:$0xff]  }
0x15ee   :  { %v2131_v12 = vpop.f32.mrb[48].mxu0  ;;  %2422 = vmatprep.subr.bf16.mxu1 %v3942_v13  ;;  %v3948_v13 = vld [vmem:[#allocation2 + $0x1b0] ss:$12 sps:$4 sm:$0xff]  }
0x15ef   :  { %v3561_v21 = vpop.f32.mrb[49].mxu0 }
0x15f0   :  { %v2134_v38 = vpop.f32.mrb[50].mxu0  ;;  %v3949_v21 = vld [vmem:[#allocation2 + $0x1c8] ss:$12 sps:$4 sm:$0xff]  }
0x15f1   :  { %v3562_v14 = vpop.f32.mrb[51].mxu0  ;;  %2423 = vmatpush1.bf16.msra.mxu1 %v3943_v39  ;;  %v3950_v38 = vld [vmem:[#allocation2 + $0x300] ss:$12 sps:$4 sm:$0xff]  }
0x15f2   :  { %2424 = vmatprep.subr.bf16.mxu1 %v3944_v15  ;;  %v3951_v14 = vld [vmem:[#allocation4 + $0x6] ss:$0 sm:$0xff] }
0x15f3   :  { %v2139_v39 = vadd.f32 %v3951_v14, %v2131_v12  ;;  %v1983_v15 = vadd.f32 %v3951_v14, %v4671_v17  ;;  %v3954_v12 = vld [vmem:[#allocation2 + $0x258] ss:$12 sps:$4 sm:$0xff]   ;;  %v3955_v17 = vld [vmem:[#allocation2 + $0x330] ss:$12 sps:$4 sm:$0xff]  }
0x15f5   :  { %2425 = vmatpush1.bf16.msra.mxu1 %v3945_v19  ;;  %v2339_v19 = vrot.slane %v2139_v39, 6 }
0x15f6   :  { %2542 = vmatprep.subr.bf16.mxu1 %v4542_v10 }
0x16bb   :  { %v2220_v53 = vpop.f32.mrb[34].mxu1 }
0x16bc   :  { %v2225_v30 = vrot.slane %v2220_v53, 2  ;;  %v3581_v11 = vpop.f32.mrb[35].mxu1  ;;  %v2228_v9 = vrot.slane %v2220_v53, 4 }
0x16be   :  { %v2227_v6 = vmax.f32 %v2220_v53, %v2225_v30 }
0x16c0   :  { %v2230_v54 = vmax.f32 %v2227_v6, %v2228_v9 }
0x16c2   :  { %v2231_v22 = vsub.f32 %v2220_v53, %v2230_v54  ;;  %v2235_v58 = vrot.slane %v2230_v54, 6  ;;  %v2240_v28 = vrot.slane %v2230_v54, 4 }
0x16c4   :  { %v2237_v61 = vsub.f32 %v2220_v53, %v2235_v58  ;;  %v2242_v63 = vsub.f32 %v2220_v53, %v2240_v28  ;;  %v2232_v25 = vmul.f32 1.442695, %v2231_v22 }
0x16c6   :  { %v2238_v20 = vmul.f32 1.442695, %v2237_v61  ;;  %v2243_v1 = vmul.f32 1.442695, %v2242_v63  ;;  %v3952_v63 = vld [vmem:[#allocation2 + $0x240] ss:$12 sps:$4 sm:$0xff]  }
0x16c8   :  { %3866 = vpow2.f32 %v2238_v20  ;;  %v3956_v20 = vld [vmem:[#allocation2 + $0x270] ss:$12 sps:$4 sm:$0xff]  }
0x16c9   :  { %3868 = vpow2.f32 %v2243_v1  ;;  %v3957_v1 = vld [vmem:[#allocation2 + $0x348] ss:$12 sps:$4 sm:$0xff]  }
0x16ca   :  { %3870 = vpow2.f32 %v2232_v25  ;;  %v3953_v25 = vld [vmem:[#allocation2 + $0x318] ss:$12 sps:$4 sm:$0xff]  }
0x16d2   :  { %v3867_v51 = vpop.eup %3866 }
0x16d3   :  { %v3869_v0 = vpop.eup %3868  ;;  %v2246_v10 = vrot.slane %v3867_v51, 2 }
0x16d4   :  { %v3871_v37 = vpop.eup %3870  ;;  %v2250_v44 = vrot.slane %v3869_v0, 4 }
0x16d5   :  { %v2248_v41 = vadd.f32 %v3871_v37, %v2246_v10  ;;  %v3960_v10 = vld [vmem:[#allocation2 + $0x2a0] ss:$12 sps:$4 sm:$0xff]  }
0x16d7   :  { %v2252_v45 = vadd.f32 %v2250_v44, %v2248_v41  ;;  %v3962_v41 = vld [vmem:[#allocation2 + $0x2b8] ss:$12 sps:$4 sm:$0xff]   ;;  %v3963_v44 = vld [vmem:[#allocation2 + $0x390] ss:$12 sps:$4 sm:$0xff]  }
0x16d9   :  { %3872 = vrcp.f32 %v2252_v45  ;;  %v3964_v45 = vld [vmem:[#allocation2 + $0x2d0] ss:$12 sps:$4 sm:$0xff]  }
0x16e3   :  { %v3873_v46 = vpop.eup %3872 }
0x16e4   :  { %v2256_v31 = vrot.slane %v3873_v46, 6  ;;  %v2259_v27 = vrot.slane %v3873_v46, 4  ;;  %v2254_v48 = vmul.f32 %v3873_v46, %v3871_v37  ;;  %v3961_v37 = vld [vmem:[#allocation2 + $0x378] ss:$12 sps:$4 sm:$0xff]   ;;  %v3965_v46 = vld [vmem:[#allocation2 + $0x3a8] ss:$12 sps:$4 sm:$0xff]  }
0x16e6   :  { %v2258_v16 = vmul.f32 %v3867_v51, %v2256_v31  ;;  %v2261_v49 = vmul.f32 %v3869_v0, %v2259_v27  ;;  %v3958_v51 = vld [vmem:[#allocation2 + $0x288] ss:$12 sps:$4 sm:$0xff]   ;;  %v3959_v0 = vld [vmem:[#allocation2 + $0x360] ss:$12 sps:$4 sm:$0xff]  }
0x16e7   :  { %v3966_v31 = vld [vmem:[#allocation2 + $0x2e8] ss:$12 sps:$4 sm:$0xff]  }
0x16e8   :  { %v2262_v50 = vsel %vm411_vm2, %v2254_v48, %v2258_v16  ;;  %v3967_v48 = vld [vmem:[#allocation4 + $0x7] ss:$0 sm:$0xff] }
0x16e9   :  { %v2263_v23 = vsel %vm691_vm4, %v2262_v50, %v2261_v49 }
0x16ea   :  { %3585 = vmatmul.mubr.msk.f32.vlgmr.msra.gmra.mrb[30].mxu0 %vm806_vm5, %v2263_v23 }
0x16eb   :  { %3588 = vmatpush3.bf16.msra.mxu0 %v3946_v33  ;;  %3595 = vmatprep.mubr.msk.bf16.mxu0 %vm4029_vm3, %v4856_v29 }
0x16ec   :  { %3589 = vmatprep.subr.bf16.mxu0 %v4856_v29 }
0x16ef   :  { %3590 = vmatpush3.bf16.msra.mxu0 %v3947_v24 }
0x16f0   :  { %3591 = vmatprep.subr.bf16.mxu0 %v4856_v29 }
0x16f3   :  { %3592 = vmatpush3.bf16.msra.mxu0 %v3948_v13 }
0x16f4   :  { %3593 = vmatprep.subr.bf16.mxu0 %v4856_v29 }
0x16f7   :  { %3594 = vmatpush3.bf16.msra.mxu0 %v3949_v21 }
0x16f8   :  { %3298 = vmatprep.subr.bf16.mxu0 %v3950_v38 }
0x17bd   :  { %v2333_v53 = vpop.f32.mrb[30].mxu0 }
0x17be   :  { %v2337_v30 = vmul.f32 %v2333_v53, %v1983_v15  ;;  %v2341_v11 = vmul.f32 %v2339_v19, %v2333_v53  ;;  %v2346_v6 = vmul.f32 %v3951_v14, %v2333_v53  ;;  %v3586_v9 = vpop.f32.mrb[31].mxu0 }
0x17c0   :  { %v2343_v54 = vrot.slane %v2341_v11, 2  ;;  %v2348_v58 = vrot.slane %v2346_v6, 4 }
0x17c2   :  { %v2345_v22 = vadd.f32 %v2343_v54, %v2337_v30  ;;  %v3968_v54 = vld [vmem:[#allocation4 + $0x18] ss:$0 sm:$0xff] }
0x17c4   :  { %v2350_v28 = vadd.f32 %v2348_v58, %v2345_v22  ;;  %v3969_v58 = vld [vmem:[#allocation4 + $0x19] ss:$0 sm:$0xff] }
0x17c6   :  { %v2351_v61 = vpack.c.bf16 %v2350_v28, %v2350_v28 }
0x17c8   :  { %3596 = vmatmul.mubr.msk.bf16.vlgmr.msra.gmra.mrb[52].mxu0 %vm219_vm1, %v2351_v61 }
0x17c9   :  { %3299 = vmatpush3.bf16.msra.mxu0 %v3952_v63 }
0x17ca   :  { %3300 = vmatprep.subr.bf16.mxu0 %v3953_v25 }
0x17cd   :  { %3301 = vmatpush3.bf16.msra.mxu0 %v3954_v12 }
0x17ce   :  { %3302 = vmatprep.subr.bf16.mxu0 %v3955_v17 }
0x17d1   :  { %3303 = vmatpush3.bf16.msra.mxu0 %v3956_v20 }
0x17d2   :  { %3304 = vmatprep.subr.bf16.mxu0 %v3957_v1 }
0x17d5   :  { %3305 = vmatpush3.bf16.msra.mxu0 %v3958_v51 }
0x17d6   :  { %3306 = vmatprep.subr.bf16.mxu0 %v3959_v0 }
0x17d9   :  { %3307 = vmatpush3.bf16.msra.mxu0 %v3960_v10 }
0x17da   :  { %3308 = vmatprep.subr.bf16.mxu0 %v3961_v37 }
0x17dd   :  { %3309 = vmatpush3.bf16.msra.mxu0 %v3962_v41 }
0x17de   :  { %3310 = vmatprep.subr.bf16.mxu0 %v3963_v44 }
0x17e1   :  { %3311 = vmatpush3.bf16.msra.mxu0 %v3964_v45 }
0x17e2   :  { %3312 = vmatprep.subr.bf16.mxu0 %v3965_v46 }
0x17e5   :  { %3313 = vmatpush3.bf16.msra.mxu0 %v3966_v31 }
0x17e6   :  { %3619 = vmatprep.subr.bf16.mxu0 %v4856_v29 }
0x189b   :  { %v2389_v27 = vpop.f32.mrb[52].mxu0 }
0x189c   :  { %v2390_v16 = vadd.f32 %v3967_v48, %v2389_v27  ;;  %v3597_v49 = vpop.f32.mrb[53].mxu0 }
0x189d   :  { %v2392_v50 = vpop.f32.mrb[54].mxu0 }
0x189e   :  { %v2395_v23 = vadd.f32 %v2390_v16, %v4687_v26  ;;  %v3598_v33 = vpop.f32.mrb[55].mxu0 }
0x189f   :  { %v3970_v33 = vld [vmem:[#allocation4 + $0x1b] ss:$0 sm:$0xff] }
0x18a0   :  { %v2396_v24 = vsel %vm963_vm6, %v2395_v23, 0.0  ;;  %v2400_v13 = vmul.f32 %v2395_v23, %v2395_v23 }
0x18a1   :  { %2397 = vadd.xlane.f32.xlu0 %v2396_v24 }
0x18a2   :  { %v2401_v21 = vsel %vm963_vm6, %v2400_v13, 0.0 }
0x18a3   :  { %2402 = vadd.xlane.f32.xlu1 %v2401_v21 }
0x192e   :  { %v2398_v38 = vpop.xlane.xlu0 %2397 }
0x192f   :  { %v2399_v14 = vmul.f32 0.015625, %v2398_v38 }
0x1930   :  { %v2403_v39 = vpop.xlane.xlu1 %2402 }
0x1931   :  { %v2405_v15 = vmul.f32 %v2399_v14, %v2399_v14  ;;  %v2404_v19 = vmul.f32 0.015625, %v2403_v39  ;;  %v2408_v6 = vsub.f32 %v2395_v23, %v2399_v14 }
0x1933   :  { %v2406_v53 = vsub.f32 %v2404_v19, %v2405_v15 }
0x1935   :  { %v2407_v30 = vmax.f32 %v2406_v53, 0.0 }
0x1937   :  { %v2409_v11 = vadd.f32 1e-05, %v2407_v30 }
0x1939   :  { %3874 = vrsqrt.f32 %v2409_v11 }
0x1943   :  { %v3875_v9 = vpop.eup %3874 }
0x1944   :  { %v2411_v26 = vmul.f32 %v3875_v9, %v2408_v6 }
0x1946   :  { %v2412_v22 = vmul.f32 %v3968_v54, %v2411_v26 }
0x1948   :  { %v2413_v28 = vadd.f32 %v3969_v58, %v2412_v22  ;;  %v3971_v58 = vld [vmem:[#allocation4 + $0x1c] ss:$0 sm:$0xff] }
0x194a   :  { %v2414_v61 = vpack.c.bf16 %v2413_v28, %v2413_v28 }
0x194c   :  { %3124 = vmatmul.mubr.msk.bf16.vlgmr.msra.gmra.mrb[48].mxu1 %vm219_vm1, %v2414_v61  ;;  %v3972_v61 = vld [vmem:[#allocation4 + $0x1d] ss:$0 sm:$0xff] }
0x194d   :  { %2543 = vmatpush1.bf16.msra.mxu1 %v4590_v56  ;;  %2574 = vmatprep.mubr.bf16.mxu1 %v4854_v55 }
0x194e   :  { %2544 = vmatprep.subr.bf16.mxu1 %v4594_v59 }
0x1951   :  { %2545 = vmatpush1.bf16.msra.mxu1 %v4597_v60 }
0x1952   :  { %2546 = vmatprep.subr.bf16.mxu1 %v4600_v7 }
0x1955   :  { %2547 = vmatpush1.bf16.msra.mxu1 %v4603_v8 }
0x1956   :  { %2548 = vmatprep.subr.bf16.mxu1 %v4606_v62 }
0x1959   :  { %2549 = vmatpush1.bf16.msra.mxu1 %v4609_v18 }
0x195a   :  { %3599 = vmatprep.subr.bf16.mxu1 %v4856_v29 }
0x1a1f   :  { %v2452_v63 = vpop.f32.mrb[48].mxu1 }
0x1a20   :  { %v2453_v25 = vadd.f32 %v2452_v63, %v4913_v40  ;;  %v2454_v56 = vpop.f32.mrb[49].mxu1 }
0x1a21   :  { %v2455_v55 = vadd.f32 %v2454_v56, %v4914_v42  ;;  %v2456_v12 = vpop.f32.mrb[50].mxu1 }
0x1a22   :  { %v2461_v59 = vmul.f32 0.044715, %v2453_v25  ;;  %v2457_v17 = vpop.f32.mrb[51].mxu1  ;;  %v2459_v40 = vmul.f32 0.5, %v2453_v25  ;;  %v3809_v12 = vld [vmem:[#allocation2 + $0x438] ss:$12 sps:$4 sm:$0xff]  }
0x1a23   :  { %v2462_v60 = vmul.f32 0.044715, %v2455_v55  ;;  %v2460_v44 = vmul.f32 0.5, %v2455_v55 }
0x1a24   :  { %v2463_v20 = vmul.f32 %v2461_v59, %v2453_v25 }
0x1a25   :  { %v2464_v7 = vmul.f32 %v2462_v60, %v2455_v55 }
0x1a26   :  { %v2465_v1 = vmul.f32 %v2463_v20, %v2453_v25 }
0x1a27   :  { %v2466_v8 = vmul.f32 %v2464_v7, %v2455_v55 }
0x1a28   :  { %v2467_v51 = vadd.f32 %v2465_v1, %v2453_v25 }
0x1a29   :  { %v2468_v62 = vadd.f32 %v2466_v8, %v2455_v55 }
0x1a2a   :  { %v2469_v0 = vmul.f32 0.7978846, %v2467_v51 }
0x1a2b   :  { %v2470_v18 = vmul.f32 0.7978846, %v2468_v62 }
0x1a2c   :  { %3876 = vtanh.f32 %v2469_v0 }
0x1a2d   :  { %3878 = vtanh.f32 %v2470_v18 }
0x1a36   :  { %v3877_v10 = vpop.eup %3876 }
0x1a37   :  { %v3879_v37 = vpop.eup %3878  ;;  %v2473_v41 = vadd.f32 1.0, %v3877_v10 }
0x1a38   :  { %v2474_v42 = vadd.f32 1.0, %v3879_v37 }
0x1a39   :  { %v2475_v45 = vmul.f32 %v2473_v41, %v2459_v40 }
0x1a3a   :  { %v2476_v46 = vmul.f32 %v2474_v42, %v2460_v44 }
0x1a3b   :  { %v2477_v27 = vpack.c.bf16 %v2475_v45, %v2475_v45 }
0x1a3c   :  { %v2478_v31 = vpack.c.bf16 %v2476_v46, %v2476_v46 }
0x1a3e   :  { %2511 = vmatprep.mubr.bf16.mxu0 %v2478_v31 }
0x1a3f   :  { %2512 = vmatmul.mubr.bf16.vlgmr.msra.gmra.mrb[56].mxu0 %v2477_v27 }
0x1a40   :  { %3627 = vmatprep.mubr.msk.bf16.mxu0 %vm4029_vm3, %v4856_v29 }
0x1b12   :  { %v3314_v48 = vpop.f32.mrb[56].mxu0 }
0x1b13   :  { %v3315_v16 = vpop.f32.mrb[57].mxu0 }
0x1b14   :  { %v3316_v49 = vadd.f32 %v3315_v16, %v3314_v48  ;;  %v3317_v50 = vpop.f32.mrb[58].mxu0  ;;  %v3811_v16 = vld [vmem:[#allocation2 + $0x468] ss:$12 sps:$4 sm:$0xff]  }
0x1b15   :  { %v3318_v23 = vpop.f32.mrb[59].mxu0 }
0x1b16   :  { %v2514_v24 = vadd.f32 %v3970_v33, %v3316_v49 }
0x1b18   :  { %v2519_v13 = vadd.f32 %v2514_v24, %v2413_v28  ;;  %v186_v24 = vld [vmem:[#allocation4 + $0x1e] ss:$0 sm:$0xff] }
0x1b1a   :  { %v2520_v21 = vsel %vm963_vm6, %v2519_v13, 0.0  ;;  %v2524_v38 = vmul.f32 %v2519_v13, %v2519_v13 }
0x1b1b   :  { %2521 = vadd.xlane.f32.xlu0 %v2520_v21 }
0x1b1c   :  { %v2525_v14 = vsel %vm963_vm6, %v2524_v38, 0.0 }
0x1b1d   :  { %2526 = vadd.xlane.f32.xlu1 %v2525_v14 }
0x1ba8   :  { %v2522_v39 = vpop.xlane.xlu0 %2521 }
0x1ba9   :  { %v2523_v15 = vmul.f32 0.015625, %v2522_v39 }
0x1baa   :  { %v2527_v19 = vpop.xlane.xlu1 %2526 }
0x1bab   :  { %v2529_v53 = vmul.f32 %v2523_v15, %v2523_v15  ;;  %v2528_v30 = vmul.f32 0.015625, %v2527_v19  ;;  %v2532_v26 = vsub.f32 %v2519_v13, %v2523_v15 }
0x1bad   :  { %v2530_v11 = vsub.f32 %v2528_v30, %v2529_v53  ;;  %v3812_v53 = vld [vmem:[#allocation2 + $0x480] ss:$12 sps:$4 sm:$0xff]   ;;  %v3813_v30 = vld [vmem:[#allocation2 + $0x498] ss:$12 sps:$4 sm:$0xff]  }
0x1baf   :  { %v2531_v6 = vmax.f32 %v2530_v11, 0.0  ;;  %v3814_v11 = vld [vmem:[#allocation2 + $0x4b0] ss:$12 sps:$4 sm:$0xff]  }
0x1bb1   :  { %v2533_v9 = vadd.f32 1e-05, %v2531_v6  ;;  %v3815_v6 = vld [vmem:[#allocation2 + $0x4c8] ss:$12 sps:$4 sm:$0xff]  }
0x1bb3   :  { %3880 = vrsqrt.f32 %v2533_v9  ;;  %v3816_v9 = vld [vmem:[#allocation2 + $0x4e0] ss:$12 sps:$4 sm:$0xff]  }
0x1bbd   :  { %v3881_v54 = vpop.eup %3880 }
0x1bbe   :  { %v2535_v22 = vmul.f32 %v3881_v54, %v2532_v26  ;;  %v3817_v26 = vld [vmem:[#allocation2 + $0x4f8] ss:$12 sps:$4 sm:$0xff]   ;;  %v3818_v54 = vld [vmem:[#allocation2 + $0x510] ss:$12 sps:$4 sm:$0xff]  }
0x1bc0   :  { %v2536_v28 = vmul.f32 %v3971_v58, %v2535_v22 }
0x1bc2   :  { %v2537_v63 = vadd.f32 %v3972_v61, %v2536_v28 }
0x1bc4   :  { %v2538_v25 = vpack.c.bf16 %v2537_v63, %v2537_v63 }
0x1bc6   :  { %3125 = vmatmul.mubr.msk.bf16.vlgmr.msra.gmra.mrb[52].mxu1 %vm219_vm1, %v2538_v25 }
0x1bc7   :  { %3600 = vmatpush3.bf16.msra.mxu1 %v4615_v52  ;;  %3615 = vmatprep.mubr.msk.bf16.mxu1 %vm4029_vm3, %v4856_v29 }
0x1bc8   :  { %3601 = vmatprep.subr.bf16.mxu1 %v4856_v29 }
0x1bcb   :  { %3602 = vmatpush3.bf16.msra.mxu1 %v4621_v34 }
0x1bcc   :  { %3603 = vmatprep.subr.bf16.mxu1 %v4856_v29 }
0x1bcf   :  { %3604 = vmatpush3.bf16.msra.mxu1 %v4625_v2 }
0x1bd0   :  { %3605 = vmatprep.subr.bf16.mxu1 %v4856_v29 }
0x1bd3   :  { %3606 = vmatpush3.bf16.msra.mxu1 %v4629_v35 }
0x1bd4   :  { %3607 = vmatprep.subr.bf16.mxu1 %v4856_v29 }
0x1bd7   :  { %3608 = vmatpush3.bf16.msra.mxu1 %v4633_v3 }
0x1bd8   :  { %3609 = vmatprep.subr.bf16.mxu1 %v4856_v29 }
0x1bdb   :  { %3610 = vmatpush3.bf16.msra.mxu1 %v4637_v36 }
0x1bdc   :  { %3611 = vmatprep.subr.bf16.mxu1 %v4856_v29 }
0x1bdf   :  { %3612 = vmatpush3.bf16.msra.mxu1 %v4641_v4  ;;  %v3808_v4 = vld [vmem:[#allocation2 + $0x420] ss:$12 sps:$4 sm:$0xff]  }
0x1be0   :  { %3613 = vmatprep.subr.bf16.mxu1 %v4856_v29  ;;  %3620 = vmatpush3.bf16.msra.mxu0 %v3808_v4 }
0x1be1   :  { %3621 = vmatprep.subr.bf16.mxu0 %v4856_v29 }
0x1be3   :  { %3614 = vmatpush3.bf16.msra.mxu1 %v4645_v5  ;;  %v3810_v5 = vld [vmem:[#allocation2 + $0x450] ss:$12 sps:$4 sm:$0xff]  }
0x1be4   :  { %3643 = vmatprep.subr.bf16.mxu1 %v4856_v29  ;;  %3622 = vmatpush3.bf16.msra.mxu0 %v3809_v12 }
0x1be5   :  { %3623 = vmatprep.subr.bf16.mxu0 %v4856_v29 }
0x1be8   :  { %3624 = vmatpush3.bf16.msra.mxu0 %v3810_v5 }
0x1be9   :  { %3625 = vmatprep.subr.bf16.mxu0 %v4856_v29 }
0x1bec   :  { %3626 = vmatpush3.bf16.msra.mxu0 %v3811_v16 }
0x1bed   :  { %3631 = vmatprep.subr.bf16.mxu0 %v4856_v29 }
0x1c99   :  { %v2576_v52 = vpop.f32.mrb[52].mxu1 }
0x1c9a   :  { %v2582_v34 = vadd.f32 %v4664_v32, %v2576_v52  ;;  %v2578_v2 = vpop.f32.mrb[53].mxu1 }
0x1c9b   :  { %v2579_v35 = vpop.f32.mrb[54].mxu1 }
0x1c9c   :  { %v2580_v3 = vpop.f32.mrb[55].mxu1  ;;  %v2583_v56 = vsel %vm411_vm2, %v2582_v34, 0.0  ;;  %v2587_v55 = vmul.f32 %v2582_v34, %v2582_v34 }
0x1c9d   :  { %2584 = vadd.xlane.f32.xlu0 %v2583_v56  ;;  %v2728_v3 = vld [vmem:[#allocation4 + $0x1f] ss:$0 sm:$0xff] }
0x1c9e   :  { %v2588_v36 = vsel %vm411_vm2, %v2587_v55, 0.0  ;;  %v2729_v55 = vld [vmem:[#allocation4 + $0x30] ss:$0 sm:$0xff] }
0x1c9f   :  { %2589 = vadd.xlane.f32.xlu1 %v2588_v36 }
0x1d2a   :  { %v2585_v32 = vpop.xlane.xlu0 %2584 }
0x1d2b   :  { %v2586_v59 = vmul.f32 0.0078125, %v2585_v32 }
0x1d2c   :  { %v2590_v17 = vpop.xlane.xlu1 %2589 }
0x1d2d   :  { %v2592_v60 = vmul.f32 %v2586_v59, %v2586_v59  ;;  %v2591_v20 = vmul.f32 0.0078125, %v2590_v17  ;;  %v2595_v51 = vsub.f32 %v2582_v34, %v2586_v59 }
0x1d2f   :  { %v2593_v7 = vsub.f32 %v2591_v20, %v2592_v60 }
0x1d31   :  { %v2594_v1 = vmax.f32 %v2593_v7, 0.0 }
0x1d33   :  { %v2596_v8 = vadd.f32 1e-05, %v2594_v1 }
0x1d35   :  { %3882 = vrsqrt.f32 %v2596_v8 }
0x1d3f   :  { %v3883_v62 = vpop.eup %3882 }
0x1d40   :  { %v2598_v0 = vmul.f32 %v3883_v62, %v2595_v51  ;;  %v3819_v51 = vld [vmem:[#allocation2 + $0x528] ss:$12 sps:$4 sm:$0xff]   ;;  %v2988_v62 = vld [vmem:[%s4805_s0] sm:$0xff] }
0x1d41   :  { %2990 = vst.msk [vmem:[%s4808_s3] sm:$0xff] %vm219_vm1, %v2988_v62 }
0x1d42   :  { %v2599_v18 = vmul.f32 %v4673_v47, %v2598_v0  ;;  %v4031_v0 = vmov 1966171168  }
0x1d44   :  { %v2600_v10 = vadd.f32 %v4676_v43, %v2599_v18  ;;  %v2994_v18 = vunpack.c.l.s4 %v4031_v0 }
0x1d46   :  { %v2602_v37 = vmul.f32 0.044715, %v2600_v10  ;;  %v2601_v46 = vmul.f32 0.5, %v2600_v10 }
0x1d48   :  { %v2603_v40 = vmul.f32 %v2602_v37, %v2600_v10  ;;  %v2766_v37 = vld [vmem:[#allocation4 + $0x31] ss:$0 sm:$0xff] }
0x1d4a   :  { %v2604_v41 = vmul.f32 %v2603_v40, %v2600_v10  ;;  %v4915_v40 = vld [vmem:[#allocation36_spill] sm:$0xff] }
0x1d4c   :  { %v2605_v44 = vadd.f32 %v2604_v41, %v2600_v10  ;;  %v2995_v10 = vunpack.c.0.s8 %v2994_v18 }
0x1d4e   :  { %v2606_v42 = vmul.f32 0.7978846, %v2605_v44  ;;  %v2998_v41 = vsub.s32 %v2995_v10, %v4915_v40 }
0x1d50   :  { %3884 = vtanh.f32 %v2606_v42 }
0x1d5a   :  { %v3885_v45 = vpop.eup %3884 }
0x1d5b   :  { %v2608_v31 = vadd.f32 1.0, %v3885_v45 }
0x1d5d   :  { %v2609_v27 = vmul.f32 %v2608_v31, %v2601_v46 }
0x1d5f   :  { %v2610_v48 = vpack.c.bf16 %v2609_v27, %v2609_v27 }
0x1d61   :  { %3616 = vmatmul.mubr.bf16.vlgmr.msra.gmra.mrb[56].mxu1 %v2610_v48 }
0x1d62   :  { %3651 = vmatprep.mubr.msk.bf16.mxu1 %vm4029_vm3, %v4856_v29  ;;  %3644 = vmatpush3.bf16.msra.mxu1 %v3816_v9 }
0x1d63   :  { %3645 = vmatprep.subr.bf16.mxu1 %v4856_v29 }
0x1d66   :  { %3646 = vmatpush3.bf16.msra.mxu1 %v3817_v26 }
0x1d67   :  { %3647 = vmatprep.subr.bf16.mxu1 %v4856_v29 }
0x1d6a   :  { %3648 = vmatpush3.bf16.msra.mxu1 %v3818_v54 }
0x1d6b   :  { %3649 = vmatprep.subr.bf16.mxu1 %v4856_v29 }
0x1d6e   :  { %3650 = vmatpush3.bf16.msra.mxu1 %v3819_v51 }
0x1e34   :  { %v2645_v47 = vpop.f32.mrb[56].mxu1 }
0x1e35   :  { %v2646_v43 = vadd.f32 %v4684_v57, %v2645_v47  ;;  %v3617_v49 = vpop.f32.mrb[57].mxu1 }
0x1e36   :  { %v2648_v50 = vpop.f32.mrb[58].mxu1  ;;  %v3820_v49 = vld [vmem:[#allocation2 + $0x540] ss:$12 sps:$4 sm:$0xff]  }
0x1e37   :  { %v2659_v23 = vpack.c.bf16 %v2646_v43, %v2646_v43  ;;  %v3618_v33 = vpop.f32.mrb[59].mxu1  ;;  %v3821_v50 = vld [vmem:[#allocation2 + $0x558] ss:$12 sps:$4 sm:$0xff]  }
0x1e39   :  { %3628 = vmatmul.mubr.msk.bf16.vlgmr.msra.gmra.mrb[0].mxu0 %vm219_vm1, %v2659_v23  ;;  %v2843_v23 = vld [vmem:[#allocation4 + $0x32] ss:$0 sm:$0xff] }
0x1e3a   :  { %3639 = vmatprep.mubr.msk.bf16.mxu0 %vm4029_vm3, %v4856_v29  ;;  %3632 = vmatpush3.bf16.msra.mxu0 %v3812_v53 }
0x1e3b   :  { %3633 = vmatprep.subr.bf16.mxu0 %v4856_v29 }
0x1e3e   :  { %3634 = vmatpush3.bf16.msra.mxu0 %v3813_v30 }
0x1e3f   :  { %3635 = vmatprep.subr.bf16.mxu0 %v4856_v29 }
0x1e42   :  { %3636 = vmatpush3.bf16.msra.mxu0 %v3814_v11 }
0x1e43   :  { %3637 = vmatprep.subr.bf16.mxu0 %v4856_v29 }
0x1e46   :  { %3638 = vmatpush3.bf16.msra.mxu0 %v3815_v6 }
0x1e47   :  { %3655 = vmatprep.subr.bf16.mxu0 %v4856_v29 }
0x1f0c   :  { %v2721_v13 = vpop.f32.mrb[0].mxu0 }
0x1f0d   :  { %v3699_v21 = vadd.f32 %v2721_v13, %v186_v24  ;;  %v3629_v38 = vpop.f32.mrb[1].mxu0 }
0x1f0e   :  { %v2724_v14 = vpop.f32.mrb[2].mxu0 }
0x1f0f   :  { %v3630_v39 = vpop.f32.mrb[3].mxu0  ;;  %v2730_v15 = vsel %vm963_vm6, %v3699_v21, 0.0  ;;  %v2734_v19 = vmul.f32 %v3699_v21, %v3699_v21 }
0x1f10   :  { %2731 = vadd.xlane.f32.xlu0 %v2730_v15 }
0x1f11   :  { %v2735_v57 = vsel %vm963_vm6, %v2734_v19, 0.0 }
0x1f12   :  { %2736 = vadd.xlane.f32.xlu1 %v2735_v57 }
0x1f9d   :  { %v2732_v22 = vpop.xlane.xlu0 %2731 }
0x1f9e   :  { %v2733_v58 = vmul.f32 0.015625, %v2732_v22 }
0x1f9f   :  { %v2737_v28 = vpop.xlane.xlu1 %2736 }
0x1fa0   :  { %v2739_v61 = vmul.f32 %v2733_v58, %v2733_v58  ;;  %v2738_v63 = vmul.f32 0.015625, %v2737_v28  ;;  %v2742_v2 = vsub.f32 %v3699_v21, %v2733_v58 }
0x1fa2   :  { %v2740_v25 = vsub.f32 %v2738_v63, %v2739_v61 }
0x1fa4   :  { %v2741_v52 = vmax.f32 %v2740_v25, 0.0 }
0x1fa6   :  { %v2743_v34 = vadd.f32 1e-05, %v2741_v52 }
0x1fa8   :  { %3886 = vrsqrt.f32 %v2743_v34 }
0x1fb2   :  { %v3887_v35 = vpop.eup %3886 }
0x1fb3   :  { %v2745_v56 = vmul.f32 %v3887_v35, %v2742_v2 }
0x1fb5   :  { %v2746_v36 = vmul.f32 %v2745_v56, %v2728_v3 }
0x1fb7   :  { %v2747_v4 = vadd.f32 %v2746_v36, %v2729_v55 }
0x1fb9   :  { %v2749_v12 = vmul.f32 0.044715, %v2747_v4  ;;  %v2748_v20 = vmul.f32 0.5, %v2747_v4 }
0x1fbb   :  { %v2750_v5 = vmul.f32 %v2749_v12, %v2747_v4 }
0x1fbd   :  { %v2751_v32 = vmul.f32 %v2750_v5, %v2747_v4 }
0x1fbf   :  { %v2752_v59 = vadd.f32 %v2751_v32, %v2747_v4 }
0x1fc1   :  { %v2753_v17 = vmul.f32 0.7978846, %v2752_v59 }
0x1fc3   :  { %3888 = vtanh.f32 %v2753_v17 }
0x1fcd   :  { %v3889_v60 = vpop.eup %3888 }
0x1fce   :  { %v2755_v7 = vadd.f32 1.0, %v3889_v60 }
0x1fd0   :  { %v2756_v1 = vmul.f32 %v2755_v7, %v2748_v20 }
0x1fd2   :  { %v2765_v8 = vpack.c.bf16 %v2756_v1, %v2756_v1 }
0x1fd4   :  { %3640 = vmatmul.mubr.msk.bf16.vlgmr.msra.gmra.mrb[60].mxu0 %vm219_vm1, %v2765_v8 }
0x1fd5   :  { %3659 = vmatprep.mubr.msk.bf16.mxu0 %vm4029_vm3, %v4856_v29  ;;  %3656 = vmatpush3.bf16.msra.mxu0 %v3820_v49 }
0x1fd6   :  { %3657 = vmatprep.subr.bf16.mxu0 %v4856_v29  ;;  %v2925_v29 = vld [vmem:[#allocation4 + $0x33] ss:$0 sm:$0xff] }
0x1fd9   :  { %3658 = vmatpush3.bf16.msra.mxu0 %v3821_v50 }
0x20a7   :  { %v2828_v44 = vpop.f32.mrb[60].mxu0 }
0x20a8   :  { %v2829_v42 = vadd.f32 %v2828_v44, %v2766_v37  ;;  %v3641_v45 = vpop.f32.mrb[61].mxu0 }
0x20a9   :  { %v2831_v46 = vpop.f32.mrb[62].mxu0 }
0x20aa   :  { %v2842_v31 = vpack.c.bf16 %v2829_v42, %v2829_v42  ;;  %v2999_v27 = vrot.slane %v2829_v42, %v2998_v41  ;;  %v3642_v48 = vpop.f32.mrb[63].mxu0 }
0x20ac   :  { %v3000_v16 = vcombine.high %v2999_v27, %v2999_v27  ;;  %v3007_v47 = vrot.slane %v2999_v27, %v2998_v41  ;;  %3652 = vmatmul.mubr.msk.bf16.vlgmr.msra.gmra.mrb[60].mxu1 %vm219_vm1, %v2842_v31 }
0x20ae   :  { %v3014_v43 = vrot.slane %v3000_v16, %v2998_v41  ;;  %3018 = vst.msk [vmem:[%s4808_s3] sm:$0x1] %vm3017_vm7, %v3007_v47 }
0x20b0   :  { %3019 = vst.msk [vmem:[%s4808_s3 + $0x8] sm:$0x1] %vm3017_vm7, %v3014_v43 }
0x217f   :  { %v2905_v33 = vpop.f32.mrb[60].mxu1 }
0x2180   :  { %v2906_v24 = vadd.f32 %v2905_v33, %v2843_v23  ;;  %v3653_v13 = vpop.f32.mrb[61].mxu1 }
0x2181   :  { %v2908_v21 = vpop.f32.mrb[62].mxu1 }
0x2182   :  { %v2912_v38 = vmul.f32 0.044715, %v2906_v24  ;;  %v3654_v14 = vpop.f32.mrb[63].mxu1  ;;  %v2911_v30 = vmul.f32 0.5, %v2906_v24 }
0x2184   :  { %v2913_v39 = vmul.f32 %v2912_v38, %v2906_v24 }
0x2186   :  { %v2914_v15 = vmul.f32 %v2913_v39, %v2906_v24 }
0x2188   :  { %v2915_v19 = vadd.f32 %v2914_v15, %v2906_v24 }
0x218a   :  { %v2916_v57 = vmul.f32 0.7978846, %v2915_v19 }
0x218c   :  { %3890 = vtanh.f32 %v2916_v57 }
0x2196   :  { %v3891_v53 = vpop.eup %3890 }
0x2197   :  { %v2918_v11 = vadd.f32 1.0, %v3891_v53 }
0x2199   :  { %v2919_v6 = vmul.f32 %v2918_v11, %v2911_v30 }
0x219b   :  { %v2924_v9 = vpack.c.bf16 %v2919_v6, %v2919_v6 }
0x219d   :  { %3660 = vmatmul.mubr.msk.bf16.vlgmr.msra.gmra.mrb[64].mxu0 %vm2938_vm8, %v2924_v9 }
0x2270   :  { %v2976_v26 = vpop.f32.mrb[64].mxu0 }
0x2271   :  { %v2977_v54 = vadd.f32 %v2976_v26, %v2925_v29  ;;  %v3661_v22 = vpop.f32.mrb[65].mxu0 }
0x2272   :  { %v2979_v58 = vpop.f32.mrb[66].mxu0 }
0x2273   :  { %v2982_v28 = vsub.f32 0.0, %v2977_v54  ;;  %v3662_v61 = vpop.f32.mrb[67].mxu0 }
0x2275   :  { %v2983_v63 = vmul.f32 1.442695, %v2982_v28 }
0x2277   :  { %3892 = vpow2.f32 %v2983_v63 }
0x2281   :  { %v3893_v25 = vpop.eup %3892 }
0x2282   :  { %v2985_v52 = vadd.f32 1.0, %v3893_v25 }
0x2284   :  { %3894 = vrcp.f32 %v2985_v52 }
0x228e   :  { %v3895_v34 = vpop.eup %3894 }
0x228f   :  { %3022 = vperm.xlu0 %3727, %v3895_v34  }
0x230e   :  { %v3023_v2 = vpop.permute.xlu0 %3022 }
0x230f   :  { %3025 = vst.msk [vmem:[%s4809_s4] sm:$0x3] %vm963_vm6, %v3023_v2 }
0x2310   :  { %3034 = vsyncpa [#allocation3], 1 }
0x2311   :  { %3035 = vsyncpa [#allocation5], 1 }

</bundles_post_ra>
